<compile_context>
chip_gen: v6e
topology: v6e:2x2x1
jax: 0.10.0
libtpu: 0.0.40
codegen_flags: <defaults>
</compile_context>

<pallas_src>
import functools

import numpy as np
import jax
import jax.numpy as jnp
from jax.experimental import pallas as pl
from jax.experimental.pallas import tpu as pltpu

C = 128          # feature width (module default)
K = 5            # cube size (module default)
Q = 1            # n_scale (module default)
NEG_SLOPE = 0.2
CUBE = Q * K ** 3  # 125 flattened conv taps


def _lrelu(x):
    # leaky_relu(x, 0.2) == max(x, 0.2*x) for slope < 1 (mul+max, 2 VPU ops/elem)
    return jnp.maximum(x, NEG_SLOPE * x)


# ----------------------------------------------------------------------------
# Pallas kernel: fused conv-as-matmul + localfc + fc1 + fc2 + fc3 (+ leaky_relu)
# ----------------------------------------------------------------------------
# NOTE: this single path is tuned for v6e/v7x (256x256 MXU). On v5e (4x128^2 MXU)
# the block-diag K=256 dot and the fused K=256 fc2 would ideally be split into
# K=128 dots; not done here to keep one verified code path.
def node_feature_kernel(xin_ref, wblk_ref, bblk_ref,
                        wlfc_ref, blfc_ref,
                        w2_ref, b2_ref,
                        w3_ref, b3_ref,
                        out_ref):
    f32 = jnp.float32
    bf16 = jnp.bfloat16

    # block-diagonal K=256 matmul: lanes 0:128 -> conv pre-act, 128:256 -> fc1 pre-act
    # bias + leaky_relu + bf16 cast fused in one epilogue pass.
    z0 = _lrelu(jnp.dot(xin_ref[...], wblk_ref[...],
                        preferred_element_type=f32) + bblk_ref[...]).astype(bf16)
    zc = z0[:, :C]                                   # conv branch (aligned 128-lane slice)
    zp = z0[:, C:]                                   # point branch (fc1 output), bf16

    # local branch: localfc on the conv output
    zl = _lrelu(jnp.dot(zc, wlfc_ref[...],
                        preferred_element_type=f32) + blfc_ref[...]).astype(bf16)

    # fc2 as one MXU-native K=256 contraction on bf16 [z_point | z_local]
    # (lane-aligned 128-lane concat of bf16 halves -- half the bytes vs f32).
    z2in = jnp.concatenate([zp, zl], axis=-1)
    z = _lrelu(jnp.dot(z2in, w2_ref[...],
                       preferred_element_type=f32) + b2_ref[...]).astype(bf16)

    # fc3
    z = _lrelu(jnp.dot(z, w3_ref[...],
                       preferred_element_type=f32) + b3_ref[...])
    out_ref[...] = z.astype(out_ref.dtype)           # bf16 store


def node_feature_forward(xin, kargs, m, *, tm=512, out_dtype=jnp.bfloat16):
    """xin: (m_pad, 2C) bf16 packed rows = [cube(125) | 0 | v,normal(6) | 0].

    Output has the exact (m, 2C) shape: the ragged last tile is clipped by Pallas
    partial-block stores (no jnp.pad / out[:m] HBM round trips).
    """
    m_pad = xin.shape[0]
    grid = pl.cdiv(m, tm)
    assert m_pad == grid * tm, "pack_inputs must pad to a tile multiple"

    def full(shape):
        return pl.BlockSpec(shape, lambda i: (0, 0))   # grid-invariant (resident)

    w_elems = 2 * C * 2 * C + C * C + 2 * C * 4 * C + 4 * C * 2 * C
    flops = 2 * m_pad * w_elems
    bytes_accessed = (m_pad * 2 * C * 2          # bf16 input
                      + m * 2 * C * 2            # bf16 output
                      + w_elems * 2              # bf16 weights
                      + (2 * C + C + 4 * C + 2 * C) * 4)  # f32 biases

    grid_spec = pltpu.PrefetchScalarGridSpec(
        num_scalar_prefetch=0,
        grid=(grid,),
        in_specs=[
            pl.BlockSpec((tm, 2 * C), lambda i: (i, 0)),     # packed activations
            full((2 * C, 2 * C)), full((1, 2 * C)),          # block-diag conv/fc1
            full((C, C)), full((1, C)),                      # localfc
            full((2 * C, 4 * C)), full((1, 4 * C)),          # fc2 (fused K=256)
            full((4 * C, 2 * C)), full((1, 2 * C)),          # fc3
        ],
        out_specs=pl.BlockSpec((tm, 2 * C), lambda i: (i, 0)),
    )
    out = pl.pallas_call(
        node_feature_kernel,
        out_shape=jax.ShapeDtypeStruct((m, 2 * C), out_dtype),   # exact shape, no slice
        grid_spec=grid_spec,
        compiler_params=pltpu.CompilerParams(
            dimension_semantics=("parallel",),
            vmem_limit_bytes=32 * 1024 * 1024),
        cost_estimate=pl.CostEstimate(flops=flops, transcendentals=0,
                                      bytes_accessed=bytes_accessed),
    )(xin, *kargs)
    return out


# ----------------------------------------------------------------------------
# Glue (plain JAX): geometry + sampling pieces that feed the kernel.
# ----------------------------------------------------------------------------
def vertex_normals(verts, faces):
    # Reproduces pytorch3d Meshes.verts_normals_packed (area-weighted scatter-add,
    # then normalize with eps=1e-6).
    v0 = verts[faces[:, 0]]
    v1 = verts[faces[:, 1]]
    v2 = verts[faces[:, 2]]
    n = jnp.zeros_like(verts)
    n = n.at[faces[:, 1]].add(jnp.cross(v2 - v1, v0 - v1))
    n = n.at[faces[:, 2]].add(jnp.cross(v0 - v2, v1 - v2))
    n = n.at[faces[:, 0]].add(jnp.cross(v1 - v0, v2 - v0))
    norm = jnp.linalg.norm(n, axis=1, keepdims=True)
    return n / jnp.maximum(norm, 1e-6)


def grid_sample_3d(vol, coords):
    # TODO(synk): data-dependent trilinear gather (F.grid_sample, border padding,
    # align_corners=True) stays in plain JAX; no clean Pallas TPU gather.
    D1, D2, D3 = vol.shape
    gx, gy, gz = coords[:, 0], coords[:, 1], coords[:, 2]   # (x->W, y->H, z->D)
    ix = jnp.clip((gx + 1.0) * 0.5 * (D3 - 1), 0.0, D3 - 1.0)
    iy = jnp.clip((gy + 1.0) * 0.5 * (D2 - 1), 0.0, D2 - 1.0)
    iz = jnp.clip((gz + 1.0) * 0.5 * (D1 - 1), 0.0, D1 - 1.0)
    x0 = jnp.floor(ix); y0 = jnp.floor(iy); z0 = jnp.floor(iz)
    wx = ix - x0; wy = iy - y0; wz = iz - z0

    def gather(z, y, x):
        zi = jnp.clip(z, 0, D1 - 1).astype(jnp.int32)
        yi = jnp.clip(y, 0, D2 - 1).astype(jnp.int32)
        xi = jnp.clip(x, 0, D3 - 1).astype(jnp.int32)
        return vol[zi, yi, xi]

    c000 = gather(z0, y0, x0);     c001 = gather(z0, y0, x0 + 1)
    c010 = gather(z0, y0 + 1, x0); c011 = gather(z0, y0 + 1, x0 + 1)
    c100 = gather(z0 + 1, y0, x0);     c101 = gather(z0 + 1, y0, x0 + 1)
    c110 = gather(z0 + 1, y0 + 1, x0); c111 = gather(z0 + 1, y0 + 1, x0 + 1)

    c00 = c000 * (1 - wx) + c001 * wx
    c01 = c010 * (1 - wx) + c011 * wx
    c10 = c100 * (1 - wx) + c101 * wx
    c11 = c110 * (1 - wx) + c111 * wx
    c0 = c00 * (1 - wy) + c01 * wy
    c1 = c10 * (1 - wy) + c11 * wy
    return c0 * (1 - wz) + c1 * wz


def make_x_shift():
    # note: -K//2 == -3 for K=5 (torch quirk intentionally preserved)
    grid = np.linspace(-K // 2, K // 2, K)
    grid_3d = np.stack(np.meshgrid(grid, grid, grid), axis=0).transpose(2, 1, 3, 0)
    return jnp.asarray(grid_3d.reshape(-1, 3), jnp.float32)   # (K^3, 3)


def cube_sampling(v, Vq, x_shift, rescale, D):
    # v: (1, m, 3) -> cube features (m, Q*K^3), order matches (m, Q, K, K, K) flatten
    m = v.shape[1]
    per_q = []
    for q in range(Q):
        xq = v[:, :, None, :] + x_shift[None, None] / D * 2.0 * (2 ** q)  # (1,m,K^3,3)
        xq = xq.reshape(-1, 3) / rescale
        samp = grid_sample_3d(Vq[q][0, 0], xq)                            # (m*K^3,)
        per_q.append(samp.reshape(m, K ** 3))
    return jnp.stack(per_q, axis=1).reshape(m, Q * K ** 3)


def make_params(key):
    def linear(k, fan_in, fan_out):
        bound = 1.0 / np.sqrt(fan_in)
        kw, kb = jax.random.split(k)
        w = jax.random.uniform(kw, (fan_out, fan_in), jnp.float32, -bound, bound)
        b = jax.random.uniform(kb, (fan_out,), jnp.float32, -bound, bound)
        return w, b

    ks = jax.random.split(key, 5)
    p = {}
    p['w1'], p['b1'] = linear(ks[0], 6, C)                     # fc1
    p['w2'], p['b2'] = linear(ks[1], 2 * C, 4 * C)             # fc2
    p['w3'], p['b3'] = linear(ks[2], 4 * C, 2 * C)             # fc3
    p['wconv'], p['bconv'] = linear(ks[3], Q * K ** 3, C)      # Conv3d flattened (C, Q*K^3)
    p['wlfc'], p['blfc'] = linear(ks[4], C, C)                 # localfc
    return p


def pack_inputs(cube, x6, m_pad):
    """Pack [cube(125) | 0 | v,normal(6) | 0] into one lane-dense (m_pad, 256) bf16
    slab, built directly at the padded size (no separate jnp.pad pass)."""
    m = cube.shape[0]
    xin = jnp.zeros((m_pad, 2 * C), jnp.bfloat16)
    xin = xin.at[:m, :CUBE].set(cube.astype(jnp.bfloat16))
    xin = xin.at[:m, C:C + 6].set(x6.astype(jnp.bfloat16))
    return xin


def pack_kernel_args(p):
    bf16 = jnp.bfloat16
    # block-diagonal diag(wconv^T, w1^T): (256, 256)
    wblk = jnp.zeros((2 * C, 2 * C), jnp.float32)
    wblk = wblk.at[:CUBE, :C].set(p['wconv'].T)
    wblk = wblk.at[C:C + 6, C:].set(p['w1'].T)
    bblk = jnp.concatenate([p['bconv'], p['b1']]).reshape(1, 2 * C)
    return (
        wblk.astype(bf16), bblk,                               # fused conv/fc1
        p['wlfc'].T.astype(bf16), p['blfc'].reshape(1, C),     # localfc
        p['w2'].T.astype(bf16), p['b2'].reshape(1, 4 * C),     # fc2 (full K=256)
        p['w3'].T.astype(bf16), p['b3'].reshape(1, 2 * C),     # fc3
    )


@functools.partial(jax.jit, static_argnames=("tm",))
def node_feature_net_forward(v, faces, V, params, tm=512):
    """Full NodeFeatureNet.forward: set_data geometry + cube sampling + fused MLP
    kernel, all under one jit so XLA fuses the packing into the gather epilogues."""
    D1, D2, D3 = V.shape[2], V.shape[3], V.shape[4]
    D = max(D1, D2, D3)
    rescale = jnp.array([D3 / D, D2 / D, D1 / D], jnp.float32)
    x_shift = make_x_shift()
    Vq = [V]                      # Q == 1, no pooled pyramid levels

    m = v.shape[1]
    cube = cube_sampling(v, Vq, x_shift, rescale, D)                    # (m, 125)
    normal = vertex_normals(v[0], faces)                                # (m, 3)
    x6 = jnp.concatenate([v[0], normal], axis=1)                        # (m, 6)

    m_pad = pl.cdiv(m, tm) * tm
    xin = pack_inputs(cube, x6, m_pad)                                  # (m_pad, 256) bf16
    kargs = pack_kernel_args(params)

    out = node_feature_forward(xin, kargs, m, tm=tm)                    # (m, 2C) bf16
    return out.reshape(1, m, 2 * C)                                     # torch shape (1, m, 2C)


def reference_forward(cube, x6, p):
    def lr(x):
        return jnp.where(x > 0, x, NEG_SLOPE * x)
    zl = lr(cube @ p['wconv'].T + p['bconv'])
    zl = lr(zl @ p['wlfc'].T + p['blfc'])
    zp = lr(x6 @ p['w1'].T + p['b1'])
    z = jnp.concatenate([zp, zl], axis=1)
    z = lr(z @ p['w2'].T + p['b2'])
    z = lr(z @ p['w3'].T + p['b3'])
    return z


if __name__ == "__main__":
    key = jax.random.PRNGKey(0)
    kv, kf, kvol, kp = jax.random.split(key, 4)

    m = 2000                      # mesh vertices (deliberately not a tile multiple)
    n_faces = 4096
    D1 = D2 = D3 = 16             # volume size

    v = jax.random.uniform(kv, (1, m, 3), jnp.float32, -0.8, 0.8)       # verts
    faces = jax.random.randint(kf, (n_faces, 3), 0, m)                  # triangle indices
    V = jax.random.uniform(kvol, (1, 1, D1, D2, D3), jnp.float32)       # intensity volume

    params = make_params(kp)

    # --- fused forward (jit: glue + Pallas kernel) ---
    out = node_feature_net_forward(v, faces, V, params, tm=512)         # (1, m, 2C) bf16
    out = jax.block_until_ready(out)
    assert out.shape == (1, m, 2 * C)

    # --- reference (plain JAX, f32) ---
    D = max(D1, D2, D3)
    rescale = jnp.array([D3 / D, D2 / D, D1 / D], jnp.float32)
    x_shift = make_x_shift()
    cube = cube_sampling(v, [V], x_shift, rescale, D)
    normal = vertex_normals(v[0], faces)
    x6 = jnp.concatenate([v[0], normal], axis=1)
    ref = reference_forward(cube, x6, params)

    # bf16 matmul inputs + bf16 output vs f32 reference: loosened tolerance
    got = np.asarray(out[0].astype(jnp.float32))
    np.testing.assert_allclose(got, np.asarray(ref), rtol=3e-2, atol=3e-2)
    print("KERNEL_OK")
</pallas_src>

<mosaic_0001>
module attributes {stable_mosaic.version = 11 : i64} {
  func.func @node_feature_kernel(%arg0: i32, %arg1: memref<512x256xbf16, #tpu.memory_space<vmem>>, %arg2: memref<256x256xbf16, #tpu.memory_space<vmem>>, %arg3: memref<1x256xf32, #tpu.memory_space<vmem>>, %arg4: memref<128x128xbf16, #tpu.memory_space<vmem>>, %arg5: memref<1x128xf32, #tpu.memory_space<vmem>>, %arg6: memref<256x512xbf16, #tpu.memory_space<vmem>>, %arg7: memref<1x512xf32, #tpu.memory_space<vmem>>, %arg8: memref<512x256xbf16, #tpu.memory_space<vmem>>, %arg9: memref<1x256xf32, #tpu.memory_space<vmem>>, %arg10: memref<512x256xbf16, #tpu.memory_space<vmem>>) attributes {dimension_semantics = [#tpu.dimension_semantics<parallel>], iteration_bounds = array<i64: 4>, scalar_prefetch = 0 : i64, scratch_operands = 0 : i64, tpu.core_type = #tpu.core_type<tc>, window_params = [{transform_indices = @transform_0, window_bounds = array<i64: 512, 256>}, {pipeline_mode = #tpu.pipeline_mode<synchronous>, transform_indices = @transform_1, window_bounds = array<i64: 256, 256>}, {pipeline_mode = #tpu.pipeline_mode<synchronous>, transform_indices = @transform_2, window_bounds = array<i64: 1, 256>}, {pipeline_mode = #tpu.pipeline_mode<synchronous>, transform_indices = @transform_3, window_bounds = array<i64: 128, 128>}, {pipeline_mode = #tpu.pipeline_mode<synchronous>, transform_indices = @transform_4, window_bounds = array<i64: 1, 128>}, {pipeline_mode = #tpu.pipeline_mode<synchronous>, transform_indices = @transform_5, window_bounds = array<i64: 256, 512>}, {pipeline_mode = #tpu.pipeline_mode<synchronous>, transform_indices = @transform_6, window_bounds = array<i64: 1, 512>}, {pipeline_mode = #tpu.pipeline_mode<synchronous>, transform_indices = @transform_7, window_bounds = array<i64: 512, 256>}, {pipeline_mode = #tpu.pipeline_mode<synchronous>, transform_indices = @transform_8, window_bounds = array<i64: 1, 256>}, {transform_indices = @transform_9, window_bounds = array<i64: 512, 256>}]} {
    %c0 = arith.constant 0 : index
    %c0_0 = arith.constant 0 : index
    %0 = vector.load %arg1[%c0, %c0_0] : memref<512x256xbf16, #tpu.memory_space<vmem>>, vector<512x256xbf16>
    %c0_1 = arith.constant 0 : index
    %c0_2 = arith.constant 0 : index
    %1 = vector.load %arg2[%c0_1, %c0_2] : memref<256x256xbf16, #tpu.memory_space<vmem>>, vector<256x256xbf16>
    %cst = arith.constant dense<0.000000e+00> : vector<512x256xf32>
    %2 = tpu.matmul %0, %1, %cst {dimension_numbers = #tpu.dot_dimension_numbers<[1], [0], [0], [1], [0, 0, 1, 1], [], []>} : vector<512x256xbf16>, vector<256x256xbf16>, vector<512x256xf32> -> vector<512x256xf32>
    %c0_3 = arith.constant 0 : index
    %c0_4 = arith.constant 0 : index
    %3 = vector.load %arg3[%c0_3, %c0_4] : memref<1x256xf32, #tpu.memory_space<vmem>>, vector<1x256xf32>
    %4 = vector.broadcast %3 : vector<1x256xf32> to vector<512x256xf32>
    %5 = arith.addf %2, %4 : vector<512x256xf32>
    %cst_5 = arith.constant 2.000000e-01 : f32
    %6 = vector.broadcast %cst_5 : f32 to vector<512x256xf32>
    %7 = arith.mulf %6, %5 : vector<512x256xf32>
    %8 = arith.maximumf %5, %7 : vector<512x256xf32>
    %9 = arith.truncf %8 : vector<512x256xf32> to vector<512x256xbf16>
    %10 = vector.extract_strided_slice %9 {offsets = [0, 0], sizes = [512, 128], strides = [1, 1]} : vector<512x256xbf16> to vector<512x128xbf16>
    %11 = vector.extract_strided_slice %9 {offsets = [0, 128], sizes = [512, 128], strides = [1, 1]} : vector<512x256xbf16> to vector<512x128xbf16>
    %c0_6 = arith.constant 0 : index
    %c0_7 = arith.constant 0 : index
    %12 = vector.load %arg4[%c0_6, %c0_7] : memref<128x128xbf16, #tpu.memory_space<vmem>>, vector<128x128xbf16>
    %cst_8 = arith.constant dense<0.000000e+00> : vector<512x128xf32>
    %13 = tpu.matmul %10, %12, %cst_8 {dimension_numbers = #tpu.dot_dimension_numbers<[1], [0], [0], [1], [0, 0, 1, 1], [], []>} : vector<512x128xbf16>, vector<128x128xbf16>, vector<512x128xf32> -> vector<512x128xf32>
    %c0_9 = arith.constant 0 : index
    %c0_10 = arith.constant 0 : index
    %14 = vector.load %arg5[%c0_9, %c0_10] : memref<1x128xf32, #tpu.memory_space<vmem>>, vector<1x128xf32>
    %15 = vector.broadcast %14 : vector<1x128xf32> to vector<512x128xf32>
    %16 = arith.addf %13, %15 : vector<512x128xf32>
    %cst_11 = arith.constant 2.000000e-01 : f32
    %17 = vector.broadcast %cst_11 : f32 to vector<512x128xf32>
    %18 = arith.mulf %17, %16 : vector<512x128xf32>
    %19 = arith.maximumf %16, %18 : vector<512x128xf32>
    %20 = arith.truncf %19 : vector<512x128xf32> to vector<512x128xbf16>
    %21 = tpu.concatenate %11, %20 in 1 : vector<512x128xbf16>, vector<512x128xbf16> -> vector<512x256xbf16>
    %c0_12 = arith.constant 0 : index
    %c0_13 = arith.constant 0 : index
    %22 = vector.load %arg6[%c0_12, %c0_13] : memref<256x512xbf16, #tpu.memory_space<vmem>>, vector<256x512xbf16>
    %cst_14 = arith.constant dense<0.000000e+00> : vector<512x512xf32>
    %23 = tpu.matmul %21, %22, %cst_14 {dimension_numbers = #tpu.dot_dimension_numbers<[1], [0], [0], [1], [0, 0, 1, 1], [], []>} : vector<512x256xbf16>, vector<256x512xbf16>, vector<512x512xf32> -> vector<512x512xf32>
    %c0_15 = arith.constant 0 : index
    %c0_16 = arith.constant 0 : index
    %24 = vector.load %arg7[%c0_15, %c0_16] : memref<1x512xf32, #tpu.memory_space<vmem>>, vector<1x512xf32>
    %25 = vector.broadcast %24 : vector<1x512xf32> to vector<512x512xf32>
    %26 = arith.addf %23, %25 : vector<512x512xf32>
    %cst_17 = arith.constant 2.000000e-01 : f32
    %27 = vector.broadcast %cst_17 : f32 to vector<512x512xf32>
    %28 = arith.mulf %27, %26 : vector<512x512xf32>
    %29 = arith.maximumf %26, %28 : vector<512x512xf32>
    %30 = arith.truncf %29 : vector<512x512xf32> to vector<512x512xbf16>
    %c0_18 = arith.constant 0 : index
    %c0_19 = arith.constant 0 : index
    %31 = vector.load %arg8[%c0_18, %c0_19] : memref<512x256xbf16, #tpu.memory_space<vmem>>, vector<512x256xbf16>
    %cst_20 = arith.constant dense<0.000000e+00> : vector<512x256xf32>
    %32 = tpu.matmul %30, %31, %cst_20 {dimension_numbers = #tpu.dot_dimension_numbers<[1], [0], [0], [1], [0, 0, 1, 1], [], []>} : vector<512x512xbf16>, vector<512x256xbf16>, vector<512x256xf32> -> vector<512x256xf32>
    %c0_21 = arith.constant 0 : index
    %c0_22 = arith.constant 0 : index
    %33 = vector.load %arg9[%c0_21, %c0_22] : memref<1x256xf32, #tpu.memory_space<vmem>>, vector<1x256xf32>
    %34 = vector.broadcast %33 : vector<1x256xf32> to vector<512x256xf32>
    %35 = arith.addf %32, %34 : vector<512x256xf32>
    %cst_23 = arith.constant 2.000000e-01 : f32
    %36 = vector.broadcast %cst_23 : f32 to vector<512x256xf32>
    %37 = arith.mulf %36, %35 : vector<512x256xf32>
    %38 = arith.maximumf %35, %37 : vector<512x256xf32>
    %39 = arith.truncf %38 : vector<512x256xf32> to vector<512x256xbf16>
    %c0_24 = arith.constant 0 : index
    %c0_25 = arith.constant 0 : index
    %40 = vector.load %arg10[%c0_24, %c0_25] : memref<512x256xbf16, #tpu.memory_space<vmem>>, vector<512x256xbf16>
    tpu.vector_store %arg10[%c0_24, %c0_25], %39 {strides = array<i32>} : memref<512x256xbf16, #tpu.memory_space<vmem>>, vector<512x256xbf16>,
    return
  }
  func.func @transform_0(%arg0: i32) -> (i32, i32) {
    %c0_i32 = arith.constant 0 : i32
    %c0_i32_0 = arith.constant 0 : i32
    return %arg0, %c0_i32 : i32, i32
  }
  func.func @transform_1(%arg0: i32) -> (i32, i32) {
    %c0_i32 = arith.constant 0 : i32
    %c0_i32_0 = arith.constant 0 : i32
    %c0_i32_1 = arith.constant 0 : i32
    return %c0_i32, %c0_i32_0 : i32, i32
  }
  func.func @transform_2(%arg0: i32) -> (i32, i32) {
    %c0_i32 = arith.constant 0 : i32
    %c0_i32_0 = arith.constant 0 : i32
    %c0_i32_1 = arith.constant 0 : i32
    return %c0_i32, %c0_i32_0 : i32, i32
  }
  func.func @transform_3(%arg0: i32) -> (i32, i32) {
    %c0_i32 = arith.constant 0 : i32
    %c0_i32_0 = arith.constant 0 : i32
    %c0_i32_1 = arith.constant 0 : i32
    return %c0_i32, %c0_i32_0 : i32, i32
  }
  func.func @transform_4(%arg0: i32) -> (i32, i32) {
    %c0_i32 = arith.constant 0 : i32
    %c0_i32_0 = arith.constant 0 : i32
    %c0_i32_1 = arith.constant 0 : i32
    return %c0_i32, %c0_i32_0 : i32, i32
  }
  func.func @transform_5(%arg0: i32) -> (i32, i32) {
    %c0_i32 = arith.constant 0 : i32
    %c0_i32_0 = arith.constant 0 : i32
    %c0_i32_1 = arith.constant 0 : i32
    return %c0_i32, %c0_i32_0 : i32, i32
  }
  func.func @transform_6(%arg0: i32) -> (i32, i32) {
    %c0_i32 = arith.constant 0 : i32
    %c0_i32_0 = arith.constant 0 : i32
    %c0_i32_1 = arith.constant 0 : i32
    return %c0_i32, %c0_i32_0 : i32, i32
  }
  func.func @transform_7(%arg0: i32) -> (i32, i32) {
    %c0_i32 = arith.constant 0 : i32
    %c0_i32_0 = arith.constant 0 : i32
    %c0_i32_1 = arith.constant 0 : i32
    return %c0_i32, %c0_i32_0 : i32, i32
  }
  func.func @transform_8(%arg0: i32) -> (i32, i32) {
    %c0_i32 = arith.constant 0 : i32
    %c0_i32_0 = arith.constant 0 : i32
    %c0_i32_1 = arith.constant 0 : i32
    return %c0_i32, %c0_i32_0 : i32, i32
  }
  func.func @transform_9(%arg0: i32) -> (i32, i32) {
    %c0_i32 = arith.constant 0 : i32
    %c0_i32_0 = arith.constant 0 : i32
    return %arg0, %c0_i32 : i32, i32
  }
}

</mosaic_0001>

<bundles_post_ra>
// kernel: node_feature_net_forward.1
= control target key start
LH: loop header
LB: loop body
LE: loop exit
PB: predicated region body
PF: predicated region fallthrough
CT: control target
= control target key end

     0   :  { %14 = vsyncpa [#allocation3], 0  ;;  %s9515_s0 = inlined_call_operand.vmem [shape: bf16[2048,256], index: 0, kind: input, shape index: {}]   ;;  %s9516_s1 = inlined_call_operand.vmem [shape: bf16[256,256], index: 1, kind: input, shape index: {}]   ;;  %s9517_s2 = inlined_call_operand.vmem [shape: f32[1,256], index: 2, kind: input, shape index: {}]   ;;  %s9518_s3 = inlined_call_operand.vmem [shape: bf16[128,128], index: 3, kind: input, shape index: {}]   ;;  %s9519_s4 = inlined_call_operand.vmem [shape: f32[1,128], index: 4, kind: input, shape index: {}]   ;;  %s9520_s5 = inlined_call_operand.vmem [shape: bf16[256,512], index: 5, kind: input, shape index: {}]   ;;  %s9521_s6 = inlined_call_operand.vmem [shape: f32[1,512], index: 6, kind: input, shape index: {}]   ;;  %s9522_s7 = inlined_call_operand.vmem [shape: bf16[512,256], index: 7, kind: input, shape index: {}]   ;;  %s9523_s8 = inlined_call_operand.vmem [shape: f32[1,256], index: 8, kind: input, shape index: {}]   ;;  %s9524_s9 = inlined_call_operand.hbm [shape: bf16[2000,256], index: 9, kind: output, shape index: {}]  }
   0x1   :  { %16 = vsyncpa [#allocation3 + $0x1], 0  ;;  %s6833_s30 = smov 0   ;;  %s6835_s10 = smov 0  }
   0x2   :  { %s6837_s11 = smov 0   ;;  %s6839_s12 = smov 0  }
   0x3 LB: > { %s6854_s13 = sadd.s32 4294967295, %s6778_s12   ;;  %s5766_s14 = sadd.s32 4294967294, %s6778_s12   ;;  %s6778_s12 = sphi %s6839_s12, %s9672_s12   ;;  %s6774_s11 = sphi %s6837_s11, %s9671_s11   ;;  %s6770_s10 = sphi %s6835_s10, %s9670_s10   ;;  %s6766_s30 = sphi %s6833_s30, %s9669_s30  }
   0x4   : > { %s6858_s15 = sadd.s32 1, %s6778_s12   ;;  %s223_s16 = sadd.s32 1, %s6774_s11 }
   0x5   : > { %s220_s17 = ssub.s32 %s6778_s12, %s6858_s15  ;;  %p233_p0 = scmp.ne.s32.totalorder %s6774_s11, %s6770_s10 }
   0x6   : > { %p221_p1 = scmp.eq.s32.totalorder %s220_s17, 0  ;;  %p234_p2 = scmp.eq.s32.totalorder %s6854_s13, 3 }
   0x7   : > { %p239_p3 = scmp.ne.s32.totalorder %s6770_s10, %s6766_s30  ;;  %p240_p4 = scmp.eq.s32.totalorder %s5766_s14, 3 }
   0x8   : > { %s6869_s18 = scalar_select %p221_p1, %s6774_s11, %s223_s16  }
   0x9   : > { %p6871_p5 = por %p234_p2, %p233_p0  ;;  %p6875_p6 = por %p240_p4, %p239_p3 }
   0xa   : > { %p5769_p7 = scmp.ge.s32.totalorder %s6778_s12, 1  ;;  %p292_p8 = scmp.lt.s32.totalorder %s6778_s12, 5 }
   0xc   : > { %p293_p9 = pnand %p5769_p7, %p292_p8 }
   0xe   : > { %296 = sbr.rel (%p293_p9) target bundleno = 1366 (0x556), region = 56 }
  0x13   : > { %v6342_v0 = vld [vmem:[%s9516_s1 + $0x74] ss:$8 sps:$4 sm:$0xff]   ;;  %v6344_v1 = vld [vmem:[%s9516_s1 + $0x70] ss:$8 sps:$4 sm:$0xff]   ;;  %v6345_v2 = vld [vmem:[%s9516_s1 + $0x64] ss:$8 sps:$4 sm:$0xff]  }
  0x14   : > { %931 = vmatprep.subr.bf16.mxu0 %v6342_v0  ;;  %v6347_v3 = vld [vmem:[%s9516_s1 + $0x60] ss:$8 sps:$4 sm:$0xff]   ;;  %v6348_v4 = vld [vmem:[%s9516_s1 + $0x54] ss:$8 sps:$4 sm:$0xff]   ;;  %s6897_s16 = sshll.u32 %s6854_s13, 6  ;;  %s326_s25 = sand.u32 1, %s6770_s10  }
  0x15   : > { %932 = vmatpush1.bf16.msra.mxu0 %v6344_v1  ;;  %v6350_v5 = vld [vmem:[%s9516_s1 + $0x50] ss:$8 sps:$4 sm:$0xff]   ;;  %v6351_v6 = vld [vmem:[%s9516_s1 + $0x44] ss:$8 sps:$4 sm:$0xff]   ;;  %p330_p10 = scmp.lt.s32.totalorder %s6897_s16, 255  ;;  %s5770_s26 = sshll.u32 %s326_s25, 9 }
  0x16   : > { %933 = vmatprep.subr.bf16.mxu0 %v6345_v2  ;;  %v6353_v7 = vld [vmem:[%s9516_s1 + $0x40] ss:$8 sps:$4 sm:$0xff]   ;;  %v6354_v8 = vld [vmem:[%s9516_s1 + $0x34] ss:$8 sps:$4 sm:$0xff]   ;;  %v6356_v9 = vld [vmem:[%s9516_s1 + $0x30] ss:$8 sps:$4 sm:$0xff]  }
  0x17   : > { %s331_s28 = scalar_select %p330_p10, %s6897_s16, 255  ;;  %v6357_v10 = vld [vmem:[%s9516_s1 + $0x24] ss:$8 sps:$4 sm:$0xff]   ;;  %v6359_v11 = vld [vmem:[%s9516_s1 + $0x20] ss:$8 sps:$4 sm:$0xff]   ;;  %v6459_v47 = vld [vmem:[%s9518_s3 + $0x38] sm:$0xff]  }
  0x18   : > { %v6360_v12 = vld [vmem:[%s9516_s1 + $0x14] ss:$8 sps:$4 sm:$0xff]   ;;  %v6362_v14 = vld [vmem:[%s9516_s1 + $0x10] ss:$8 sps:$4 sm:$0xff]   ;;  %v6363_v15 = vld [vmem:[%s9516_s1 + $0x4] ss:$8 sps:$4 sm:$0xff]   ;;  %6190 = vmatprep.subr.bf16.mxu1 %v6459_v47 }
  0x19   : > { %934 = vmatpush1.bf16.msra.mxu0 %v6347_v3  ;;  %s6082_s22 = sshll.u32 %s331_s28, 3  ;;  %v6365_v16 = vld [vmem:[%s9516_s1] ss:$8 sps:$4 sm:$0xff]   ;;  %v6366_v17 = vld [vmem:[%s9516_s1 + $0xf4] ss:$8 sps:$4 sm:$0xff]   ;;  %6191 = vmatpush3.bf16.msra.mxu1 %v6459_v47  ;;  %s9455_s29 = scalar_lea.sflag [#allocation3], %s326_s25 }
  0x1a   : > { %935 = vmatprep.subr.bf16.mxu0 %v6348_v4  ;;  %s6925_s27 = scalar_lea.vmem %s9515_s0, %s6082_s22  ;;  %v6368_v18 = vld [vmem:[%s9516_s1 + $0xf0] ss:$8 sps:$4 sm:$0xff]   ;;  %v6369_v19 = vld [vmem:[%s9516_s1 + $0xe4] ss:$8 sps:$4 sm:$0xff]   ;;  %v6371_v20 = vld [vmem:[%s9516_s1 + $0xe0] ss:$8 sps:$4 sm:$0xff]  }
  0x1b   : > { %v6392_v13 = vld [vmem:[%s6925_s27 + $0x4] ss:$8 sps:$4 sm:$0xff]   ;;  %v6372_v21 = vld [vmem:[%s9516_s1 + $0xd4] ss:$8 sps:$4 sm:$0xff]   ;;  %v6374_v22 = vld [vmem:[%s9516_s1 + $0xd0] ss:$8 sps:$4 sm:$0xff]  }
  0x1c   : > { %963 = vmatprep.mubr.bf16.mxu0 %v6392_v13  ;;  %v6375_v23 = vld [vmem:[%s9516_s1 + $0xc4] ss:$8 sps:$4 sm:$0xff]   ;;  %v6377_v24 = vld [vmem:[%s9516_s1 + $0xc0] ss:$8 sps:$4 sm:$0xff]   ;;  %v6378_v25 = vld [vmem:[%s9516_s1 + $0xb4] ss:$8 sps:$4 sm:$0xff]  }
  0x1d   : > { %936 = vmatpush1.bf16.msra.mxu0 %v6350_v5  ;;  %v6380_v26 = vld [vmem:[%s9516_s1 + $0xb0] ss:$8 sps:$4 sm:$0xff]   ;;  %v6381_v27 = vld [vmem:[%s9516_s1 + $0xa4] ss:$8 sps:$4 sm:$0xff]   ;;  %v6383_v28 = vld [vmem:[%s9516_s1 + $0xa0] ss:$8 sps:$4 sm:$0xff]  }
  0x1e   : > { %937 = vmatprep.subr.bf16.mxu0 %v6351_v6  ;;  %v6384_v29 = vld [vmem:[%s9516_s1 + $0x94] ss:$8 sps:$4 sm:$0xff]   ;;  %v6386_v30 = vld [vmem:[%s9516_s1 + $0x90] ss:$8 sps:$4 sm:$0xff]   ;;  %v6387_v31 = vld [vmem:[%s9516_s1 + $0x84] ss:$8 sps:$4 sm:$0xff]  }
  0x1f   : > { %v6389_v32 = vld [vmem:[%s9516_s1 + $0x80] ss:$8 sps:$4 sm:$0xff]   ;;  %v6393_v34 = vld [vmem:[%s6925_s27 + $0x14] ss:$8 sps:$4 sm:$0xff]   ;;  %v6395_v35 = vld [vmem:[%s6925_s27 + $0x10] ss:$8 sps:$4 sm:$0xff]  }
  0x20   : > { %v6390_v33 = vld [vmem:[%s6925_s27] ss:$8 sps:$4 sm:$0xff]   ;;  %v6396_v36 = vld [vmem:[%s6925_s27 + $0x24] ss:$8 sps:$4 sm:$0xff]   ;;  %v6399_v38 = vld [vmem:[%s6925_s27 + $0x34] ss:$8 sps:$4 sm:$0xff]  }
  0x21   : > { %938 = vmatpush1.bf16.msra.mxu0 %v6353_v7  ;;  %v6398_v37 = vld [vmem:[%s6925_s27 + $0x20] ss:$8 sps:$4 sm:$0xff]   ;;  %v6401_v39 = vld [vmem:[%s6925_s27 + $0x30] ss:$8 sps:$4 sm:$0xff]   ;;  %v6402_v40 = vld [vmem:[%s6925_s27 + $0x44] ss:$8 sps:$4 sm:$0xff]  }
  0x22   : > { %939 = vmatprep.subr.bf16.mxu0 %v6354_v8  ;;  %v6404_v41 = vld [vmem:[%s6925_s27 + $0x40] ss:$8 sps:$4 sm:$0xff]   ;;  %v6405_v42 = vld [vmem:[%s6925_s27 + $0x54] ss:$8 sps:$4 sm:$0xff]   ;;  %v6407_v43 = vld [vmem:[%s6925_s27 + $0x50] ss:$8 sps:$4 sm:$0xff]  }
  0x23   : > { %v6408_v44 = vld [vmem:[%s6925_s27 + $0x64] ss:$8 sps:$4 sm:$0xff]   ;;  %v6410_v45 = vld [vmem:[%s6925_s27 + $0x60] ss:$8 sps:$4 sm:$0xff]   ;;  %v6411_v46 = vld [vmem:[%s6925_s27 + $0x74] ss:$8 sps:$4 sm:$0xff]  }
  0x24   : > { %v6413_v48 = vld [vmem:[%s6925_s27 + $0x70] ss:$8 sps:$4 sm:$0xff]   ;;  %v6414_v49 = vld [vmem:[%s6925_s27 + $0x84] ss:$8 sps:$4 sm:$0xff]   ;;  %v6416_v52 = vld [vmem:[%s6925_s27 + $0x80] ss:$8 sps:$4 sm:$0xff]  }
  0x25   : > { %940 = vmatpush1.bf16.msra.mxu0 %v6356_v9  ;;  %v6463_v50 = vld [vmem:[%s9518_s3 + $0x30] sm:$0xff]   ;;  %v6464_v51 = vld [vmem:[%s9518_s3 + $0x28] sm:$0xff]   ;;  %v6468_v54 = vld [vmem:[%s9518_s3 + $0x20] sm:$0xff]   ;;  %s5691_s14 = ssub.s32 (%p6871_p5), 250, %s6897_s16 }
  0x26   : > { %941 = vmatprep.subr.bf16.mxu0 %v6357_v10  ;;  %6192 = vmatprep.subr.bf16.mxu1 %v6463_v50  ;;  %v6417_v53 = vld [vmem:[%s6925_s27 + $0x94] ss:$8 sps:$4 sm:$0xff]   ;;  %v6419_v56 = vld [vmem:[%s6925_s27 + $0x90] ss:$8 sps:$4 sm:$0xff]   ;;  %v6420_v57 = vld [vmem:[%s6925_s27 + $0xa4] ss:$8 sps:$4 sm:$0xff]  }
  0x27   : > { %6193 = vmatpush3.bf16.msra.mxu1 %v6463_v50  ;;  %v6469_v55 = vld [vmem:[%s9518_s3 + $0x18] sm:$0xff]   ;;  %v6473_v58 = vld [vmem:[%s9518_s3 + $0x10] sm:$0xff]   ;;  %v6474_v59 = vld [vmem:[%s9518_s3 + $0x8] sm:$0xff]   ;;  %p5692_p11 = scmp.lt.s32.totalorder (%p6871_p5), %s5691_s14, 64 }
  0x28   : > { %6194 = vmatprep.subr.bf16.mxu1 %v6464_v51  ;;  %v6422_v60 = vld [vmem:[%s6925_s27 + $0xa0] ss:$8 sps:$4 sm:$0xff]   ;;  %v6423_v61 = vld [vmem:[%s6925_s27 + $0xb4] ss:$8 sps:$4 sm:$0xff]   ;;  %v6425_v63 = vld [vmem:[%s6925_s27 + $0xb0] ss:$8 sps:$4 sm:$0xff]  }
  0x29   : > { %942 = vmatpush1.bf16.msra.mxu0 %v6359_v11  ;;  %v6478_v62 = vld [vmem:[%s9518_s3] sm:$0xff]   ;;  %v6429_v2 = vld [vmem:[%s6925_s27 + $0xd4] ss:$8 sps:$4 sm:$0xff]   ;;  %v6431_v3 = vld [vmem:[%s6925_s27 + $0xd0] ss:$8 sps:$4 sm:$0xff]  }
  0x2a   : > { %943 = vmatprep.subr.bf16.mxu0 %v6360_v12  ;;  %v6426_v0 = vld [vmem:[%s6925_s27 + $0xc4] ss:$8 sps:$4 sm:$0xff]   ;;  %v6428_v1 = vld [vmem:[%s6925_s27 + $0xc0] ss:$8 sps:$4 sm:$0xff]   ;;  %v6435_v6 = vld [vmem:[%s6925_s27 + $0xf4] ss:$8 sps:$4 sm:$0xff]  }
  0x2b   : > { %6195 = vmatpush3.bf16.msra.mxu1 %v6464_v51  ;;  %v6432_v4 = vld [vmem:[%s6925_s27 + $0xe4] ss:$8 sps:$4 sm:$0xff]   ;;  %v6434_v5 = vld [vmem:[%s6925_s27 + $0xe0] ss:$8 sps:$4 sm:$0xff]   ;;  %v6437_v7 = vld [vmem:[%s6925_s27 + $0xf0] ss:$8 sps:$4 sm:$0xff]  }
  0x2c   : > { %6196 = vmatprep.subr.bf16.mxu1 %v6468_v54  ;;  %v6438_v8 = vld [vmem:[%s6925_s27 + $0x104] ss:$8 sps:$4 sm:$0xff]   ;;  %v6440_v9 = vld [vmem:[%s6925_s27 + $0x100] ss:$8 sps:$4 sm:$0xff]   ;;  %v6441_v10 = vld [vmem:[%s6925_s27 + $0x114] ss:$8 sps:$4 sm:$0xff]  }
  0x2d   : > { %944 = vmatpush1.bf16.msra.mxu0 %v6362_v14  ;;  %v6443_v11 = vld [vmem:[%s6925_s27 + $0x110] ss:$8 sps:$4 sm:$0xff]   ;;  %v6444_v12 = vld [vmem:[%s6925_s27 + $0x124] ss:$8 sps:$4 sm:$0xff]   ;;  %v6446_v13 = vld [vmem:[%s6925_s27 + $0x120] ss:$8 sps:$4 sm:$0xff]  }
  0x2e   : > { %945 = vmatprep.subr.bf16.mxu0 %v6363_v15  ;;  %v6447_v14 = vld [vmem:[%s6925_s27 + $0x134] ss:$8 sps:$4 sm:$0xff]   ;;  %v6449_v15 = vld [vmem:[%s6925_s27 + $0x130] ss:$8 sps:$4 sm:$0xff]  }
  0x2f   : > { %6197 = vmatpush3.bf16.msra.mxu1 %v6468_v54 }
  0x30   : > { %6198 = vmatprep.subr.bf16.mxu1 %v6469_v55 }
  0x31   : > { %946 = vmatpush1.bf16.msra.mxu0 %v6365_v16  ;;  %v6450_v16 = vld [vmem:[%s6925_s27 + $0x144] ss:$8 sps:$4 sm:$0xff]  }
  0x32   : > { %947 = vmatprep.subr.bf16.mxu0 %v6366_v17  ;;  %v6452_v17 = vld [vmem:[%s6925_s27 + $0x140] ss:$8 sps:$4 sm:$0xff]  }
  0x33   : > { %6199 = vmatpush3.bf16.msra.mxu1 %v6469_v55 }
  0x34   : > { %6200 = vmatprep.subr.bf16.mxu1 %v6473_v58 }
  0x35   : > { %948 = vmatpush2.bf16.msra.mxu0 %v6368_v18  ;;  %v6453_v18 = vld [vmem:[%s6925_s27 + $0x154] ss:$8 sps:$4 sm:$0xff]  }
  0x36   : > { %949 = vmatprep.subr.bf16.mxu0 %v6369_v19  ;;  %v6455_v19 = vld [vmem:[%s6925_s27 + $0x150] ss:$8 sps:$4 sm:$0xff]  }
  0x37   : > { %6201 = vmatpush3.bf16.msra.mxu1 %v6473_v58  ;;  %v6477_v58 = vld [vmem:[%s6925_s27 + $0x1a0] ss:$8 sps:$4 sm:$0xff]  }
  0x38   : > { %6202 = vmatprep.subr.bf16.mxu1 %v6474_v59 }
  0x39   : > { %950 = vmatpush2.bf16.msra.mxu0 %v6371_v20  ;;  %v6456_v20 = vld [vmem:[%s6925_s27 + $0x164] ss:$8 sps:$4 sm:$0xff]  }
  0x3a   : > { %951 = vmatprep.subr.bf16.mxu0 %v6372_v21  ;;  %v6458_v21 = vld [vmem:[%s6925_s27 + $0x160] ss:$8 sps:$4 sm:$0xff]  }
  0x3b   : > { %6203 = vmatpush3.bf16.msra.mxu1 %v6474_v59 }
  0x3c   : > { %6204 = vmatprep.subr.bf16.mxu1 %v6478_v62 }
  0x3d   : > { %952 = vmatpush2.bf16.msra.mxu0 %v6374_v22  ;;  %v6460_v22 = vld [vmem:[%s6925_s27 + $0x174] ss:$8 sps:$4 sm:$0xff]  }
  0x3e   : > { %953 = vmatprep.subr.bf16.mxu0 %v6375_v23  ;;  %v441_v23 = vlaneseq }
  0x3f   : > { %6205 = vmatpush3.bf16.msra.mxu1 %v6478_v62  ;;  %v6479_v62 = vld [vmem:[%s6925_s27 + $0x1b4] ss:$8 sps:$4 sm:$0xff]  }
  0x41   : > { %954 = vmatpush2.bf16.msra.mxu0 %v6377_v24  ;;  %v6462_v24 = vld [vmem:[%s6925_s27 + $0x170] ss:$8 sps:$4 sm:$0xff]  }
  0x42   : > { %955 = vmatprep.subr.bf16.mxu0 %v6378_v25  ;;  %v6465_v25 = vld [vmem:[%s6925_s27 + $0x184] ss:$8 sps:$4 sm:$0xff]  }
  0x45   : > { %956 = vmatpush2.bf16.msra.mxu0 %v6380_v26  ;;  %v7060_v26 = vshrl.u32 %v441_v23, 7 }
  0x46   : > { %957 = vmatprep.subr.bf16.mxu0 %v6381_v27 }
  0x47   : > { %9533 = vst [vmem:[#allocation5_spill] sm:$0xff] %v7060_v26  ;;  %v7063_v27 = vsub.s32 0, %v7060_v26 }
  0x49   : > { %958 = vmatpush2.bf16.msra.mxu0 %v6383_v28  ;;  %9534 = vst [vmem:[#allocation6_spill] sm:$0xff] %v7063_v27  ;;  %v439_v28 = vld [vmem:[%s9517_s2] sm:$0x3] }
  0x4a   : > { %959 = vmatprep.subr.bf16.mxu0 %v6384_v29  ;;  %v7069_v29 = vsub.s32 1, %v7060_v26 }
  0x4c   : > { %9535 = vst [vmem:[#allocation7_spill] sm:$0xff] %v7069_v29 }
  0x4d   : > { %960 = vmatpush2.bf16.msra.mxu0 %v6386_v30  ;;  %v6467_v30 = vld [vmem:[%s6925_s27 + $0x180] ss:$8 sps:$4 sm:$0xff]  }
  0x4e   : > { %961 = vmatprep.subr.bf16.mxu0 %v6387_v31  ;;  %v7073_v31 = vrot.slane %v439_v28, %v7063_v27 }
  0x51   : > { %962 = vmatpush2.bf16.msra.mxu0 %v6389_v32  ;;  %v6470_v32 = vld [vmem:[%s6925_s27 + $0x194] ss:$8 sps:$4 sm:$0xff]  }
  0x54   : > { %964 = vmatmul.mubr.bf16.vlgmr.msra.gmra.mxu0 %v6390_v33  ;;  %v7077_v33 = vrot.slane %v439_v28, %v7069_v29 }
  0x55   : > { %973 = vmatprep.mubr.bf16.mxu0 %v6393_v34 }
  0x5c   : > { %974 = vmatmul.mubr.bf16.gmra.mxu0 %v6395_v35 }
  0x5d   : > { %983 = vmatprep.mubr.bf16.mxu0 %v6396_v36 }
  0x64   : > { %984 = vmatmul.mubr.bf16.gmra.mxu0 %v6398_v37 }
  0x65   : > { %993 = vmatprep.mubr.bf16.mxu0 %v6399_v38 }
  0x6c   : > { %994 = vmatmul.mubr.bf16.gmra.mxu0 %v6401_v39  ;;  %v6472_v39 = vld [vmem:[%s6925_s27 + $0x190] ss:$8 sps:$4 sm:$0xff]  }
  0x6d   : > { %1003 = vmatprep.mubr.bf16.mxu0 %v6402_v40 }
  0x74   : > { %1004 = vmatmul.mubr.bf16.gmra.mxu0 %v6404_v41 }
  0x75   : > { %1013 = vmatprep.mubr.bf16.mxu0 %v6405_v42  ;;  %v6475_v42 = vld [vmem:[%s6925_s27 + $0x1a4] ss:$8 sps:$4 sm:$0xff]  }
  0x7c   : > { %1014 = vmatmul.mubr.bf16.gmra.mxu0 %v6407_v43 }
  0x7d   : > { %1023 = vmatprep.mubr.bf16.mxu0 %v6408_v44 }
  0x84   : > { %1024 = vmatmul.mubr.bf16.gmra.mxu0 %v6410_v45 }
  0x85   : > { %1033 = vmatprep.mubr.bf16.mxu0 %v6411_v46 }
  0x8c   : > { %1034 = vmatmul.mubr.bf16.gmra.mxu0 %v6413_v48 }
  0x8d   : > { %1043 = vmatprep.mubr.bf16.mxu0 %v6414_v49 }
  0x94   : > { %1044 = vmatmul.mubr.bf16.gmra.mxu0 %v6416_v52 }
  0x95   : > { %1053 = vmatprep.mubr.bf16.mxu0 %v6417_v53 }
  0x9c   : > { %1054 = vmatmul.mubr.bf16.gmra.mxu0 %v6419_v56 }
  0x9d   : > { %1063 = vmatprep.mubr.bf16.mxu0 %v6420_v57 }
  0xa4   : > { %1064 = vmatmul.mubr.bf16.gmra.mxu0 %v6422_v60 }
  0xa5   : > { %1073 = vmatprep.mubr.bf16.mxu0 %v6423_v61 }
  0xac   : > { %1074 = vmatmul.mubr.bf16.gmra.mxu0 %v6425_v63 }
  0xad   : > { %1083 = vmatprep.mubr.bf16.mxu0 %v6426_v0 }
  0xb4   : > { %1084 = vmatmul.mubr.bf16.gmra.mxu0 %v6428_v1 }
  0xb5   : > { %1093 = vmatprep.mubr.bf16.mxu0 %v6429_v2 }
  0xbc   : > { %1094 = vmatmul.mubr.bf16.gmra.mxu0 %v6431_v3 }
  0xbd   : > { %1103 = vmatprep.mubr.bf16.mxu0 %v6432_v4 }
  0xc4   : > { %1104 = vmatmul.mubr.bf16.gmra.mxu0 %v6434_v5 }
  0xc5   : > { %1113 = vmatprep.mubr.bf16.mxu0 %v6435_v6 }
  0xcc   : > { %1114 = vmatmul.mubr.bf16.gmra.mxu0 %v6437_v7 }
  0xcd   : > { %1123 = vmatprep.mubr.bf16.mxu0 %v6438_v8  ;;  %v6496_v8 = vld [vmem:[%s9520_s5 + $0xe4] ss:$16 sps:$4 sm:$0xff]  }
  0xce   : > { %2530 = vmatprep.subr.bf16.mxu1 %v6496_v8  ;;  %v6506_v8 = vld [vmem:[%s9520_s5 + $0xc8] ss:$16 sps:$4 sm:$0xff]  }
  0xd4   : > { %1124 = vmatmul.mubr.bf16.gmra.mxu0 %v6440_v9 }
  0xd5   : > { %1133 = vmatprep.mubr.bf16.mxu0 %v6441_v10  ;;  %v6494_v10 = vld [vmem:[%s9520_s5 + $0xe0] ss:$16 sps:$4 sm:$0xff]  }
  0xdc   : > { %1134 = vmatmul.mubr.bf16.gmra.mxu0 %v6443_v11 }
  0xdd   : > { %1143 = vmatprep.mubr.bf16.mxu0 %v6444_v12 }
  0xe4   : > { %1144 = vmatmul.mubr.bf16.gmra.mxu0 %v6446_v13 }
  0xe5   : > { %1153 = vmatprep.mubr.bf16.mxu0 %v6447_v14 }
  0xec   : > { %1154 = vmatmul.mubr.bf16.gmra.mxu0 %v6449_v15 }
  0xed   : > { %1163 = vmatprep.mubr.bf16.mxu0 %v6450_v16  ;;  %v6481_v16 = vld [vmem:[%s6925_s27 + $0x1b0] ss:$8 sps:$4 sm:$0xff]  }
  0xf4   : > { %1164 = vmatmul.mubr.bf16.gmra.mxu0 %v6452_v17  ;;  %v6484_v17 = vld [vmem:[%s6925_s27 + $0x1c4] ss:$8 sps:$4 sm:$0xff]  }
  0xf5   : > { %1173 = vmatprep.mubr.bf16.mxu0 %v6453_v18 }
  0xfc   : > { %1174 = vmatmul.mubr.bf16.gmra.mxu0 %v6455_v19 }
  0xfd   : > { %1183 = vmatprep.mubr.bf16.mxu0 %v6456_v20 }
 0x104   : > { %1184 = vmatmul.mubr.bf16.gmra.mxu0 %v6458_v21  ;;  %v6497_v21 = vld [vmem:[%s9520_s5 + $0xe8] ss:$16 sps:$4 sm:$0xff]  }
 0x105   : > { %1193 = vmatprep.mubr.bf16.mxu0 %v6460_v22  ;;  %v7112_v22 = vld [vmem:[%s9520_s5 + $0xec] ss:$16 sps:$4 sm:$0xff]  }
 0x106   : > { %2883 = vmatprep.subr.bf16.mxu0 %v7112_v22 }
 0x107   : > { %2884 = vmatpush1.bf16.msra.mxu0 %v6497_v21  ;;  %v6517_v21 = vld [vmem:[%s9520_s5 + $0xac] ss:$16 sps:$4 sm:$0xff]  }
 0x10c   : > { %1194 = vmatmul.mubr.bf16.gmra.mxu0 %v6462_v24 }
 0x10d   : > { %1203 = vmatprep.mubr.bf16.mxu0 %v6465_v25 }
 0x114   : > { %v965_v34 = vpop.f32.mrf.mxu0  ;;  %1204 = vmatmul.mubr.bf16.gmra.mxu0 %v6467_v30 }
 0x115   : > { %v966_v35 = vadd.f32 %v965_v34, %v7073_v31  ;;  %1213 = vmatprep.mubr.bf16.mxu0 %v6470_v32 }
 0x116   : > { %v967_v36 = vpop.f32.mrf.mxu0 }
 0x117   : > { %v968_v37 = vadd.f32 %v967_v36, %v7077_v33  ;;  %v1284_v40 = vmul.f32 0.2, %v966_v35 }
 0x118   : > { %v969_v38 = vpop.f32.mrf.mxu0 }
 0x119   : > { %v970_v41 = vadd.f32 %v969_v38, %v7073_v31  ;;  %v1285_v44 = vmul.f32 0.2, %v968_v37  ;;  %v1412_v50 = vmax.f32 %v966_v35, %v1284_v40  ;;  %v6502_v38 = vld [vmem:[%s9520_s5 + $0xc4] ss:$16 sps:$4 sm:$0xff]  }
 0x11a   : > { %v971_v43 = vpop.f32.mrf.mxu0 }
 0x11b   : > { %v1286_v45 = vmul.f32 0.2, %v970_v41  ;;  %v972_v46 = vadd.f32 %v971_v43, %v7077_v33  ;;  %v1413_v53 = vmax.f32 %v968_v37, %v1285_v44  ;;  %v6500_v37 = vld [vmem:[%s9520_s5 + $0xc0] ss:$16 sps:$4 sm:$0xff]  }
 0x11c   : > { %v975_v47 = vpop.f32.mrf.mxu0  ;;  %1214 = vmatmul.mubr.bf16.gmra.mxu0 %v6472_v39 }
 0x11d   : > { %v1287_v48 = vmul.f32 0.2, %v972_v46  ;;  %v976_v49 = vadd.f32 %v975_v47, %v7073_v31  ;;  %v1414_v51 = vmax.f32 %v970_v41, %v1286_v45  ;;  %1223 = vmatprep.mubr.bf16.mxu0 %v6475_v42  ;;  %v6482_v45 = vld [vmem:[%s6925_s27 + $0x1c0] ss:$8 sps:$4 sm:$0xff]  }
 0x11e   : > { %v977_v52 = vpop.f32.mrf.mxu0 }
 0x11f   : > { %v1415_v54 = vmax.f32 %v972_v46, %v1287_v48  ;;  %v978_v55 = vadd.f32 %v977_v52, %v7077_v33  ;;  %v1540_v56 = vpack.c.bf16 %v1414_v51, %v1412_v50  ;;  %v1288_v60 = vmul.f32 0.2, %v976_v49 }
 0x120   : > { %v979_v57 = vpop.f32.mrf.mxu0 }
 0x121   : > { %v7088_v59 = vpack.c.bf16 %v1415_v54, %v1413_v53  ;;  %v980_v61 = vadd.f32 %v979_v57, %v7073_v31  ;;  %6206 = vmatprep.mubr.bf16.mxu1 %v1540_v56  ;;  %v1289_v0 = vmul.f32 0.2, %v978_v55  ;;  %v1416_v4 = vmax.f32 %v976_v49, %v1288_v60  ;;  %v6487_v49 = vld [vmem:[%s6925_s27 + $0x1d4] ss:$8 sps:$4 sm:$0xff]   ;;  %v6503_v60 = vld [vmem:[%s9520_s5 + $0xa0] ss:$16 sps:$4 sm:$0xff]  }
 0x122   : > { %v981_v63 = vpop.f32.mrf.mxu0 }
 0x123   : > { %v1290_v1 = vmul.f32 0.2, %v980_v61  ;;  %v982_v2 = vadd.f32 %v981_v63, %v7077_v33  ;;  %v1417_v11 = vmax.f32 %v978_v55, %v1289_v0 }
 0x124   : > { %v985_v3 = vpop.f32.mrf.mxu0  ;;  %1224 = vmatmul.mubr.bf16.gmra.mxu0 %v6477_v58 }
 0x125   : > { %v1418_v5 = vmax.f32 %v980_v61, %v1290_v1  ;;  %v1291_v6 = vmul.f32 0.2, %v982_v2  ;;  %v986_v7 = vadd.f32 %v985_v3, %v7073_v31  ;;  %1233 = vmatprep.mubr.bf16.mxu0 %v6479_v62  ;;  %v6505_v61 = vld [vmem:[%s9520_s5 + $0xa4] ss:$16 sps:$4 sm:$0xff]   ;;  %v6485_v3 = vld [vmem:[%s6925_s27 + $0x1d0] ss:$8 sps:$4 sm:$0xff]  }
 0x126   : > { %v987_v9 = vpop.f32.mrf.mxu0 }
 0x127   : > { %v1419_v12 = vmax.f32 %v982_v2, %v1291_v6  ;;  %v988_v13 = vadd.f32 %v987_v9, %v7077_v33  ;;  %v1542_v14 = vpack.c.bf16 %v1418_v5, %v1416_v4  ;;  %v1292_v19 = vmul.f32 0.2, %v986_v7  ;;  %v6490_v4 = vld [vmem:[%s6925_s27 + $0x1e4] ss:$8 sps:$4 sm:$0xff]  }
 0x128   : > { %v989_v15 = vpop.f32.mrf.mxu0  ;;  %v6508_v9 = vld [vmem:[%s9520_s5 + $0xcc] ss:$16 sps:$4 sm:$0xff]  }
 0x129   : > { %v7103_v18 = vpack.c.bf16 %v1419_v12, %v1417_v11  ;;  %v990_v20 = vadd.f32 %v989_v15, %v7073_v31  ;;  %6207 = vmatmul.mubr.bf16.vlgmr.msra.gmra.mxu1 %v1542_v14  ;;  %v1293_v24 = vmul.f32 0.2, %v988_v13  ;;  %v1420_v32 = vmax.f32 %v986_v7, %v1292_v19  ;;  %2885 = vmatprep.subr.bf16.mxu0 %v6508_v9 }
 0x12a   : > { %v991_v23 = vpop.f32.mrf.mxu0  ;;  %2531 = vmatpush1.bf16.msra.mxu1 %v6494_v10  ;;  %2886 = vmatpush1.bf16.msra.mxu0 %v6506_v8 }
 0x12b   : > { %v1294_v25 = vmul.f32 0.2, %v990_v20  ;;  %v992_v28 = vadd.f32 %v991_v23, %v7077_v33  ;;  %v1421_v40 = vmax.f32 %v988_v13, %v1293_v24  ;;  %2532 = vmatprep.subr.bf16.mxu1 %v6502_v38  ;;  %v6488_v24 = vld [vmem:[%s6925_s27 + $0x1e0] ss:$8 sps:$4 sm:$0xff]   ;;  %2887 = vmatprep.subr.bf16.mxu0 %v6517_v21  ;;  %v6532_v21 = vld [vmem:[%s9520_s5 + $0x24] ss:$16 sps:$4 sm:$0xff]  }
 0x12c   : > { %v995_v30 = vpop.f32.mrf.mxu0  ;;  %1234 = vmatmul.mubr.bf16.gmra.mxu0 %v6481_v16  ;;  %v6509_v16 = vld [vmem:[%s9520_s5 + $0x80] ss:$16 sps:$4 sm:$0xff]   ;;  %v6518_v38 = vld [vmem:[%s9520_s5 + $0x88] ss:$16 sps:$4 sm:$0xff]  }
 0x12d   : > { %v1422_v34 = vmax.f32 %v990_v20, %v1294_v25  ;;  %v1295_v35 = vmul.f32 0.2, %v992_v28  ;;  %v996_v36 = vadd.f32 %v995_v30, %v7073_v31  ;;  %1243 = vmatprep.mubr.bf16.mxu0 %v6484_v17  ;;  %v6511_v17 = vld [vmem:[%s9520_s5 + $0x84] ss:$16 sps:$4 sm:$0xff]   ;;  %v6515_v25 = vld [vmem:[%s9520_s5 + $0xa8] ss:$16 sps:$4 sm:$0xff]  }
 0x12e   : > { %v997_v39 = vpop.f32.mrf.mxu0  ;;  %2533 = vmatpush1.bf16.msra.mxu1 %v6500_v37  ;;  %2888 = vmatpush1.bf16.msra.mxu0 %v6515_v25  ;;  %v6544_v25 = vld [vmem:[%s9520_s5 + $0x1ec] ss:$16 sps:$4 sm:$0xff]  }
 0x12f   : > { %v1423_v41 = vmax.f32 %v992_v28, %v1295_v35  ;;  %v998_v42 = vadd.f32 %v997_v39, %v7077_v33  ;;  %v1544_v43 = vpack.c.bf16 %v1422_v34, %v1420_v32  ;;  %v1296_v47 = vmul.f32 0.2, %v996_v36  ;;  %2534 = vmatprep.subr.bf16.mxu1 %v6505_v61  ;;  %v6493_v32 = vld [vmem:[%s6925_s27 + $0x1f4] ss:$8 sps:$4 sm:$0xff]  }
 0x130   : > { %v999_v44 = vpop.f32.mrf.mxu0 }
 0x131   : > { %v7125_v46 = vpack.c.bf16 %v1423_v41, %v1421_v40  ;;  %v1000_v48 = vadd.f32 %v999_v44, %v7073_v31  ;;  %6210 = vmatprep.mubr.bf16.mxu1 %v1544_v43  ;;  %v1297_v51 = vmul.f32 0.2, %v998_v42  ;;  %v1424_v55 = vmax.f32 %v996_v36, %v1296_v47  ;;  %v6520_v36 = vld [vmem:[%s9520_s5 + $0x8c] ss:$16 sps:$4 sm:$0xff]   ;;  %v6514_v43 = vld [vmem:[%s9520_s5 + $0x64] ss:$16 sps:$4 sm:$0xff]  }
 0x132   : > { %v1001_v50 = vpop.f32.mrf.mxu0  ;;  %2535 = vmatpush1.bf16.msra.mxu1 %v6503_v60  ;;  %2889 = vmatprep.subr.bf16.mxu0 %v6520_v36  ;;  %v6526_v47 = vld [vmem:[%s9520_s5 + $0x6c] ss:$16 sps:$4 sm:$0xff]  }
 0x133   : > { %v1298_v52 = vmul.f32 0.2, %v1000_v48  ;;  %v1002_v53 = vadd.f32 %v1001_v50, %v7077_v33  ;;  %v1425_v63 = vmax.f32 %v998_v42, %v1297_v51  ;;  %2536 = vmatprep.subr.bf16.mxu1 %v6511_v17  ;;  %v6512_v42 = vld [vmem:[%s9520_s5 + $0x60] ss:$16 sps:$4 sm:$0xff]   ;;  %2890 = vmatpush1.bf16.msra.mxu0 %v6518_v38  ;;  %v6524_v50 = vld [vmem:[%s9520_s5 + $0x68] ss:$16 sps:$4 sm:$0xff]  }
 0x134   : > { %v1005_v54 = vpop.f32.mrf.mxu0  ;;  %1244 = vmatmul.mubr.bf16.gmra.mxu0 %v6482_v45  ;;  %2891 = vmatprep.subr.bf16.mxu0 %v6526_v47  ;;  %v6547_v38 = vld [vmem:[%s9520_s5 + $0x1cc] ss:$16 sps:$4 sm:$0xff]   ;;  %v6541_v47 = vld [vmem:[%s9520_s5 + $0x4] ss:$16 sps:$4 sm:$0xff]  }
 0x135   : > { %v1426_v56 = vmax.f32 %v1000_v48, %v1298_v52  ;;  %v1299_v57 = vmul.f32 0.2, %v1002_v53  ;;  %v1006_v58 = vadd.f32 %v1005_v54, %v7073_v31  ;;  %1253 = vmatprep.mubr.bf16.mxu0 %v6487_v49  ;;  %v6491_v49 = vld [vmem:[%s6925_s27 + $0x1f0] ss:$8 sps:$4 sm:$0xff]   ;;  %s9020_s27 = scalar_lea.vmem [#allocation2], %s5770_s26 }
 0x136   : > { %v7137_v62 = vpop.f32.mrf.mxu0  ;;  %2537 = vmatpush1.bf16.msra.mxu1 %v6509_v16 }
 0x137   : > { %v1427_v0 = vmax.f32 %v1002_v53, %v1299_v57  ;;  %v1546_v1 = vpack.c.bf16 %v1426_v56, %v1424_v55  ;;  %v1300_v6 = vmul.f32 0.2, %v1006_v58  ;;  %2538 = vmatprep.subr.bf16.mxu1 %v6514_v43  ;;  %2892 = vmatpush1.bf16.msra.mxu0 %v6524_v50  ;;  %v6529_v55 = vld [vmem:[%s9520_s5 + $0x4c] ss:$16 sps:$4 sm:$0xff]   ;;  %v6527_v57 = vld [vmem:[%s9520_s5 + $0x48] ss:$16 sps:$4 sm:$0xff]  }
 0x138   : > { %v1009_v2 = vpop.f32.mrf.mxu0  ;;  %2893 = vmatprep.subr.bf16.mxu0 %v6529_v55  ;;  %v6553_v50 = vld [vmem:[%s9520_s5 + $0x1ac] ss:$16 sps:$4 sm:$0xff]  }
 0x139   : > { %v7141_v5 = vpack.c.bf16 %v1427_v0, %v1425_v63  ;;  %v1010_v7 = vadd.f32 %v1009_v2, %v7073_v31  ;;  %6211 = vmatmul.mubr.bf16.gmra.mxu1 %v1546_v1  ;;  %v1428_v13 = vmax.f32 %v1006_v58, %v1300_v6  ;;  %v6521_v63 = vld [vmem:[%s9520_s5 + $0x40] ss:$16 sps:$4 sm:$0xff]   ;;  %v6523_v0 = vld [vmem:[%s9520_s5 + $0x44] ss:$16 sps:$4 sm:$0xff]   ;;  %v6533_v6 = vld [vmem:[%s9520_s5 + $0x28] ss:$16 sps:$4 sm:$0xff]  }
 0x13a   : > { %v7150_v10 = vpop.f32.mrf.mxu0  ;;  %2539 = vmatpush1.bf16.msra.mxu1 %v6512_v42 }
 0x13b   : > { %v1302_v11 = vmul.f32 0.2, %v1010_v7  ;;  %2894 = vmatpush1.bf16.msra.mxu0 %v6527_v57  ;;  %2540 = vmatprep.subr.bf16.mxu1 %v6523_v0 }
 0x13c   : > { %v1015_v12 = vpop.f32.mrf.mxu0  ;;  %1254 = vmatmul.mubr.bf16.gmra.mxu0 %v6485_v3  ;;  %v6535_v3 = vld [vmem:[%s9520_s5 + $0x2c] ss:$16 sps:$4 sm:$0xff]  }
 0x13d   : > { %v1430_v14 = vmax.f32 %v1010_v7, %v1302_v11  ;;  %v1016_v15 = vadd.f32 %v1015_v12, %v7073_v31  ;;  %1263 = vmatprep.mubr.bf16.mxu0 %v6490_v4  ;;  %2895 = vmatprep.subr.bf16.mxu0 %v6535_v3  ;;  %v6538_v12 = vld [vmem:[%s9520_s5 + $0xc] ss:$16 sps:$4 sm:$0xff]   ;;  %v6548_v3 = vld [vmem:[%s9520_s5 + $0x1e0] ss:$16 sps:$4 sm:$0xff]  }
 0x13e   : > { %v7159_v19 = vpop.f32.mrf.mxu0  ;;  %2541 = vmatpush1.bf16.msra.mxu1 %v6521_v63 }
 0x13f   : > { %v1548_v20 = vpack.c.bf16 %v1430_v14, %v1428_v13  ;;  %v1304_v28 = vmul.f32 0.2, %v1016_v15  ;;  %2896 = vmatpush1.bf16.msra.mxu0 %v6533_v6  ;;  %v6536_v14 = vld [vmem:[%s9520_s5 + $0x8] ss:$16 sps:$4 sm:$0xff]   ;;  %2542 = vmatprep.subr.bf16.mxu1 %v6532_v21 }
 0x140   : > { %v1019_v23 = vpop.f32.mrf.mxu0  ;;  %2897 = vmatprep.subr.bf16.mxu0 %v6538_v12  ;;  %v6560_v12 = vld [vmem:[%s9520_s5 + $0x168] ss:$16 sps:$4 sm:$0xff]  }
 0x141   : > { %v1020_v30 = vadd.f32 %v1019_v23, %v7073_v31  ;;  %6214 = vmatprep.mubr.bf16.mxu1 %v1548_v20  ;;  %v1432_v39 = vmax.f32 %v1016_v15, %v1304_v28  ;;  %v6530_v20 = vld [vmem:[%s9520_s5 + $0x20] ss:$16 sps:$4 sm:$0xff]   ;;  %v6563_v21 = vld [vmem:[%s9520_s5 + $0x148] ss:$16 sps:$4 sm:$0xff]  }
 0x142   : > { %v7170_v34 = vpop.f32.mrf.mxu0  ;;  %2543 = vmatpush1.bf16.msra.mxu1 %v6530_v20 }
 0x143   : > { %v1306_v35 = vmul.f32 0.2, %v1020_v30  ;;  %2898 = vmatpush1.bf16.msra.mxu0 %v6536_v14  ;;  %2544 = vmatprep.subr.bf16.mxu1 %v6541_v47  ;;  %v6574_v47 = vld [vmem:[%s9520_s5 + $0x10c] ss:$16 sps:$4 sm:$0xff]  }
 0x144   : > { %v1025_v37 = vpop.f32.mrf.mxu0  ;;  %1264 = vmatmul.mubr.bf16.gmra.mxu0 %v6488_v24  ;;  %2899 = vmatprep.subr.bf16.mxu0 %v6544_v25 }
 0x145   : > { %v1434_v40 = vmax.f32 %v1020_v30, %v1306_v35  ;;  %v1026_v41 = vadd.f32 %v1025_v37, %v7073_v31  ;;  %1273 = vmatprep.mubr.bf16.mxu0 %v6493_v32  ;;  %v6542_v30 = vld [vmem:[%s9520_s5 + $0x1e8] ss:$16 sps:$4 sm:$0xff]  }
 0x146   : > { %v7185_v44 = vpop.f32.mrf.mxu0 }
 0x147   : > { %v1550_v45 = vpack.c.bf16 %v1434_v40, %v1432_v39  ;;  %v1308_v51 = vmul.f32 0.2, %v1026_v41  ;;  %2900 = vmatpush2.bf16.msra.mxu0 %v6542_v30  ;;  %v6545_v40 = vld [vmem:[%s9520_s5 + $0x1c8] ss:$16 sps:$4 sm:$0xff]   ;;  %v6557_v30 = vld [vmem:[%s9520_s5 + $0x1c0] ss:$16 sps:$4 sm:$0xff]  }
 0x148   : > { %v1029_v48 = vpop.f32.mrf.mxu0  ;;  %2901 = vmatprep.subr.bf16.mxu0 %v6547_v38  ;;  %v6571_v38 = vld [vmem:[%s9520_s5 + $0x12c] ss:$16 sps:$4 sm:$0xff]  }
 0x149   : > { %v1030_v52 = vadd.f32 %v1029_v48, %v7073_v31  ;;  %6215 = vmatmul.mubr.bf16.gmra.mxu1 %v1550_v45  ;;  %v1436_v58 = vmax.f32 %v1026_v41, %v1308_v51  ;;  %v6539_v45 = vld [vmem:[%s9520_s5] ss:$16 sps:$4 sm:$0xff]  }
 0x14a   : > { %v7195_v53 = vpop.f32.mrf.mxu0  ;;  %2545 = vmatpush1.bf16.msra.mxu1 %v6539_v45 }
 0x14b   : > { %v1310_v54 = vmul.f32 0.2, %v1030_v52  ;;  %2902 = vmatpush2.bf16.msra.mxu0 %v6545_v40  ;;  %v6569_v40 = vld [vmem:[%s9520_s5 + $0x128] ss:$16 sps:$4 sm:$0xff]  }
 0x14c   : > { %v1035_v56 = vpop.f32.mrf.mxu0  ;;  %1274 = vmatmul.mubr.bf16.gmra.mxu0 %v6491_v49  ;;  %2903 = vmatprep.subr.bf16.mxu0 %v6553_v50  ;;  %v6572_v50 = vld [vmem:[%s9520_s5 + $0x108] ss:$16 sps:$4 sm:$0xff]  }
 0x14d   : > { %v1438_v60 = vmax.f32 %v1030_v52, %v1310_v54  ;;  %v1036_v61 = vadd.f32 %v1035_v56, %v7073_v31  ;;  %v6551_v52 = vld [vmem:[%s9520_s5 + $0x1a8] ss:$16 sps:$4 sm:$0xff]  }
 0x14e   : > { %v7210_v1 = vpop.f32.mrf.mxu0 }
 0x14f   : > { %v1552_v2 = vpack.c.bf16 %v1438_v60, %v1436_v58  ;;  %v1312_v7 = vmul.f32 0.2, %v1036_v61  ;;  %2904 = vmatpush2.bf16.msra.mxu0 %v6551_v52  ;;  %v6556_v58 = vld [vmem:[%s9520_s5 + $0x18c] ss:$16 sps:$4 sm:$0xff]  }
 0x150   : > { %v1039_v4 = vpop.f32.mrf.mxu0  ;;  %2905 = vmatprep.subr.bf16.mxu0 %v6556_v58 }
 0x151   : > { %v1040_v8 = vadd.f32 %v1039_v4, %v7073_v31  ;;  %6218 = vmatprep.mubr.bf16.mxu1 %v1552_v2  ;;  %v1440_v15 = vmax.f32 %v1036_v61, %v1312_v7  ;;  %v6554_v61 = vld [vmem:[%s9520_s5 + $0x188] ss:$16 sps:$4 sm:$0xff]   ;;  %v6550_v4 = vld [vmem:[%s9520_s5 + $0x1e4] ss:$16 sps:$4 sm:$0xff]  }
 0x152   : > { %v7219_v9 = vpop.f32.mrf.mxu0  ;;  %2546 = vmatprep.subr.bf16.mxu1 %v6550_v4 }
 0x153   : > { %v1314_v11 = vmul.f32 0.2, %v1040_v8  ;;  %2906 = vmatpush2.bf16.msra.mxu0 %v6554_v61  ;;  %2547 = vmatpush2.bf16.msra.mxu1 %v6548_v3 }
 0x154   : > { %v1045_v13 = vpop.f32.mrf.mxu0 }
 0x155   : > { %v1442_v16 = vmax.f32 %v1040_v8, %v1314_v11  ;;  %v1046_v17 = vadd.f32 %v1045_v13, %v7073_v31  ;;  %v6562_v8 = vld [vmem:[%s9520_s5 + $0x16c] ss:$16 sps:$4 sm:$0xff]  }
 0x156   : > { %v7234_v23 = vpop.f32.mrf.mxu0  ;;  %2907 = vmatprep.subr.bf16.mxu0 %v6562_v8 }
 0x157   : > { %v1554_v24 = vpack.c.bf16 %v1442_v16, %v1440_v15  ;;  %v1316_v32 = vmul.f32 0.2, %v1046_v17  ;;  %2908 = vmatpush2.bf16.msra.mxu0 %v6560_v12  ;;  %v6575_v12 = vld [vmem:[%s9520_s5 + $0x180] ss:$16 sps:$4 sm:$0xff]  }
 0x158   : > { %v1049_v28 = vpop.f32.mrf.mxu0 }
 0x159   : > { %v1050_v35 = vadd.f32 %v1049_v28, %v7073_v31  ;;  %6219 = vmatmul.mubr.bf16.gmra.mxu1 %v1554_v24  ;;  %v1444_v41 = vmax.f32 %v1046_v17, %v1316_v32  ;;  %v6565_v17 = vld [vmem:[%s9520_s5 + $0x14c] ss:$16 sps:$4 sm:$0xff]   ;;  %v6559_v32 = vld [vmem:[%s9520_s5 + $0x1c4] ss:$16 sps:$4 sm:$0xff]  }
 0x15a   : > { %v7243_v36 = vpop.f32.mrf.mxu0  ;;  %2909 = vmatprep.subr.bf16.mxu0 %v6565_v17  ;;  %2548 = vmatprep.subr.bf16.mxu1 %v6559_v32 }
 0x15b   : > { %v1318_v37 = vmul.f32 0.2, %v1050_v35  ;;  %2910 = vmatpush2.bf16.msra.mxu0 %v6563_v21  ;;  %2549 = vmatpush2.bf16.msra.mxu1 %v6557_v30 }
 0x15c   : > { %v1055_v39 = vpop.f32.mrf.mxu0  ;;  %2911 = vmatprep.subr.bf16.mxu0 %v6571_v38  ;;  %v6578_v38 = vld [vmem:[%s9520_s5 + $0x160] ss:$16 sps:$4 sm:$0xff]  }
 0x15d   : > { %v1446_v42 = vmax.f32 %v1050_v35, %v1318_v37  ;;  %v1056_v43 = vadd.f32 %v1055_v39, %v7073_v31 }
 0x15e   : > { %v7258_v48 = vpop.f32.mrf.mxu0 }
 0x15f   : > { %v1556_v49 = vpack.c.bf16 %v1446_v42, %v1444_v41  ;;  %v1320_v54 = vmul.f32 0.2, %v1056_v43  ;;  %2912 = vmatpush2.bf16.msra.mxu0 %v6569_v40 }
 0x160   : > { %v1059_v51 = vpop.f32.mrf.mxu0  ;;  %2913 = vmatprep.subr.bf16.mxu0 %v6574_v47 }
 0x161   : > { %v1060_v55 = vadd.f32 %v1059_v51, %v7073_v31  ;;  %6222 = vmatprep.mubr.bf16.mxu1 %v1556_v49  ;;  %v1448_v63 = vmax.f32 %v1056_v43, %v1320_v54 }
 0x162   : > { %v7267_v56 = vpop.f32.mrf.mxu0 }
 0x163   : > { %v1322_v57 = vmul.f32 0.2, %v1060_v55  ;;  %2914 = vmatpush2.bf16.msra.mxu0 %v6572_v50 }
 0x164   : > { %v1065_v60 = vpop.f32.mrf.mxu0 }
 0x165   : > { %v1450_v0 = vmax.f32 %v1060_v55, %v1322_v57  ;;  %v1066_v2 = vadd.f32 %v1065_v60, %v7073_v31  ;;  %v6566_v55 = vld [vmem:[%s9520_s5 + $0x1a0] ss:$16 sps:$4 sm:$0xff]   ;;  %v6568_v57 = vld [vmem:[%s9520_s5 + $0x1a4] ss:$16 sps:$4 sm:$0xff]  }
 0x166   : > { %v7282_v6 = vpop.f32.mrf.mxu0  ;;  %2550 = vmatprep.subr.bf16.mxu1 %v6568_v57  ;;  %v6581_v57 = vld [vmem:[%s9520_s5 + $0x140] ss:$16 sps:$4 sm:$0xff]  }
 0x167   : > { %v1558_v7 = vpack.c.bf16 %v1450_v0, %v1448_v63  ;;  %v1324_v13 = vmul.f32 0.2, %v1066_v2  ;;  %2551 = vmatpush2.bf16.msra.mxu1 %v6566_v55 }
 0x168   : > { %v1069_v11 = vpop.f32.mrf.mxu0 }
 0x169   : > { %v1070_v14 = vadd.f32 %v1069_v11, %v7073_v31  ;;  %6223 = vmatmul.mubr.bf16.gmra.mxu1 %v1558_v7  ;;  %v1452_v24 = vmax.f32 %v1066_v2, %v1324_v13  ;;  %v6577_v13 = vld [vmem:[%s9520_s5 + $0x184] ss:$16 sps:$4 sm:$0xff]  }
 0x16a   : > { %v7291_v15 = vpop.f32.mrf.mxu0  ;;  %2552 = vmatprep.subr.bf16.mxu1 %v6577_v13 }
 0x16b   : > { %v1326_v16 = vmul.f32 0.2, %v1070_v14  ;;  %2553 = vmatpush2.bf16.msra.mxu1 %v6575_v12 }
 0x16c   : > { %v1075_v20 = vpop.f32.mrf.mxu0 }
 0x16d   : > { %v1454_v25 = vmax.f32 %v1070_v14, %v1326_v16  ;;  %v1076_v28 = vadd.f32 %v1075_v20, %v7073_v31 }
 0x16e   : > { %v7306_v35 = vpop.f32.mrf.mxu0 }
 0x16f   : > { %v1560_v37 = vpack.c.bf16 %v1454_v25, %v1452_v24  ;;  %v1328_v41 = vmul.f32 0.2, %v1076_v28 }
 0x170   : > { %v1079_v39 = vpop.f32.mrf.mxu0 }
 0x171   : > { %v1080_v42 = vadd.f32 %v1079_v39, %v7073_v31  ;;  %6226 = vmatprep.mubr.bf16.mxu1 %v1560_v37  ;;  %v1456_v51 = vmax.f32 %v1076_v28, %v1328_v41  ;;  %v6580_v39 = vld [vmem:[%s9520_s5 + $0x164] ss:$16 sps:$4 sm:$0xff]  }
 0x172   : > { %v7315_v43 = vpop.f32.mrf.mxu0  ;;  %2554 = vmatprep.subr.bf16.mxu1 %v6580_v39 }
 0x173   : > { %v1330_v45 = vmul.f32 0.2, %v1080_v42  ;;  %2555 = vmatpush2.bf16.msra.mxu1 %v6578_v38  ;;  %v6589_v38 = vld [vmem:[%s9520_s5 + $0x104] ss:$16 sps:$4 sm:$0xff]  }
 0x174   : > { %v1085_v49 = vpop.f32.mrf.mxu0 }
 0x175   : > { %v1458_v52 = vmax.f32 %v1080_v42, %v1330_v45  ;;  %v1086_v54 = vadd.f32 %v1085_v49, %v7073_v31 }
 0x176   : > { %v7330_v58 = vpop.f32.mrf.mxu0 }
 0x177   : > { %v1562_v60 = vpack.c.bf16 %v1458_v52, %v1456_v51  ;;  %v1332_v63 = vmul.f32 0.2, %v1086_v54 }
 0x178   : > { %v1089_v61 = vpop.f32.mrf.mxu0 }
 0x179   : > { %v1090_v0 = vadd.f32 %v1089_v61, %v7073_v31  ;;  %6227 = vmatmul.mubr.bf16.gmra.mxu1 %v1562_v60  ;;  %v1460_v7 = vmax.f32 %v1086_v54, %v1332_v63  ;;  %v6583_v60 = vld [vmem:[%s9520_s5 + $0x144] ss:$16 sps:$4 sm:$0xff]  }
 0x17a   : > { %v7333_v2 = vpop.f32.mrf.mxu0  ;;  %2556 = vmatprep.subr.bf16.mxu1 %v6583_v60 }
 0x17b   : > { %v1334_v3 = vmul.f32 0.2, %v1090_v0  ;;  %2557 = vmatpush2.bf16.msra.mxu1 %v6581_v57 }
 0x17c   : > { %v1095_v4 = vpop.f32.mrf.mxu0 }
 0x17d   : > { %v1462_v8 = vmax.f32 %v1090_v0, %v1334_v3  ;;  %v1096_v11 = vadd.f32 %v1095_v4, %v7073_v31 }
 0x17e   : > { %v7342_v14 = vpop.f32.mrf.mxu0 }
 0x17f   : > { %v1564_v16 = vpack.c.bf16 %v1462_v8, %v1460_v7  ;;  %v1336_v20 = vmul.f32 0.2, %v1096_v11 }
 0x180   : > { %v1099_v17 = vpop.f32.mrf.mxu0 }
 0x181   : > { %v1100_v21 = vadd.f32 %v1099_v17, %v7073_v31  ;;  %6230 = vmatprep.mubr.bf16.mxu1 %v1564_v16  ;;  %v1464_v30 = vmax.f32 %v1096_v11, %v1336_v20  ;;  %v6584_v17 = vld [vmem:[%s9520_s5 + $0x120] ss:$16 sps:$4 sm:$0xff]   ;;  %v6586_v20 = vld [vmem:[%s9520_s5 + $0x124] ss:$16 sps:$4 sm:$0xff]  }
 0x182   : > { %v7345_v24 = vpop.f32.mrf.mxu0  ;;  %2558 = vmatprep.subr.bf16.mxu1 %v6586_v20 }
 0x183   : > { %v1338_v25 = vmul.f32 0.2, %v1100_v21  ;;  %2559 = vmatpush2.bf16.msra.mxu1 %v6584_v17 }
 0x184   : > { %v1105_v28 = vpop.f32.mrf.mxu0  ;;  %2560 = vmatprep.subr.bf16.mxu1 %v6589_v38 }
 0x185   : > { %v1466_v32 = vmax.f32 %v1100_v21, %v1338_v25  ;;  %v1106_v37 = vadd.f32 %v1105_v28, %v7073_v31 }
 0x186   : > { %v7354_v40 = vpop.f32.mrf.mxu0 }
 0x187   : > { %v1566_v41 = vpack.c.bf16 %v1466_v32, %v1464_v30  ;;  %v1340_v45 = vmul.f32 0.2, %v1106_v37 }
 0x188   : > { %v1109_v42 = vpop.f32.mrf.mxu0 }
 0x189   : > { %v1110_v47 = vadd.f32 %v1109_v42, %v7073_v31  ;;  %6231 = vmatmul.mubr.bf16.gmra.mxu1 %v1566_v41  ;;  %v1468_v52 = vmax.f32 %v1106_v37, %v1340_v45  ;;  %v6587_v37 = vld [vmem:[%s9520_s5 + $0x100] ss:$16 sps:$4 sm:$0xff]  }
 0x18a   : > { %v7357_v49 = vpop.f32.mrf.mxu0  ;;  %2561 = vmatpush2.bf16.msra.mxu1 %v6587_v37 }
 0x18b   : > { %v1342_v50 = vmul.f32 0.2, %v1110_v47  ;;  %6270 = vmatprep.subr.bf16.mxu1 %v7112_v22 }
 0x18c   : > { %v1115_v51 = vpop.f32.mrf.mxu0 }
 0x18d   : > { %v1470_v54 = vmax.f32 %v1110_v47, %v1342_v50  ;;  %v1116_v55 = vadd.f32 %v1115_v51, %v7073_v31 }
 0x18e   : > { %v7366_v61 = vpop.f32.mrf.mxu0 }
 0x18f   : > { %v1568_v63 = vpack.c.bf16 %v1470_v54, %v1468_v52  ;;  %v1344_v3 = vmul.f32 0.2, %v1116_v55 }
 0x190   : > { %v1119_v0 = vpop.f32.mrf.mxu0 }
 0x191   : > { %v1120_v4 = vadd.f32 %v1119_v0, %v7073_v31  ;;  %6234 = vmatprep.mubr.bf16.mxu1 %v1568_v63  ;;  %v1472_v12 = vmax.f32 %v1116_v55, %v1344_v3 }
 0x192   : > { %v7369_v7 = vpop.f32.mrf.mxu0 }
 0x193   : > { %v1346_v8 = vmul.f32 0.2, %v1120_v4 }
 0x194   : > { %v1125_v11 = vpop.f32.mrf.mxu0 }
 0x195   : > { %v1474_v13 = vmax.f32 %v1120_v4, %v1346_v8  ;;  %v1126_v16 = vadd.f32 %v1125_v11, %v7073_v31 }
 0x196   : > { %v7378_v21 = vpop.f32.mrf.mxu0 }
 0x197   : > { %v1570_v25 = vpack.c.bf16 %v1474_v13, %v1472_v12  ;;  %v1348_v30 = vmul.f32 0.2, %v1126_v16 }
 0x198   : > { %v1129_v28 = vpop.f32.mrf.mxu0 }
 0x199   : > { %v1130_v32 = vadd.f32 %v1129_v28, %v7073_v31  ;;  %6235 = vmatmul.mubr.bf16.gmra.mxu1 %v1570_v25  ;;  %v1476_v45 = vmax.f32 %v1126_v16, %v1348_v30 }
 0x19a   : > { %v7387_v39 = vpop.f32.mrf.mxu0 }
 0x19b   : > { %v1350_v41 = vmul.f32 0.2, %v1130_v32 }
 0x19c   : > { %v1135_v42 = vpop.f32.mrf.mxu0 }
 0x19d   : > { %v1478_v47 = vmax.f32 %v1130_v32, %v1350_v41  ;;  %v1136_v50 = vadd.f32 %v1135_v42, %v7073_v31 }
 0x19e   : > { %v7391_v51 = vpop.f32.mrf.mxu0 }
 0x19f   : > { %v1572_v52 = vpack.c.bf16 %v1478_v47, %v1476_v45  ;;  %v1352_v55 = vmul.f32 0.2, %v1136_v50 }
 0x1a0   : > { %v1139_v54 = vpop.f32.mrf.mxu0 }
 0x1a1   : > { %v1140_v57 = vadd.f32 %v1139_v54, %v7073_v31  ;;  %6238 = vmatprep.mubr.bf16.mxu1 %v1572_v52  ;;  %v1480_v3 = vmax.f32 %v1136_v50, %v1352_v55 }
 0x1a2   : > { %v7394_v60 = vpop.f32.mrf.mxu0 }
 0x1a3   : > { %v1354_v63 = vmul.f32 0.2, %v1140_v57 }
 0x1a4   : > { %v1145_v0 = vpop.f32.mrf.mxu0 }
 0x1a5   : > { %v1482_v4 = vmax.f32 %v1140_v57, %v1354_v63  ;;  %v1146_v8 = vadd.f32 %v1145_v0, %v7073_v31 }
 0x1a6   : > { %v7397_v11 = vpop.f32.mrf.mxu0 }
 0x1a7   : > { %9536 = vst [vmem:[#allocation8_spill] sm:$0xff] %v7397_v11  ;;  %v1574_v12 = vpack.c.bf16 %v1482_v4, %v1480_v3  ;;  %v1356_v13 = vmul.f32 0.2, %v1146_v8 }
 0x1a8   : > { %v1149_v22 = vpop.f32.mrf.mxu0 }
 0x1a9   : > { %v1150_v16 = vadd.f32 %v1149_v22, %v7073_v31  ;;  %6239 = vmatmul.mubr.bf16.gmra.mxu1 %v1574_v12  ;;  %v1484_v28 = vmax.f32 %v1146_v8, %v1356_v13 }
 0x1aa   : > { %v7400_v17 = vpop.f32.mrf.mxu0 }
 0x1ab   : > { %9537 = vst [vmem:[#allocation9_spill] sm:$0xff] %v7400_v17  ;;  %v1358_v20 = vmul.f32 0.2, %v1150_v16 }
 0x1ac   : > { %v1155_v25 = vpop.f32.mrf.mxu0 }
 0x1ad   : > { %v1486_v30 = vmax.f32 %v1150_v16, %v1358_v20  ;;  %v1156_v32 = vadd.f32 %v1155_v25, %v7073_v31 }
 0x1ae   : > { %v7403_v37 = vpop.f32.mrf.mxu0 }
 0x1af   : > { %9538 = vst [vmem:[#allocation10_spill] sm:$0xff] %v7403_v37  ;;  %v1576_v38 = vpack.c.bf16 %v1486_v30, %v1484_v28  ;;  %v1360_v42 = vmul.f32 0.2, %v1156_v32 }
 0x1b0   : > { %v1159_v41 = vpop.f32.mrf.mxu0 }
 0x1b1   : > { %v1160_v45 = vadd.f32 %v1159_v41, %v7073_v31  ;;  %6242 = vmatprep.mubr.bf16.mxu1 %v1576_v38  ;;  %v1488_v54 = vmax.f32 %v1156_v32, %v1360_v42 }
 0x1b2   : > { %v7406_v47 = vpop.f32.mrf.mxu0 }
 0x1b3   : > { %9539 = vst [vmem:[#allocation11_spill] sm:$0xff] %v7406_v47  ;;  %v1362_v50 = vmul.f32 0.2, %v1160_v45  ;;  %v6592_v47 = vld [vmem:[%s9522_s7 + $0x174] ss:$8 sps:$4 sm:$0xff]  }
 0x1b4   : > { %v1165_v52 = vpop.f32.mrf.mxu0  ;;  %4625 = vmatprep.subr.bf16.mxu0 %v6592_v47  ;;  %v1008_v47 = vadd.f32 %v7137_v62, %v7077_v33  ;;  %v6598_v62 = vld [vmem:[%s9522_s7 + $0x154] ss:$8 sps:$4 sm:$0xff]  }
 0x1b5   : > { %v1490_v55 = vmax.f32 %v1160_v45, %v1362_v50  ;;  %v1166_v57 = vadd.f32 %v1165_v52, %v7073_v31 }
 0x1b6   : > { %v7409_v63 = vpop.f32.mrf.mxu0 }
 0x1b7   : > { %9540 = vst [vmem:[#allocation12_spill] sm:$0xff] %v7409_v63  ;;  %v1578_v0 = vpack.c.bf16 %v1490_v55, %v1488_v54  ;;  %v1364_v4 = vmul.f32 0.2, %v1166_v57 }
 0x1b8   : > { %v1169_v3 = vpop.f32.mrf.mxu0 }
 0x1b9   : > { %v1170_v8 = vadd.f32 %v1169_v3, %v7073_v31  ;;  %6243 = vmatmul.mubr.bf16.gmra.mxu1 %v1578_v0  ;;  %v1492_v16 = vmax.f32 %v1166_v57, %v1364_v4 }
 0x1ba   : > { %v7412_v12 = vpop.f32.mrf.mxu0 }
 0x1bb   : > { %9541 = vst [vmem:[#allocation13_spill] sm:$0xff] %v7412_v12  ;;  %v1366_v22 = vmul.f32 0.2, %v1170_v8 }
 0x1bc   : > { %v1175_v13 = vpop.f32.mrf.mxu0 }
 0x1bd   : > { %v1494_v20 = vmax.f32 %v1170_v8, %v1366_v22  ;;  %v1176_v25 = vadd.f32 %v1175_v13, %v7073_v31 }
 0x1be   : > { %v7415_v28 = vpop.f32.mrf.mxu0 }
 0x1bf   : > { %9542 = vst [vmem:[#allocation14_spill] sm:$0xff] %v7415_v28  ;;  %v1580_v30 = vpack.c.bf16 %v1494_v20, %v1492_v16  ;;  %v1368_v38 = vmul.f32 0.2, %v1176_v25 }
 0x1c0   : > { %v1179_v32 = vpop.f32.mrf.mxu0 }
 0x1c1   : > { %v1180_v41 = vadd.f32 %v1179_v32, %v7073_v31  ;;  %6246 = vmatprep.mubr.bf16.mxu1 %v1580_v30  ;;  %v1496_v52 = vmax.f32 %v1176_v25, %v1368_v38 }
 0x1c2   : > { %v7418_v42 = vpop.f32.mrf.mxu0 }
 0x1c3   : > { %9543 = vst [vmem:[#allocation15_spill] sm:$0xff] %v7418_v42  ;;  %v1370_v45 = vmul.f32 0.2, %v1180_v41 }
 0x1c4   : > { %v1185_v50 = vpop.f32.mrf.mxu0 }
 0x1c5   : > { %v1498_v54 = vmax.f32 %v1180_v41, %v1370_v45  ;;  %v1186_v55 = vadd.f32 %v1185_v50, %v7073_v31 }
 0x1c6   : > { %v7421_v57 = vpop.f32.mrf.mxu0 }
 0x1c7   : > { %9544 = vst [vmem:[#allocation16_spill] sm:$0xff] %v7421_v57  ;;  %v1582_v0 = vpack.c.bf16 %v1498_v54, %v1496_v52  ;;  %v1372_v4 = vmul.f32 0.2, %v1186_v55 }
 0x1c8   : > { %v1189_v3 = vpop.f32.mrf.mxu0 }
 0x1c9   : > { %v1190_v8 = vadd.f32 %v1189_v3, %v7073_v31  ;;  %6247 = vmatmul.mubr.bf16.gmra.mxu1 %v1582_v0  ;;  %v1500_v20 = vmax.f32 %v1186_v55, %v1372_v4 }
 0x1ca   : > { %v7424_v22 = vpop.f32.mrf.mxu0 }
 0x1cb   : > { %9545 = vst [vmem:[#allocation17_spill] sm:$0xff] %v7424_v22  ;;  %v1374_v13 = vmul.f32 0.2, %v1190_v8 }
 0x1cc   : > { %v1195_v16 = vpop.f32.mrf.mxu0 }
 0x1cd   : > { %v1502_v30 = vmax.f32 %v1190_v8, %v1374_v13  ;;  %v1196_v32 = vadd.f32 %v1195_v16, %v7073_v31 }
 0x1ce   : > { %v7427_v25 = vpop.f32.mrf.mxu0 }
 0x1cf   : > { %9546 = vst [vmem:[#allocation18_spill] sm:$0xff] %v7427_v25  ;;  %v1584_v38 = vpack.c.bf16 %v1502_v30, %v1500_v20  ;;  %v1376_v45 = vmul.f32 0.2, %v1196_v32 }
 0x1d0   : > { %v1199_v41 = vpop.f32.mrf.mxu0 }
 0x1d1   : > { %v1200_v50 = vadd.f32 %v1199_v41, %v7073_v31  ;;  %6250 = vmatprep.mubr.bf16.mxu1 %v1584_v38  ;;  %v1504_v3 = vmax.f32 %v1196_v32, %v1376_v45 }
 0x1d2   : > { %v7430_v52 = vpop.f32.mrf.mxu0 }
 0x1d3   : > { %9547 = vst [vmem:[#allocation19_spill] sm:$0xff] %v7430_v52  ;;  %v1378_v54 = vmul.f32 0.2, %v1200_v50 }
 0x1d4   : > { %v1205_v0 = vpop.f32.mrf.mxu0 }
 0x1d5   : > { %v1506_v29 = vmax.f32 %v1200_v50, %v1378_v54  ;;  %v1206_v27 = vadd.f32 %v1205_v0, %v7073_v31 }
 0x1d6   : > { %v7433_v55 = vpop.f32.mrf.mxu0 }
 0x1d7   : > { %9548 = vst [vmem:[#allocation20_spill] sm:$0xff] %v7433_v55  ;;  %v1586_v4 = vpack.c.bf16 %v1506_v29, %v1504_v3  ;;  %v1380_v13 = vmul.f32 0.2, %v1206_v27 }
 0x1d8   : > { %v1209_v8 = vpop.f32.mrf.mxu0 }
 0x1d9   : > { %v1210_v16 = vadd.f32 %v1209_v8, %v7073_v31  ;;  %6251 = vmatmul.mubr.bf16.gmra.mxu1 %v1586_v4  ;;  %v1508_v41 = vmax.f32 %v1206_v27, %v1380_v13 }
 0x1da   : > { %v7436_v20 = vpop.f32.mrf.mxu0 }
 0x1db   : > { %9549 = vst [vmem:[#allocation21_spill] sm:$0xff] %v7436_v20  ;;  %v1382_v30 = vmul.f32 0.2, %v1210_v16 }
 0x1dc   : > { %v1215_v38 = vpop.f32.mrf.mxu0 }
 0x1dd   : > { %v1510_v26 = vmax.f32 %v1210_v16, %v1382_v30  ;;  %v1216_v25 = vadd.f32 %v1215_v38, %v7073_v31 }
 0x1de   : > { %v7439_v32 = vpop.f32.mrf.mxu0 }
 0x1df   : > { %9550 = vst [vmem:[#allocation22_spill] sm:$0xff] %v7439_v32  ;;  %v1588_v45 = vpack.c.bf16 %v1510_v26, %v1508_v41  ;;  %v1384_v54 = vmul.f32 0.2, %v1216_v25 }
 0x1e0   : > { %v1219_v50 = vpop.f32.mrf.mxu0 }
 0x1e1   : > { %v1220_v29 = vadd.f32 %v1219_v50, %v7073_v31  ;;  %6254 = vmatprep.mubr.bf16.mxu1 %v1588_v45  ;;  %v1512_v8 = vmax.f32 %v1216_v25, %v1384_v54  ;;  %v7453_v50 = vld [vmem:[%s9519_s4] ss:$0 sm:$0xff] }
 0x1e2   : > { %v7442_v0 = vpop.f32.mrf.mxu0 }
 0x1e3   : > { %9551 = vst [vmem:[#allocation23_spill] sm:$0xff] %v7442_v0  ;;  %v1386_v3 = vmul.f32 0.2, %v1220_v29 }
 0x1e4   : > { %v1225_v4 = vpop.f32.mrf.mxu0 }
 0x1e5   : > { %v1514_v55 = vmax.f32 %v1220_v29, %v1386_v3  ;;  %v1226_v20 = vadd.f32 %v1225_v4, %v7073_v31 }
 0x1e6   : > { %v7445_v27 = vpop.f32.mrf.mxu0 }
 0x1e7   : > { %9552 = vst [vmem:[#allocation24_spill] sm:$0xff] %v7445_v27  ;;  %v1590_v13 = vpack.c.bf16 %v1514_v55, %v1512_v8  ;;  %v1388_v30 = vmul.f32 0.2, %v1226_v20 }
 0x1e8   : > { %v1229_v16 = vpop.f32.mrf.mxu0 }
 0x1e9   : > { %v1230_v26 = vadd.f32 %v1229_v16, %v7073_v31  ;;  %v6208_v38 = vpop.f32.mrf.mxu1  ;;  %6255 = vmatmul.mubr.bf16.gmra.mxu1 %v1590_v13  ;;  %v1516_v3 = vmax.f32 %v1226_v20, %v1388_v30 }
 0x1ea   : > { %v7448_v41 = vpop.f32.mrf.mxu0  ;;  %v1718_v16 = vadd.f32 %v6208_v38, %v7453_v50 }
 0x1eb   : > { %9553 = vst [vmem:[#allocation25_spill] sm:$0xff] %v7448_v41  ;;  %v1390_v45 = vmul.f32 0.2, %v1230_v26  ;;  %v1709_v25 = vpop.f32.mrf.mxu1 }
 0x1ec   : > { %v1710_v54 = vadd.f32 %v7453_v50, %v1709_v25  ;;  %v1235_v29 = vpop.f32.mrf.mxu0  ;;  %v1966_v30 = vmul.f32 0.2, %v1718_v16 }
 0x1ed   : > { %v1518_v55 = vmax.f32 %v1230_v26, %v1390_v45  ;;  %v1236_v4 = vadd.f32 %v1235_v29, %v7073_v31  ;;  %v6209_v8 = vpop.f32.mrf.mxu1 }
 0x1ee   : > { %v1721_v13 = vadd.f32 %v6209_v8, %v7453_v50  ;;  %v7459_v41 = vpop.f32.mrf.mxu0  ;;  %v1964_v0 = vmul.f32 0.2, %v1710_v54  ;;  %v2030_v63 = vmax.f32 %v1718_v16, %v1966_v30 }
 0x1ef   : > { %9554 = vst [vmem:[#allocation26_spill] sm:$0xff] %v7459_v41  ;;  %v1712_v27 = vpop.f32.mrf.mxu1  ;;  %v1592_v32 = vpack.c.bf16 %v1518_v55, %v1516_v3  ;;  %v1392_v25 = vmul.f32 0.2, %v1236_v4 }
 0x1f0   : > { %v1967_v52 = vmul.f32 0.2, %v1721_v13  ;;  %v1713_v57 = vadd.f32 %v7453_v50, %v1712_v27  ;;  %v1239_v22 = vpop.f32.mrf.mxu0  ;;  %v2028_v29 = vmax.f32 %v1710_v54, %v1964_v0 }
 0x1f1   : > { %v1240_v20 = vadd.f32 %v1239_v22, %v7073_v31  ;;  %6258 = vmatprep.mubr.bf16.mxu1 %v1592_v32  ;;  %v1520_v42 = vmax.f32 %v1236_v4, %v1392_v25 }
 0x1f2   : > { %v1965_v26 = vmul.f32 0.2, %v1713_v57  ;;  %v7463_v45 = vpop.f32.mrf.mxu0  ;;  %v2031_v8 = vmax.f32 %v1721_v13, %v1967_v52 }
 0x1f3   : > { %9555 = vst [vmem:[#allocation27_spill] sm:$0xff] %v7463_v45  ;;  %v1394_v38 = vmul.f32 0.2, %v1240_v20 }
 0x1f4   : > { %v2029_v28 = vmax.f32 %v1713_v57, %v1965_v26  ;;  %v1245_v41 = vpop.f32.mrf.mxu0  ;;  %v7471_v37 = vpack.c.bf16 %v2031_v8, %v2030_v63 }
 0x1f5   : > { %v1522_v3 = vmax.f32 %v1240_v20, %v1394_v38  ;;  %v1246_v55 = vadd.f32 %v1245_v41, %v7073_v31 }
 0x1f6   : > { %v7466_v27 = vpop.f32.mrf.mxu0  ;;  %v7468_v12 = vpack.c.bf16 %v2029_v28, %v2028_v29 }
 0x1f7   : > { %9556 = vst [vmem:[#allocation28_spill] sm:$0xff] %v7466_v27  ;;  %v1594_v22 = vpack.c.bf16 %v1522_v3, %v1520_v42  ;;  %v1396_v45 = vmul.f32 0.2, %v1246_v55 }
 0x1f8   : > { %v1249_v32 = vpop.f32.mrf.mxu0  ;;  %2915 = vmatprep.mubr.bf16.mxu0 %v7468_v12 }
 0x1f9   : > { %v1250_v52 = vadd.f32 %v1249_v32, %v7073_v31  ;;  %v6212_v57 = vpop.f32.mrf.mxu1  ;;  %6259 = vmatmul.mubr.bf16.gmra.mxu1 %v1594_v22  ;;  %2916 = vmatmul.mubr.bf16.vlgmr.msra.gmra.mxu0 %v7088_v59  ;;  %v1524_v4 = vmax.f32 %v1246_v55, %v1396_v45 }
 0x1fa   : > { %v7475_v0 = vpop.f32.mrf.mxu0  ;;  %2925 = vmatprep.mubr.bf16.mxu0 %v7471_v37  ;;  %v1734_v25 = vadd.f32 %v6212_v57, %v7453_v50 }
 0x1fb   : > { %9557 = vst [vmem:[#allocation29_spill] sm:$0xff] %v7475_v0  ;;  %v1398_v41 = vmul.f32 0.2, %v1250_v52  ;;  %v1725_v28 = vpop.f32.mrf.mxu1 }
 0x1fc   : > { %v1726_v42 = vadd.f32 %v7453_v50, %v1725_v28  ;;  %v1255_v54 = vpop.f32.mrf.mxu0  ;;  %v1970_v55 = vmul.f32 0.2, %v1734_v25 }
 0x1fd   : > { %v1526_v16 = vmax.f32 %v1250_v52, %v1398_v41  ;;  %v1256_v63 = vadd.f32 %v1255_v54, %v7073_v31  ;;  %v6213_v13 = vpop.f32.mrf.mxu1 }
 0x1fe   : > { %v1737_v20 = vadd.f32 %v6213_v13, %v7453_v50  ;;  %v7482_v30 = vpop.f32.mrf.mxu0  ;;  %v1968_v29 = vmul.f32 0.2, %v1726_v42  ;;  %v2034_v0 = vmax.f32 %v1734_v25, %v1970_v55 }
 0x1ff   : > { %9558 = vst [vmem:[#allocation30_spill] sm:$0xff] %v7482_v30  ;;  %v1728_v26 = vpop.f32.mrf.mxu1  ;;  %v1596_v38 = vpack.c.bf16 %v1526_v16, %v1524_v4  ;;  %v1400_v32 = vmul.f32 0.2, %v1256_v63 }
 0x200   : > { %v1971_v8 = vmul.f32 0.2, %v1737_v20  ;;  %v1729_v3 = vadd.f32 %v7453_v50, %v1728_v26  ;;  %v1259_v22 = vpop.f32.mrf.mxu0  ;;  %v2032_v28 = vmax.f32 %v1726_v42, %v1968_v29 }
 0x201   : > { %v1260_v45 = vadd.f32 %v1259_v22, %v7073_v31  ;;  %6262 = vmatprep.mubr.bf16.mxu1 %v1596_v38  ;;  %2926 = vmatmul.mubr.bf16.gmra.mxu0 %v7103_v18  ;;  %v1528_v16 = vmax.f32 %v1256_v63, %v1400_v32  ;;  %v6590_v63 = vld [vmem:[%s9522_s7 + $0x170] ss:$8 sps:$4 sm:$0xff]   ;;  %v6595_v32 = vld [vmem:[%s9522_s7 + $0x164] ss:$8 sps:$4 sm:$0xff]  }
 0x202   : > { %v1969_v52 = vmul.f32 0.2, %v1729_v3  ;;  %v7487_v57 = vpop.f32.mrf.mxu0  ;;  %v2035_v54 = vmax.f32 %v1737_v20, %v1971_v8  ;;  %4626 = vmatpush1.bf16.msra.mxu0 %v6590_v63 }
 0x203   : > { %9559 = vst [vmem:[#allocation31_spill] sm:$0xff] %v7487_v57  ;;  %v1402_v41 = vmul.f32 0.2, %v1260_v45  ;;  %4627 = vmatprep.subr.bf16.mxu0 %v6595_v32 }
 0x204   : > { %v2033_v13 = vmax.f32 %v1729_v3, %v1969_v52  ;;  %v1265_v4 = vpop.f32.mrf.mxu0  ;;  %v7498_v42 = vpack.c.bf16 %v2035_v54, %v2034_v0  ;;  %v1012_v0 = vadd.f32 %v7150_v10, %v7077_v33  ;;  %v6593_v52 = vld [vmem:[%s9522_s7 + $0x160] ss:$8 sps:$4 sm:$0xff]  }
 0x205   : > { %v1530_v30 = vmax.f32 %v1260_v45, %v1402_v41  ;;  %v1266_v26 = vadd.f32 %v1265_v4, %v7073_v31 }
 0x206   : > { %v7490_v27 = vpop.f32.mrf.mxu0  ;;  %v7492_v22 = vpack.c.bf16 %v2033_v13, %v2032_v28  ;;  %4628 = vmatpush1.bf16.msra.mxu0 %v6593_v52 }
 0x207   : > { %9560 = vst [vmem:[#allocation32_spill] sm:$0xff] %v7490_v27  ;;  %v1598_v38 = vpack.c.bf16 %v1530_v30, %v1528_v16  ;;  %v1404_v20 = vmul.f32 0.2, %v1266_v26  ;;  %v1303_v16 = vmul.f32 0.2, %v1012_v0  ;;  %4629 = vmatprep.subr.bf16.mxu0 %v6598_v62 }
 0x208   : > { %v1269_v57 = vpop.f32.mrf.mxu0  ;;  %2935 = vmatprep.mubr.bf16.mxu0 %v7492_v22 }
 0x209   : > { %v1270_v25 = vadd.f32 %v1269_v57, %v7073_v31  ;;  %v6216_v29 = vpop.f32.mrf.mxu1  ;;  %6263 = vmatmul.mubr.bf16.gmra.mxu1 %v1598_v38  ;;  %2936 = vmatmul.mubr.bf16.gmra.mxu0 %v7125_v46  ;;  %v1532_v57 = vmax.f32 %v1266_v26, %v1404_v20 }
 0x20a   : > { %v7505_v30 = vpop.f32.mrf.mxu0  ;;  %2945 = vmatprep.mubr.bf16.mxu0 %v7498_v42  ;;  %v1750_v54 = vadd.f32 %v6216_v29, %v7453_v50  ;;  %v6596_v29 = vld [vmem:[%s9522_s7 + $0x150] ss:$8 sps:$4 sm:$0xff]  }
 0x20b   : > { %9561 = vst [vmem:[#allocation33_spill] sm:$0xff] %v7505_v30  ;;  %v1406_v8 = vmul.f32 0.2, %v1270_v25  ;;  %v1741_v3 = vpop.f32.mrf.mxu1  ;;  %4630 = vmatpush1.bf16.msra.mxu0 %v6596_v29 }
 0x20c   : > { %v1742_v45 = vadd.f32 %v7453_v50, %v1741_v3  ;;  %v1275_v55 = vpop.f32.mrf.mxu0  ;;  %v1301_v3 = vmul.f32 0.2, %v1008_v47  ;;  %v1974_v52 = vmul.f32 0.2, %v1750_v54 }
 0x20d   : > { %v1534_v41 = vmax.f32 %v1270_v25, %v1406_v8  ;;  %v1276_v10 = vadd.f32 %v1275_v55, %v7073_v31  ;;  %v6217_v28 = vpop.f32.mrf.mxu1 }
 0x20e   : > { %v1753_v13 = vadd.f32 %v6217_v28, %v7453_v50  ;;  %v7522_v4 = vpop.f32.mrf.mxu0  ;;  %v1972_v26 = vmul.f32 0.2, %v1742_v45  ;;  %v1022_v28 = vadd.f32 %v7170_v34, %v7077_v33  ;;  %v2038_v34 = vmax.f32 %v1750_v54, %v1974_v52 }
 0x20f   : > { %9562 = vst [vmem:[#allocation34_spill] sm:$0xff] %v7522_v4  ;;  %v1744_v38 = vpop.f32.mrf.mxu1  ;;  %v1600_v63 = vpack.c.bf16 %v1534_v41, %v1532_v57  ;;  %v1408_v32 = vmul.f32 0.2, %v1276_v10  ;;  %v1431_v41 = vmax.f32 %v1012_v0, %v1303_v16  ;;  %v6601_v4 = vld [vmem:[%s9522_s7 + $0x144] ss:$8 sps:$4 sm:$0xff]   ;;  %v1018_v0 = vadd.f32 %v7159_v19, %v7077_v33 }
 0x210   : > { %v1975_v20 = vmul.f32 0.2, %v1753_v13  ;;  %v1745_v25 = vadd.f32 %v7453_v50, %v1744_v38  ;;  %v1279_v8 = vpop.f32.mrf.mxu0  ;;  %v2036_v30 = vmax.f32 %v1742_v45, %v1972_v26  ;;  %4631 = vmatprep.subr.bf16.mxu0 %v6601_v4  ;;  %v1307_v17 = vmul.f32 0.2, %v1022_v28  ;;  %v6602_v19 = vld [vmem:[%s9522_s7 + $0x130] ss:$8 sps:$4 sm:$0xff]  }
 0x211   : > { %v1280_v55 = vadd.f32 %v1279_v8, %v7073_v31  ;;  %6266 = vmatprep.mubr.bf16.mxu1 %v1600_v63  ;;  %2946 = vmatmul.mubr.bf16.gmra.mxu0 %v7141_v5  ;;  %v6599_v31 = vld [vmem:[%s9522_s7 + $0x140] ss:$8 sps:$4 sm:$0xff]   ;;  %v1429_v63 = vmax.f32 %v1008_v47, %v1301_v3  ;;  %v1536_v16 = vmax.f32 %v1276_v10, %v1408_v32  ;;  %v1305_v10 = vmul.f32 0.2, %v1018_v0 }
 0x212   : > { %v1973_v57 = vmul.f32 0.2, %v1745_v25  ;;  %v2039_v27 = vmax.f32 %v1753_v13, %v1975_v20  ;;  %4632 = vmatpush1.bf16.msra.mxu0 %v6599_v31  ;;  %v6604_v13 = vld [vmem:[%s9522_s7 + $0x134] ss:$8 sps:$4 sm:$0xff]   ;;  %v1032_v54 = vadd.f32 %v7195_v53, %v7077_v33  ;;  %v6605_v20 = vld [vmem:[%s9522_s7 + $0x120] ss:$8 sps:$4 sm:$0xff]  }
 0x213   : > { %v1410_v38 = vmul.f32 0.2, %v1280_v55  ;;  %v7545_v29 = vpack.c.bf16 %v1431_v41, %v1429_v63  ;;  %4633 = vmatprep.subr.bf16.mxu0 %v6604_v13 }
 0x214   : > { %v2037_v11 = vmax.f32 %v1745_v25, %v1973_v57  ;;  %v7551_v47 = vpack.c.bf16 %v2039_v27, %v2038_v34  ;;  %v6607_v27 = vld [vmem:[%s9522_s7 + $0x124] ss:$8 sps:$4 sm:$0xff]   ;;  %v6610_v57 = vld [vmem:[%s9522_s7 + $0x114] ss:$8 sps:$4 sm:$0xff]   ;;  %v1042_v34 = vadd.f32 %v7219_v9, %v7077_v33  ;;  %v1038_v9 = vadd.f32 %v7210_v1, %v7077_v33 }
 0x215   : > { %v1538_v62 = vmax.f32 %v1280_v55, %v1410_v38  ;;  %v1311_v55 = vmul.f32 0.2, %v1032_v54  ;;  %v6616_v1 = vld [vmem:[%s9522_s7 + $0x1f4] ss:$8 sps:$4 sm:$0xff]  }
 0x216   : > { %v7543_v8 = vpack.c.bf16 %v2037_v11, %v2036_v30  ;;  %v1435_v30 = vmax.f32 %v1022_v28, %v1307_v17  ;;  %4634 = vmatpush1.bf16.msra.mxu0 %v6602_v19  ;;  %v1028_v17 = vadd.f32 %v7185_v44, %v7077_v33  ;;  %v6608_v44 = vld [vmem:[%s9522_s7 + $0x110] ss:$8 sps:$4 sm:$0xff]  }
 0x217   : > { %v1602_v45 = vpack.c.bf16 %v1538_v62, %v1536_v16  ;;  %4635 = vmatprep.subr.bf16.mxu0 %v6607_v27  ;;  %v6686_v16 = vld [vmem:[%s9520_s5 + $0xe8] ss:$16 sps:$4 sm:$0xff]   ;;  %v1439_v62 = vmax.f32 %v1032_v54, %v1311_v55  ;;  %v1052_v55 = vadd.f32 %v7243_v36, %v7077_v33 }
 0x218   : > { %2955 = vmatprep.mubr.bf16.mxu0 %v7543_v8  ;;  %v1309_v31 = vmul.f32 0.2, %v1028_v17  ;;  %v6617_v36 = vld [vmem:[%s9522_s7 + $0x1e0] ss:$8 sps:$4 sm:$0xff]  }
 0x219   : > { %v6220_v11 = vpop.f32.mrf.mxu1  ;;  %6267 = vmatmul.mubr.bf16.gmra.mxu1 %v1602_v45  ;;  %2956 = vmatmul.mubr.bf16.gmra.mxu0 %v7545_v29  ;;  %v6687_v45 = vld [vmem:[%s9520_s5 + $0xcc] ss:$16 sps:$4 sm:$0xff]  }
 0x21a   : > { %2562 = vmatprep.mubr.bf16.mxu1 %v7468_v12  ;;  %2965 = vmatprep.mubr.bf16.mxu0 %v7551_v47  ;;  %v1433_v12 = vmax.f32 %v1018_v0, %v1305_v10  ;;  %v1766_v53 = vadd.f32 %v6220_v11, %v7453_v50  ;;  %v1437_v11 = vmax.f32 %v1028_v17, %v1309_v31  ;;  %v6614_v17 = vld [vmem:[%s9522_s7 + $0x1f0] ss:$8 sps:$4 sm:$0xff]  }
 0x21b   : > { %v1757_v4 = vpop.f32.mrf.mxu1  ;;  %4636 = vmatpush1.bf16.msra.mxu0 %v6605_v20  ;;  %v6689_v20 = vld [vmem:[%s9520_s5 + $0xac] ss:$16 sps:$4 sm:$0xff]  }
 0x21c   : > { %v1758_v26 = vadd.f32 %v7453_v50, %v1757_v4  ;;  %v7572_v32 = vpack.c.bf16 %v1435_v30, %v1433_v12  ;;  %v1978_v63 = vmul.f32 0.2, %v1766_v53  ;;  %4637 = vmatprep.subr.bf16.mxu0 %v6610_v57  ;;  %v6688_v4 = vld [vmem:[%s9520_s5 + $0xc8] ss:$16 sps:$4 sm:$0xff]   ;;  %v7605_v27 = vpack.c.bf16 %v1439_v62, %v1437_v11 }
 0x21d   : > { %v6221_v25 = vpop.f32.mrf.mxu1  ;;  %v6690_v57 = vld [vmem:[%s9520_s5 + $0xa8] ss:$16 sps:$4 sm:$0xff]  }
 0x21e   : > { %v1769_v3 = vadd.f32 %v6221_v25, %v7453_v50  ;;  %v1976_v41 = vmul.f32 0.2, %v1758_v26  ;;  %v2042_v30 = vmax.f32 %v1766_v53, %v1978_v63  ;;  %v1313_v25 = vmul.f32 0.2, %v1038_v9 }
 0x21f   : > { %v1760_v52 = vpop.f32.mrf.mxu1  ;;  %4638 = vmatpush1.bf16.msra.mxu0 %v6608_v44 }
 0x220   : > { %v1979_v28 = vmul.f32 0.2, %v1769_v3  ;;  %v1761_v38 = vadd.f32 %v7453_v50, %v1760_v52  ;;  %v2040_v13 = vmax.f32 %v1758_v26, %v1976_v41  ;;  %v1315_v26 = vmul.f32 0.2, %v1042_v34 }
 0x221   : > { %2563 = vmatmul.mubr.bf16.vlgmr.msra.gmra.mxu1 %v7088_v59  ;;  %2966 = vmatmul.mubr.bf16.gmra.mxu0 %v7572_v32  ;;  %v6613_v59 = vld [vmem:[%s9522_s7 + $0x104] ss:$8 sps:$4 sm:$0xff]  }
 0x222   : > { %v1977_v0 = vmul.f32 0.2, %v1761_v38  ;;  %6286 = vmatpush1.bf16.msra.mxu1 %v6686_v16  ;;  %2572 = vmatprep.mubr.bf16.mxu1 %v7471_v37  ;;  %v2043_v19 = vmax.f32 %v1769_v3, %v1979_v28  ;;  %v6611_v37 = vld [vmem:[%s9522_s7 + $0x100] ss:$8 sps:$4 sm:$0xff]   ;;  %v1443_v3 = vmax.f32 %v1042_v34, %v1315_v26  ;;  %v1441_v28 = vmax.f32 %v1038_v9, %v1313_v25 }
 0x223   : > { %6271 = vmatprep.subr.bf16.mxu1 %v6687_v45  ;;  %4639 = vmatprep.subr.bf16.mxu0 %v6613_v59  ;;  %v1319_v16 = vmul.f32 0.2, %v1052_v55  ;;  %v6692_v34 = vld [vmem:[%s9520_s5 + $0x88] ss:$16 sps:$4 sm:$0xff]   ;;  %v6622_v45 = vld [vmem:[%s9522_s7 + $0x1d4] ss:$8 sps:$4 sm:$0xff]  }
 0x224   : > { %v2041_v10 = vmax.f32 %v1761_v38, %v1977_v0  ;;  %v7614_v12 = vpack.c.bf16 %v2043_v19, %v2042_v30  ;;  %4640 = vmatpush1.bf16.msra.mxu0 %v6611_v37  ;;  %v1048_v38 = vadd.f32 %v7234_v23, %v7077_v33  ;;  %v7642_v0 = vpack.c.bf16 %v1443_v3, %v1441_v28  ;;  %v6693_v19 = vld [vmem:[%s9520_s5 + $0x6c] ss:$16 sps:$4 sm:$0xff]   ;;  %v6694_v26 = vld [vmem:[%s9520_s5 + $0x68] ss:$16 sps:$4 sm:$0xff]  }
 0x225   : > { %4641 = vmatprep.subr.bf16.mxu0 %v6616_v1  ;;  %v1447_v30 = vmax.f32 %v1052_v55, %v1319_v16 }
 0x226   : > { %v7600_v54 = vpack.c.bf16 %v2041_v10, %v2040_v13  ;;  %6287 = vmatpush1.bf16.msra.mxu1 %v6688_v4  ;;  %v6620_v10 = vld [vmem:[%s9522_s7 + $0x1d0] ss:$8 sps:$4 sm:$0xff]   ;;  %v1317_v37 = vmul.f32 0.2, %v1048_v38  ;;  %v1062_v4 = vadd.f32 %v7267_v56, %v7077_v33  ;;  %v1058_v56 = vadd.f32 %v7258_v48, %v7077_v33  ;;  %v6697_v48 = vld [vmem:[%s9520_s5 + $0x2c] ss:$16 sps:$4 sm:$0xff]  }
 0x227   : > { %6272 = vmatprep.subr.bf16.mxu1 %v6689_v20 }
 0x228   : > { %2975 = vmatprep.mubr.bf16.mxu0 %v7600_v54  ;;  %4642 = vmatpush2.bf16.msra.mxu0 %v6614_v17  ;;  %v1445_v25 = vmax.f32 %v1048_v38, %v1317_v37  ;;  %v6700_v37 = vld [vmem:[%s9520_s5 + $0x8] ss:$16 sps:$4 sm:$0xff]  }
 0x229   : > { %v6224_v53 = vpop.f32.mrf.mxu1  ;;  %2573 = vmatmul.mubr.bf16.gmra.mxu1 %v7103_v18  ;;  %2976 = vmatmul.mubr.bf16.gmra.mxu0 %v7605_v27  ;;  %v6619_v18 = vld [vmem:[%s9522_s7 + $0x1e4] ss:$8 sps:$4 sm:$0xff]  }
 0x22a   : > { %2582 = vmatprep.mubr.bf16.mxu1 %v7492_v22  ;;  %2985 = vmatprep.mubr.bf16.mxu0 %v7614_v12  ;;  %v6691_v22 = vld [vmem:[%s9520_s5 + $0x8c] ss:$16 sps:$4 sm:$0xff]   ;;  %v1782_v31 = vadd.f32 %v6224_v53, %v7453_v50  ;;  %v7675_v55 = vpack.c.bf16 %v1447_v30, %v1445_v25  ;;  %v6702_v25 = vld [vmem:[%s9520_s5 + $0x1e8] ss:$16 sps:$4 sm:$0xff]  }
 0x22b   : > { %v1773_v52 = vpop.f32.mrf.mxu1  ;;  %6288 = vmatpush1.bf16.msra.mxu1 %v6690_v57  ;;  %4643 = vmatprep.subr.bf16.mxu0 %v6619_v18  ;;  %v6696_v57 = vld [vmem:[%s9520_s5 + $0x48] ss:$16 sps:$4 sm:$0xff]  }
 0x22c   : > { %v1774_v41 = vadd.f32 %v7453_v50, %v1773_v52  ;;  %6273 = vmatprep.subr.bf16.mxu1 %v6691_v22  ;;  %4644 = vmatpush2.bf16.msra.mxu0 %v6617_v36  ;;  %v1982_v11 = vmul.f32 0.2, %v1782_v31  ;;  %v1323_v52 = vmul.f32 0.2, %v1062_v4  ;;  %v6623_v18 = vld [vmem:[%s9522_s7 + $0x1c0] ss:$8 sps:$4 sm:$0xff]  }
 0x22d   : > { %v6225_v44 = vpop.f32.mrf.mxu1  ;;  %4645 = vmatprep.subr.bf16.mxu0 %v6622_v45  ;;  %v6628_v22 = vld [vmem:[%s9522_s7 + $0x1b4] ss:$8 sps:$4 sm:$0xff]   ;;  %v1321_v36 = vmul.f32 0.2, %v1058_v56 }
 0x22e   : > { %v1785_v63 = vadd.f32 %v6225_v44, %v7453_v50  ;;  %v1980_v23 = vmul.f32 0.2, %v1774_v41  ;;  %v2046_v53 = vmax.f32 %v1782_v31, %v1982_v11  ;;  %v1451_v38 = vmax.f32 %v1062_v4, %v1323_v52  ;;  %v6629_v11 = vld [vmem:[%s9522_s7 + $0x1a0] ss:$8 sps:$4 sm:$0xff]   ;;  %v6701_v4 = vld [vmem:[%s9520_s5 + $0x1ec] ss:$16 sps:$4 sm:$0xff]  }
 0x22f   : > { %v1776_v62 = vpop.f32.mrf.mxu1  ;;  %6289 = vmatpush1.bf16.msra.mxu1 %v6692_v34  ;;  %v1072_v44 = vadd.f32 %v7291_v15, %v7077_v33  ;;  %v6631_v15 = vld [vmem:[%s9522_s7 + $0x1a4] ss:$8 sps:$4 sm:$0xff]   ;;  %v1068_v34 = vadd.f32 %v7282_v6, %v7077_v33 }
 0x230   : > { %v1983_v59 = vmul.f32 0.2, %v1785_v63  ;;  %v1777_v13 = vadd.f32 %v7453_v50, %v1776_v62  ;;  %6274 = vmatprep.subr.bf16.mxu1 %v6693_v19  ;;  %v2044_v20 = vmax.f32 %v1774_v41, %v1980_v23  ;;  %4646 = vmatpush2.bf16.msra.mxu0 %v6620_v10  ;;  %v1449_v62 = vmax.f32 %v1058_v56, %v1321_v36 }
 0x231   : > { %2583 = vmatmul.mubr.bf16.gmra.mxu1 %v7125_v46  ;;  %2986 = vmatmul.mubr.bf16.gmra.mxu0 %v7642_v0  ;;  %v6625_v46 = vld [vmem:[%s9522_s7 + $0x1c4] ss:$8 sps:$4 sm:$0xff]   ;;  %v1327_v19 = vmul.f32 0.2, %v1072_v44 }
 0x232   : > { %v1981_v9 = vmul.f32 0.2, %v1777_v13  ;;  %2592 = vmatprep.mubr.bf16.mxu1 %v7498_v42  ;;  %v2047_v1 = vmax.f32 %v1785_v63, %v1983_v59  ;;  %v6695_v42 = vld [vmem:[%s9520_s5 + $0x4c] ss:$16 sps:$4 sm:$0xff]   ;;  %4647 = vmatprep.subr.bf16.mxu0 %v6625_v46  ;;  %v6698_v63 = vld [vmem:[%s9520_s5 + $0x28] ss:$16 sps:$4 sm:$0xff]  }
 0x233   : > { %6290 = vmatpush1.bf16.msra.mxu1 %v6694_v26  ;;  %v6634_v26 = vld [vmem:[%s9522_s7 + $0x194] ss:$8 sps:$4 sm:$0xff]   ;;  %v1325_v46 = vmul.f32 0.2, %v1068_v34 }
 0x234   : > { %v2045_v17 = vmax.f32 %v1777_v13, %v1981_v9  ;;  %6275 = vmatprep.subr.bf16.mxu1 %v6695_v42  ;;  %v7684_v41 = vpack.c.bf16 %v2047_v1, %v2046_v53  ;;  %4648 = vmatpush2.bf16.msra.mxu0 %v6623_v18  ;;  %v7715_v13 = vpack.c.bf16 %v1451_v38, %v1449_v62  ;;  %v6637_v38 = vld [vmem:[%s9522_s7 + $0x184] ss:$8 sps:$4 sm:$0xff]   ;;  %v6706_v62 = vld [vmem:[%s9520_s5 + $0x1a8] ss:$16 sps:$4 sm:$0xff]  }
 0x235   : > { %4649 = vmatprep.subr.bf16.mxu0 %v6628_v22  ;;  %v1082_v42 = vadd.f32 %v7315_v43, %v7077_v33  ;;  %v1453_v43 = vmax.f32 %v1068_v34, %v1325_v46 }
 0x236   : > { %v7673_v3 = vpack.c.bf16 %v2045_v17, %v2044_v20  ;;  %v1455_v17 = vmax.f32 %v1072_v44, %v1327_v19 }
 0x237   : > { %6291 = vmatpush1.bf16.msra.mxu1 %v6696_v57  ;;  %v1078_v57 = vadd.f32 %v7306_v35, %v7077_v33  ;;  %v1331_v36 = vmul.f32 0.2, %v1082_v42  ;;  %v6705_v35 = vld [vmem:[%s9520_s5 + $0x1ac] ss:$16 sps:$4 sm:$0xff]  }
 0x238   : > { %2995 = vmatprep.mubr.bf16.mxu0 %v7673_v3  ;;  %6276 = vmatprep.subr.bf16.mxu1 %v6697_v48  ;;  %v7748_v22 = vpack.c.bf16 %v1455_v17, %v1453_v43  ;;  %v6710_v17 = vld [vmem:[%s9520_s5 + $0x168] ss:$16 sps:$4 sm:$0xff]  }
 0x239   : > { %v6228_v28 = vpop.f32.mrf.mxu1  ;;  %2593 = vmatmul.mubr.bf16.gmra.mxu1 %v7141_v5  ;;  %2996 = vmatmul.mubr.bf16.gmra.mxu0 %v7675_v55  ;;  %v6626_v5 = vld [vmem:[%s9522_s7 + $0x1b0] ss:$8 sps:$4 sm:$0xff]  }
 0x23a   : > { %2602 = vmatprep.mubr.bf16.mxu1 %v7543_v8  ;;  %3005 = vmatprep.mubr.bf16.mxu0 %v7684_v41  ;;  %v6699_v8 = vld [vmem:[%s9520_s5 + $0xc] ss:$16 sps:$4 sm:$0xff]   ;;  %v1798_v23 = vadd.f32 %v6228_v28, %v7453_v50  ;;  %v6704_v28 = vld [vmem:[%s9520_s5 + $0x1c8] ss:$16 sps:$4 sm:$0xff]  }
 0x23b   : > { %v1789_v31 = vpop.f32.mrf.mxu1  ;;  %6292 = vmatpush1.bf16.msra.mxu1 %v6698_v63  ;;  %4650 = vmatpush2.bf16.msra.mxu0 %v6626_v5  ;;  %v1329_v63 = vmul.f32 0.2, %v1078_v57  ;;  %v6712_v43 = vld [vmem:[%s9520_s5 + $0x148] ss:$16 sps:$4 sm:$0xff]  }
 0x23c   : > { %v1790_v16 = vadd.f32 %v7453_v50, %v1789_v31  ;;  %6277 = vmatprep.subr.bf16.mxu1 %v6699_v8  ;;  %4651 = vmatprep.subr.bf16.mxu0 %v6631_v15  ;;  %v1986_v20 = vmul.f32 0.2, %v1798_v23  ;;  %v6635_v31 = vld [vmem:[%s9522_s7 + $0x180] ss:$8 sps:$4 sm:$0xff]   ;;  %v1092_v8 = vadd.f32 %v7333_v2, %v7077_v33 }
 0x23d   : > { %v6229_v45 = vpop.f32.mrf.mxu1 }
 0x23e   : > { %v1801_v59 = vadd.f32 %v6229_v45, %v7453_v50  ;;  %v1984_v6 = vmul.f32 0.2, %v1790_v16  ;;  %v2050_v18 = vmax.f32 %v1798_v23, %v1986_v20  ;;  %v1088_v45 = vadd.f32 %v7330_v58, %v7077_v33  ;;  %v6709_v58 = vld [vmem:[%s9520_s5 + $0x16c] ss:$16 sps:$4 sm:$0xff]  }
 0x23f   : > { %v1792_v10 = vpop.f32.mrf.mxu1  ;;  %6293 = vmatpush1.bf16.msra.mxu1 %v6700_v37  ;;  %4652 = vmatpush2.bf16.msra.mxu0 %v6629_v11  ;;  %v6708_v11 = vld [vmem:[%s9520_s5 + $0x188] ss:$16 sps:$4 sm:$0xff]  }
 0x240   : > { %v1987_v9 = vmul.f32 0.2, %v1801_v59  ;;  %v1793_v30 = vadd.f32 %v7453_v50, %v1792_v10  ;;  %6278 = vmatprep.subr.bf16.mxu1 %v6701_v4  ;;  %v2048_v56 = vmax.f32 %v1790_v16, %v1984_v6  ;;  %4653 = vmatprep.subr.bf16.mxu0 %v6634_v26  ;;  %v1459_v16 = vmax.f32 %v1082_v42, %v1331_v36 }
 0x241   : > { %2603 = vmatmul.mubr.bf16.gmra.mxu1 %v7545_v29  ;;  %3006 = vmatmul.mubr.bf16.gmra.mxu0 %v7715_v13  ;;  %v6632_v29 = vld [vmem:[%s9522_s7 + $0x190] ss:$8 sps:$4 sm:$0xff]   ;;  %v1335_v10 = vmul.f32 0.2, %v1092_v8  ;;  %v1333_v4 = vmul.f32 0.2, %v1088_v45 }
 0x242   : > { %v1985_v1 = vmul.f32 0.2, %v1793_v30  ;;  %2612 = vmatprep.mubr.bf16.mxu1 %v7551_v47  ;;  %v2051_v53 = vmax.f32 %v1801_v59, %v1987_v9  ;;  %v6703_v47 = vld [vmem:[%s9520_s5 + $0x1cc] ss:$16 sps:$4 sm:$0xff]  }
 0x243   : > { %6294 = vmatpush2.bf16.msra.mxu1 %v6702_v25  ;;  %4654 = vmatpush2.bf16.msra.mxu0 %v6632_v29  ;;  %v1463_v20 = vmax.f32 %v1092_v8, %v1335_v10 }
 0x244   : > { %v2049_v52 = vmax.f32 %v1793_v30, %v1985_v1  ;;  %6279 = vmatprep.subr.bf16.mxu1 %v6703_v47  ;;  %v7757_v44 = vpack.c.bf16 %v2051_v53, %v2050_v18  ;;  %4655 = vmatprep.subr.bf16.mxu0 %v6637_v38  ;;  %v1102_v1 = vadd.f32 %v7345_v24, %v7077_v33  ;;  %v6713_v18 = vld [vmem:[%s9520_s5 + $0x12c] ss:$16 sps:$4 sm:$0xff]  }
 0x245   : > { %v1112_v38 = vadd.f32 %v7357_v49, %v7077_v33 }
 0x246   : > { %v7746_v48 = vpack.c.bf16 %v2049_v52, %v2048_v56  ;;  %v1461_v56 = vmax.f32 %v1088_v45, %v1333_v4  ;;  %v1339_v47 = vmul.f32 0.2, %v1102_v1 }
 0x247   : > { %6295 = vmatpush2.bf16.msra.mxu1 %v6704_v28  ;;  %4656 = vmatpush2.bf16.msra.mxu0 %v6635_v31  ;;  %v6714_v31 = vld [vmem:[%s9520_s5 + $0x128] ss:$16 sps:$4 sm:$0xff]  }
 0x248   : > { %3015 = vmatprep.mubr.bf16.mxu0 %v7746_v48  ;;  %6280 = vmatprep.subr.bf16.mxu1 %v6705_v35  ;;  %v7806_v24 = vpack.c.bf16 %v1463_v20, %v1461_v56  ;;  %v1467_v28 = vmax.f32 %v1102_v1, %v1339_v47 }
 0x249   : > { %v6232_v5 = vpop.f32.mrf.mxu1  ;;  %2613 = vmatmul.mubr.bf16.gmra.mxu1 %v7572_v32  ;;  %3016 = vmatmul.mubr.bf16.gmra.mxu0 %v7748_v22  ;;  %v6707_v32 = vld [vmem:[%s9520_s5 + $0x18c] ss:$16 sps:$4 sm:$0xff]  }
 0x24a   : > { %2622 = vmatprep.mubr.bf16.mxu1 %v7600_v54  ;;  %3025 = vmatprep.mubr.bf16.mxu0 %v7757_v44  ;;  %v1457_v54 = vmax.f32 %v1078_v57, %v1329_v63  ;;  %v1814_v23 = vadd.f32 %v6232_v5, %v7453_v50  ;;  %v1108_v5 = vadd.f32 %v7354_v40, %v7077_v33 }
 0x24b   : > { %v1805_v15 = vpop.f32.mrf.mxu1  ;;  %6296 = vmatpush2.bf16.msra.mxu1 %v6706_v62  ;;  %v1343_v62 = vmul.f32 0.2, %v1112_v38 }
 0x24c   : > { %v1806_v34 = vadd.f32 %v7453_v50, %v1805_v15  ;;  %6281 = vmatprep.subr.bf16.mxu1 %v6707_v32  ;;  %v7782_v19 = vpack.c.bf16 %v1459_v16, %v1457_v54  ;;  %v1990_v26 = vmul.f32 0.2, %v1814_v23  ;;  %v6716_v32 = vld [vmem:[%s9520_s5 + $0x108] ss:$16 sps:$4 sm:$0xff]  }
 0x24d   : > { %v6233_v2 = vpop.f32.mrf.mxu1  ;;  %v1471_v10 = vmax.f32 %v1112_v38, %v1343_v62 }
 0x24e   : > { %v1817_v59 = vadd.f32 %v6233_v2, %v7453_v50  ;;  %v1988_v6 = vmul.f32 0.2, %v1806_v34  ;;  %v2054_v53 = vmax.f32 %v1814_v23, %v1990_v26  ;;  %v1341_v23 = vmul.f32 0.2, %v1108_v5 }
 0x24f   : > { %v1808_v37 = vpop.f32.mrf.mxu1  ;;  %6297 = vmatpush2.bf16.msra.mxu1 %v6708_v11 }
 0x250   : > { %v1991_v9 = vmul.f32 0.2, %v1817_v59  ;;  %v1809_v30 = vadd.f32 %v7453_v50, %v1808_v37  ;;  %6282 = vmatprep.subr.bf16.mxu1 %v6709_v58  ;;  %v2052_v42 = vmax.f32 %v1806_v34, %v1988_v6  ;;  %v1122_v37 = vadd.f32 %v7369_v7, %v7077_v33 }
 0x251   : > { %2623 = vmatmul.mubr.bf16.gmra.mxu1 %v7605_v27  ;;  %3026 = vmatmul.mubr.bf16.gmra.mxu0 %v7782_v19  ;;  %v6711_v27 = vld [vmem:[%s9520_s5 + $0x14c] ss:$16 sps:$4 sm:$0xff]   ;;  %v1118_v58 = vadd.f32 %v7366_v61, %v7077_v33  ;;  %v1132_v7 = vadd.f32 %v7387_v39, %v7077_v33 }
 0x252   : > { %v1989_v46 = vmul.f32 0.2, %v1809_v30  ;;  %2632 = vmatprep.mubr.bf16.mxu1 %v7614_v12  ;;  %v2055_v25 = vmax.f32 %v1817_v59, %v1991_v9  ;;  %v1098_v12 = vadd.f32 %v7342_v14, %v7077_v33 }
 0x253   : > { %6298 = vmatpush2.bf16.msra.mxu1 %v6710_v17  ;;  %v1345_v20 = vmul.f32 0.2, %v1118_v58 }
 0x254   : > { %v2053_v29 = vmax.f32 %v1809_v30, %v1989_v46  ;;  %6283 = vmatprep.subr.bf16.mxu1 %v6711_v27  ;;  %v7812_v57 = vpack.c.bf16 %v2055_v25, %v2054_v53  ;;  %v1337_v14 = vmul.f32 0.2, %v1098_v12  ;;  %v1469_v30 = vmax.f32 %v1108_v5, %v1341_v23 }
 0x255   : > { %v1347_v46 = vmul.f32 0.2, %v1122_v37  ;;  %v1473_v25 = vmax.f32 %v1118_v58, %v1345_v20 }
 0x256   : > { %v7804_v52 = vpack.c.bf16 %v2053_v29, %v2052_v42  ;;  %v1128_v29 = vadd.f32 %v7378_v21, %v7077_v33 }
 0x257   : > { %6299 = vmatpush2.bf16.msra.mxu1 %v6712_v43  ;;  %v1475_v61 = vmax.f32 %v1122_v37, %v1347_v46  ;;  %v9565_v46 = vld [vmem:[#allocation11_spill] sm:$0xff] }
 0x258   : > { %3035 = vmatprep.mubr.bf16.mxu0 %v7804_v52  ;;  %6284 = vmatprep.subr.bf16.mxu1 %v6713_v18  ;;  %v1349_v18 = vmul.f32 0.2, %v1128_v29  ;;  %v1162_v20 = vadd.f32 %v9565_v46, %v7077_v33 }
 0x259   : > { %v6236_v36 = vpop.f32.mrf.mxu1  ;;  %2633 = vmatmul.mubr.bf16.gmra.mxu1 %v7642_v0  ;;  %3036 = vmatmul.mubr.bf16.gmra.mxu0 %v7806_v24  ;;  %v6715_v0 = vld [vmem:[%s9520_s5 + $0x10c] ss:$16 sps:$4 sm:$0xff]  }
 0x25a   : > { %2642 = vmatprep.mubr.bf16.mxu1 %v7673_v3  ;;  %3045 = vmatprep.mubr.bf16.mxu0 %v7812_v57  ;;  %v1465_v3 = vmax.f32 %v1098_v12, %v1337_v14  ;;  %v1830_v49 = vadd.f32 %v6236_v36, %v7453_v50  ;;  %v7865_v12 = vpack.c.bf16 %v1475_v61, %v1473_v25 }
 0x25b   : > { %v1821_v35 = vpop.f32.mrf.mxu1  ;;  %6300 = vmatpush2.bf16.msra.mxu1 %v6714_v31 }
 0x25c   : > { %v1822_v63 = vadd.f32 %v7453_v50, %v1821_v35  ;;  %6285 = vmatprep.subr.bf16.mxu1 %v6715_v0  ;;  %v7834_v15 = vpack.c.bf16 %v1467_v28, %v1465_v3  ;;  %v1994_v40 = vmul.f32 0.2, %v1830_v49  ;;  %v1142_v28 = vadd.f32 %v7394_v60, %v7077_v33  ;;  %v9563_v60 = vld [vmem:[#allocation9_spill] sm:$0xff] }
 0x25d   : > { %v6237_v16 = vpop.f32.mrf.mxu1  ;;  %v1138_v0 = vadd.f32 %v7391_v51, %v7077_v33  ;;  %v1152_v62 = vadd.f32 %v9563_v60, %v7077_v33  ;;  %v9569_v60 = vld [vmem:[#allocation15_spill] sm:$0xff] }
 0x25e   : > { %v1833_v8 = vadd.f32 %v6237_v16, %v7453_v50  ;;  %v1992_v54 = vmul.f32 0.2, %v1822_v63  ;;  %v2058_v4 = vmax.f32 %v1830_v49, %v1994_v40  ;;  %v1355_v16 = vmul.f32 0.2, %v1142_v28 }
 0x25f   : > { %v1824_v34 = vpop.f32.mrf.mxu1  ;;  %6301 = vmatpush2.bf16.msra.mxu1 %v6716_v32  ;;  %v1353_v49 = vmul.f32 0.2, %v1138_v0 }
 0x260   : > { %v1995_v45 = vmul.f32 0.2, %v1833_v8  ;;  %v1825_v2 = vadd.f32 %v7453_v50, %v1824_v34  ;;  %v2056_v11 = vmax.f32 %v1822_v63, %v1992_v54  ;;  %v1477_v63 = vmax.f32 %v1128_v29, %v1349_v18 }
 0x261   : > { %2643 = vmatmul.mubr.bf16.gmra.mxu1 %v7675_v55  ;;  %3046 = vmatmul.mubr.bf16.gmra.mxu0 %v7834_v15  ;;  %v7849_v55 = vpack.c.bf16 %v1471_v10, %v1469_v30  ;;  %v1483_v51 = vmax.f32 %v1142_v28, %v1355_v16  ;;  %v1481_v54 = vmax.f32 %v1138_v0, %v1353_v49 }
 0x262   : > { %v1993_v59 = vmul.f32 0.2, %v1825_v2  ;;  %2652 = vmatprep.mubr.bf16.mxu1 %v7684_v41  ;;  %v2059_v6 = vmax.f32 %v1833_v8, %v1995_v45  ;;  %v9564_v45 = vld [vmem:[#allocation8_spill] sm:$0xff] }
 0x264   : > { %v2057_v9 = vmax.f32 %v1825_v2, %v1993_v59  ;;  %v7852_v41 = vpack.c.bf16 %v2059_v6, %v2058_v4  ;;  %v1148_v2 = vadd.f32 %v9564_v45, %v7077_v33  ;;  %v7893_v59 = vpack.c.bf16 %v1483_v51, %v1481_v54 }
 0x266   : > { %v7847_v26 = vpack.c.bf16 %v2057_v9, %v2056_v11  ;;  %v1357_v9 = vmul.f32 0.2, %v1148_v2 }
 0x268   : > { %3055 = vmatprep.mubr.bf16.mxu0 %v7847_v26 }
 0x269   : > { %v6240_v1 = vpop.f32.mrf.mxu1  ;;  %2653 = vmatmul.mubr.bf16.gmra.mxu1 %v7715_v13  ;;  %3056 = vmatmul.mubr.bf16.gmra.mxu0 %v7849_v55 }
 0x26a   : > { %2662 = vmatprep.mubr.bf16.mxu1 %v7746_v48  ;;  %3065 = vmatprep.mubr.bf16.mxu0 %v7852_v41  ;;  %v1846_v13 = vadd.f32 %v6240_v1, %v7453_v50  ;;  %v1351_v48 = vmul.f32 0.2, %v1132_v7 }
 0x26b   : > { %v1837_v17 = vpop.f32.mrf.mxu1 }
 0x26c   : > { %v1838_v42 = vadd.f32 %v7453_v50, %v1837_v17  ;;  %v1998_v14 = vmul.f32 0.2, %v1846_v13  ;;  %v1479_v36 = vmax.f32 %v1132_v7, %v1351_v48  ;;  %v1485_v17 = vmax.f32 %v1148_v2, %v1357_v9  ;;  %v9570_v2 = vld [vmem:[#allocation14_spill] sm:$0xff] }
 0x26d   : > { %v6241_v27 = vpop.f32.mrf.mxu1 }
 0x26e   : > { %v1849_v56 = vadd.f32 %v6241_v27, %v7453_v50  ;;  %v1996_v47 = vmul.f32 0.2, %v1838_v42  ;;  %v2062_v3 = vmax.f32 %v1846_v13, %v1998_v14  ;;  %v1363_v27 = vmul.f32 0.2, %v1162_v20 }
 0x26f   : > { %v1840_v53 = vpop.f32.mrf.mxu1 }
 0x270   : > { %v1999_v43 = vmul.f32 0.2, %v1849_v56  ;;  %v1841_v39 = vadd.f32 %v7453_v50, %v1840_v53  ;;  %v2060_v38 = vmax.f32 %v1838_v42, %v1996_v47  ;;  %v9566_v42 = vld [vmem:[#allocation10_spill] sm:$0xff]  ;;  %v1491_v48 = vmax.f32 %v1162_v20, %v1363_v27  ;;  %v9567_v53 = vld [vmem:[#allocation13_spill] sm:$0xff] }
 0x271   : > { %2663 = vmatmul.mubr.bf16.gmra.mxu1 %v7748_v22  ;;  %3066 = vmatmul.mubr.bf16.gmra.mxu0 %v7865_v12  ;;  %v7877_v22 = vpack.c.bf16 %v1479_v36, %v1477_v63  ;;  %v1172_v47 = vadd.f32 %v9567_v53, %v7077_v33  ;;  %v9577_v27 = vld [vmem:[#allocation5_spill] sm:$0xff]  ;;  %v9579_v53 = vld [vmem:[#allocation22_spill] sm:$0xff] }
 0x272   : > { %v1997_v21 = vmul.f32 0.2, %v1841_v39  ;;  %2672 = vmatprep.mubr.bf16.mxu1 %v7757_v44  ;;  %v2063_v35 = vmax.f32 %v1849_v56, %v1999_v43 }
 0x274   : > { %v2061_v31 = vmax.f32 %v1841_v39, %v1997_v21  ;;  %v7880_v44 = vpack.c.bf16 %v2063_v35, %v2062_v3  ;;  %v7916_v39 = vld [vmem:[%s9519_s4] ss:$0 sm:$0xff]  ;;  %v1367_v35 = vmul.f32 0.2, %v1172_v47 }
 0x276   : > { %v7875_v5 = vpack.c.bf16 %v2061_v31, %v2060_v38  ;;  %v1495_v51 = vmax.f32 %v1172_v47, %v1367_v35  ;;  %v2200_v47 = vsub.s32 2, %v9577_v27 }
 0x278   : > { %3075 = vmatprep.mubr.bf16.mxu0 %v7875_v5 }
 0x279   : > { %v6244_v8 = vpop.f32.mrf.mxu1  ;;  %2673 = vmatmul.mubr.bf16.gmra.mxu1 %v7782_v19  ;;  %3076 = vmatmul.mubr.bf16.gmra.mxu0 %v7877_v22 }
 0x27a   : > { %2682 = vmatprep.mubr.bf16.mxu1 %v7804_v52  ;;  %3085 = vmatprep.mubr.bf16.mxu0 %v7880_v44  ;;  %v1862_v19 = vadd.f32 %v6244_v8, %v7453_v50  ;;  %v1359_v52 = vmul.f32 0.2, %v1152_v62 }
 0x27b   : > { %v1853_v34 = vpop.f32.mrf.mxu1 }
 0x27c   : > { %v1854_v32 = vadd.f32 %v7453_v50, %v1853_v34  ;;  %v2002_v30 = vmul.f32 0.2, %v1862_v19  ;;  %v1487_v4 = vmax.f32 %v1152_v62, %v1359_v52  ;;  %v1182_v62 = vadd.f32 %v9569_v60, %v7077_v33 }
 0x27d   : > { %v6245_v23 = vpop.f32.mrf.mxu1 }
 0x27e   : > { %v1865_v40 = vadd.f32 %v6245_v23, %v7453_v50  ;;  %v2000_v37 = vmul.f32 0.2, %v1854_v32  ;;  %v2066_v25 = vmax.f32 %v1862_v19, %v2002_v30  ;;  %v1178_v23 = vadd.f32 %v9570_v2, %v7077_v33 }
 0x27f   : > { %v1856_v10 = vpop.f32.mrf.mxu1  ;;  %v1371_v52 = vmul.f32 0.2, %v1182_v62 }
 0x280   : > { %v2003_v11 = vmul.f32 0.2, %v1865_v40  ;;  %v1857_v6 = vadd.f32 %v7453_v50, %v1856_v10  ;;  %v2064_v1 = vmax.f32 %v1854_v32, %v2000_v37  ;;  %v1158_v50 = vadd.f32 %v9566_v42, %v7077_v33 }
 0x281   : > { %2683 = vmatmul.mubr.bf16.gmra.mxu1 %v7806_v24  ;;  %3086 = vmatmul.mubr.bf16.gmra.mxu0 %v7893_v59  ;;  %v7903_v24 = vpack.c.bf16 %v1487_v4, %v1485_v17  ;;  %v1499_v37 = vmax.f32 %v1182_v62, %v1371_v52  ;;  %v9575_v17 = vld [vmem:[#allocation23_spill] sm:$0xff]  ;;  %v9581_v62 = vld [vmem:[#allocation25_spill] sm:$0xff] }
 0x282   : > { %v2001_v58 = vmul.f32 0.2, %v1857_v6  ;;  %2692 = vmatprep.mubr.bf16.mxu1 %v7812_v57  ;;  %v2067_v61 = vmax.f32 %v1865_v40, %v2003_v11  ;;  %v1361_v57 = vmul.f32 0.2, %v1158_v50  ;;  %v1222_v42 = vadd.f32 %v9575_v17, %v7077_v33 }
 0x284   : > { %v2065_v7 = vmax.f32 %v1857_v6, %v2001_v58  ;;  %v7905_v13 = vpack.c.bf16 %v2067_v61, %v2066_v25  ;;  %v1489_v14 = vmax.f32 %v1158_v50, %v1361_v57  ;;  %v2204_v57 = vsub.s32 3, %v9577_v27 }
 0x286   : > { %v2110_v29 = vpack.c.bf16 %v2065_v7, %v2064_v1  ;;  %v7923_v38 = vpack.c.bf16 %v1491_v48, %v1489_v14  ;;  %v9573_v1 = vld [vmem:[#allocation19_spill] sm:$0xff]  ;;  %v9574_v7 = vld [vmem:[#allocation21_spill] sm:$0xff] }
 0x287   : > { %v1202_v61 = vadd.f32 %v9573_v1, %v7077_v33  ;;  %v7981_v14 = vld [vmem:[%s9521_s6] sm:$0xf] }
 0x288   : > { %3095 = vmatprep.mubr.bf16.mxu0 %v2110_v29 }
 0x289   : > { %v6248_v56 = vpop.f32.mrf.mxu1  ;;  %2693 = vmatmul.mubr.bf16.gmra.mxu1 %v7834_v15  ;;  %3096 = vmatmul.mubr.bf16.gmra.mxu0 %v7903_v24  ;;  %v9568_v15 = vld [vmem:[#allocation12_spill] sm:$0xff] }
 0x28a   : > { %2702 = vmatprep.mubr.bf16.mxu1 %v7847_v26  ;;  %3105 = vmatprep.mubr.bf16.mxu0 %v7905_v13  ;;  %v1168_v21 = vadd.f32 %v9568_v15, %v7077_v33  ;;  %v1878_v26 = vadd.f32 %v7916_v39, %v6248_v56  ;;  %v9578_v56 = vld [vmem:[#allocation20_spill] sm:$0xff] }
 0x28b   : > { %v1869_v43 = vpop.f32.mrf.mxu1  ;;  %v1208_v48 = vadd.f32 %v9578_v56, %v7077_v33 }
 0x28c   : > { %v1870_v18 = vadd.f32 %v7916_v39, %v1869_v43  ;;  %v1365_v16 = vmul.f32 0.2, %v1168_v21  ;;  %v2006_v49 = vmul.f32 0.2, %v1878_v26 }
 0x28d   : > { %v6249_v36 = vpop.f32.mrf.mxu1 }
 0x28e   : > { %v1881_v28 = vadd.f32 %v7916_v39, %v6249_v36  ;;  %v2004_v63 = vmul.f32 0.2, %v1870_v18  ;;  %v1493_v45 = vmax.f32 %v1168_v21, %v1365_v16  ;;  %v2070_v19 = vmax.f32 %v1878_v26, %v2006_v49  ;;  %v7983_v36 = vpop.f32.mrf.mxu0 }
 0x28f   : > { %v1872_v31 = vpop.f32.mrf.mxu1  ;;  %v1387_v21 = vmul.f32 0.2, %v1222_v42  ;;  %v7996_v49 = vrot.slane %v7981_v14, %v2200_v47 }
 0x290   : > { %v2007_v0 = vmul.f32 0.2, %v1881_v28  ;;  %v1873_v3 = vadd.f32 %v7916_v39, %v1872_v31  ;;  %v2068_v34 = vmax.f32 %v1870_v18, %v2004_v63  ;;  %v1379_v18 = vmul.f32 0.2, %v1202_v61 }
 0x291   : > { %2703 = vmatmul.mubr.bf16.gmra.mxu1 %v7849_v55  ;;  %3106 = vmatmul.mubr.bf16.gmra.mxu0 %v7923_v38  ;;  %v7933_v55 = vpack.c.bf16 %v1495_v51, %v1493_v45  ;;  %v7988_v31 = vrot.slane %v7981_v14, %v2204_v57  ;;  %v1381_v63 = vmul.f32 0.2, %v1208_v48 }
 0x292   : > { %v2005_v8 = vmul.f32 0.2, %v1873_v3  ;;  %2712 = vmatprep.mubr.bf16.mxu1 %v7852_v41  ;;  %v2071_v32 = vmax.f32 %v1881_v28, %v2007_v0  ;;  %v1369_v41 = vmul.f32 0.2, %v1178_v23  ;;  %v1507_v60 = vmax.f32 %v1202_v61, %v1379_v18 }
 0x294   : > { %v2069_v54 = vmax.f32 %v1873_v3, %v2005_v8  ;;  %v7935_v10 = vpack.c.bf16 %v2071_v32, %v2070_v19  ;;  %v1497_v11 = vmax.f32 %v1178_v23, %v1369_v41  ;;  %v9580_v3 = vld [vmem:[#allocation24_spill] sm:$0xff]  ;;  %v1509_v41 = vmax.f32 %v1208_v48, %v1381_v63  ;;  %v9585_v48 = vld [vmem:[#allocation29_spill] sm:$0xff] }
 0x295   : > { %v7992_v16 = vadd.f32 %v9580_v3, %v7077_v33 }
 0x296   : > { %v2112_v40 = vpack.c.bf16 %v2069_v54, %v2068_v34  ;;  %v7941_v6 = vpack.c.bf16 %v1499_v37, %v1497_v11  ;;  %v8000_v34 = vadd.f32 %v9581_v62, %v7077_v33  ;;  %v1515_v54 = vmax.f32 %v1222_v42, %v1387_v21 }
 0x297   : > { %v8009_v11 = vmul.f32 0.2, %v7992_v16 }
 0x298   : > { %3115 = vmatprep.mubr.bf16.mxu0 %v2112_v40 }
 0x299   : > { %2713 = vmatmul.mubr.bf16.gmra.mxu1 %v7865_v12  ;;  %3116 = vmatmul.mubr.bf16.gmra.mxu0 %v7933_v55  ;;  %v7943_v9 = vpop.f32.mrf.mxu1  ;;  %v6640_v12 = vld [vmem:[%s9522_s7 + $0x74] ss:$8 sps:$4 sm:$0xff]  }
 0x29a   : > { %2722 = vmatprep.mubr.bf16.mxu1 %v7875_v5  ;;  %3125 = vmatprep.mubr.bf16.mxu0 %v7935_v10 }
 0x29b   : > { %v1885_v30 = vpop.f32.mrf.mxu1  ;;  %4272 = vmatprep.subr.bf16.mxu1 %v6640_v12 }
 0x29c   : > { %v1886_v1 = vadd.f32 %v7916_v39, %v1885_v30  ;;  %v1517_v30 = vmax.f32 %v7992_v16, %v8009_v11 }
 0x29d   : > { %v7951_v5 = vpop.f32.mrf.mxu1 }
 0x29f   : > { %v1888_v58 = vpop.f32.mrf.mxu1 }
 0x2a1   : > { %2723 = vmatmul.mubr.bf16.gmra.mxu1 %v7877_v22  ;;  %3126 = vmatmul.mubr.bf16.gmra.mxu0 %v7941_v6  ;;  %v9571_v22 = vld [vmem:[#allocation17_spill] sm:$0xff] }
 0x2a2   : > { %2732 = vmatprep.mubr.bf16.mxu1 %v7880_v44  ;;  %v1192_v46 = vadd.f32 %v9571_v22, %v7077_v33  ;;  %v9572_v44 = vld [vmem:[#allocation16_spill] sm:$0xff] }
 0x2a3   : > { %v1188_v20 = vadd.f32 %v9572_v44, %v7077_v33  ;;  %v8017_v44 = vmul.f32 0.2, %v8000_v34 }
 0x2a4   : > { %v1375_v25 = vmul.f32 0.2, %v1192_v46 }
 0x2a5   : > { %v1373_v43 = vmul.f32 0.2, %v1188_v20 }
 0x2a6   : > { %v1503_v28 = vmax.f32 %v1192_v46, %v1375_v25 }
 0x2a7   : > { %v1501_v51 = vmax.f32 %v1188_v20, %v1373_v43  ;;  %v9582_v20 = vld [vmem:[#allocation26_spill] sm:$0xff] }
 0x2a9   : > { %2733 = vmatmul.mubr.bf16.gmra.mxu1 %v7893_v59  ;;  %v7954_v4 = vpop.f32.mrf.mxu1  ;;  %v1212_v59 = vadd.f32 %v9574_v7, %v7077_v33  ;;  %v8004_v23 = vpack.c.bf16 %v1503_v28, %v1501_v51  ;;  %v2008_v28 = vmul.f32 0.2, %v1886_v1 }
 0x2aa   : > { %2742 = vmatprep.mubr.bf16.mxu1 %v2110_v29  ;;  %v9576_v29 = vld [vmem:[#allocation18_spill] sm:$0xff] }
 0x2ab   : > { %v7968_v50 = vpop.f32.mrf.mxu1  ;;  %v1383_v15 = vmul.f32 0.2, %v1212_v59 }
 0x2ad   : > { %v7985_v26 = vpop.f32.mrf.mxu1  ;;  %v1511_v32 = vmax.f32 %v1212_v59, %v1383_v15  ;;  %v9583_v59 = vld [vmem:[#allocation27_spill] sm:$0xff]  ;;  %v1519_v15 = vmax.f32 %v8000_v34, %v8017_v44 }
 0x2ae   : > { %v8030_v17 = vadd.f32 %v9583_v59, %v7077_v33 }
 0x2af   : > { %v8002_v45 = vpop.f32.mrf.mxu1  ;;  %v8024_v61 = vpack.c.bf16 %v1511_v32, %v1509_v41 }
 0x2b0   : > { %v8054_v63 = vmul.f32 0.2, %v8030_v17 }
 0x2b1   : > { %2743 = vmatmul.mubr.bf16.gmra.mxu1 %v7903_v24  ;;  %v1198_v24 = vadd.f32 %v9576_v29, %v7077_v33  ;;  %v9584_v29 = vld [vmem:[#allocation28_spill] sm:$0xff] }
 0x2b2   : > { %2752 = vmatprep.mubr.bf16.mxu1 %v7905_v13  ;;  %v1218_v13 = vadd.f32 %v9579_v53, %v7077_v33  ;;  %v8042_v53 = vadd.f32 %v9585_v48, %v7077_v33 }
 0x2b3   : > { %v1377_v35 = vmul.f32 0.2, %v1198_v24 }
 0x2b4   : > { %v1385_v0 = vmul.f32 0.2, %v1218_v13 }
 0x2b5   : > { %v1505_v19 = vmax.f32 %v1198_v24, %v1377_v35  ;;  %v8035_v24 = vadd.f32 %v9584_v29, %v7077_v33 }
 0x2b6   : > { %v1513_v37 = vmax.f32 %v1218_v13, %v1385_v0  ;;  %v9586_v0 = vld [vmem:[#allocation31_spill] sm:$0xff] }
 0x2b7   : > { %v8014_v46 = vpack.c.bf16 %v1507_v60, %v1505_v19  ;;  %v8058_v3 = vadd.f32 %v9586_v0, %v7077_v33  ;;  %v8065_v60 = vmul.f32 0.2, %v8035_v24 }
 0x2b8   : > { %v8026_v7 = vpack.c.bf16 %v1515_v54, %v1513_v37 }
 0x2b9   : > { %2753 = vmatmul.mubr.bf16.gmra.mxu1 %v7923_v38  ;;  %v2917_v8 = vpop.f32.mrf.mxu0  ;;  %v1889_v38 = vadd.f32 %v7916_v39, %v1888_v58  ;;  %v8011_v12 = vpop.f32.mrf.mxu1  ;;  %v8021_v58 = vadd.f32 %v9582_v20, %v7077_v33 }
 0x2ba   : > { %2762 = vmatprep.mubr.bf16.mxu1 %v2112_v40  ;;  %v2918_v40 = vadd.f32 %v2917_v8, %v7996_v49 }
 0x2bb   : > { %v2919_v2 = vpop.f32.mrf.mxu0  ;;  %v2009_v27 = vmul.f32 0.2, %v1889_v38  ;;  %v8044_v47 = vpop.f32.mrf.mxu1  ;;  %v8050_v21 = vmul.f32 0.2, %v8021_v58 }
 0x2bc   : > { %v2920_v52 = vadd.f32 %v2919_v2, %v7988_v31  ;;  %v3238_v13 = vmul.f32 0.2, %v2918_v40  ;;  %v1894_v2 = vadd.f32 %v7916_v39, %v7943_v9 }
 0x2bd   : > { %v2921_v22 = vpop.f32.mrf.mxu0  ;;  %v2073_v62 = vmax.f32 %v1889_v38, %v2009_v27  ;;  %v8072_v41 = vpop.f32.mrf.mxu1  ;;  %v9588_v27 = vld [vmem:[#allocation32_spill] sm:$0xff] }
 0x2be   : > { %v2922_v42 = vadd.f32 %v2921_v22, %v7996_v49  ;;  %v3239_v57 = vmul.f32 0.2, %v2920_v52  ;;  %v3494_v19 = vmax.f32 %v2918_v40, %v3238_v13  ;;  %v2072_v22 = vmax.f32 %v1886_v1, %v2008_v28 }
 0x2bf   : > { %v2923_v25 = vpop.f32.mrf.mxu0  ;;  %v1521_v13 = vmax.f32 %v8021_v58, %v8050_v21  ;;  %v8096_v28 = vpop.f32.mrf.mxu1 }
 0x2c0   : > { %v2924_v56 = vadd.f32 %v2923_v25, %v7988_v31  ;;  %v3242_v43 = vmul.f32 0.2, %v2922_v42  ;;  %v3495_v32 = vmax.f32 %v2920_v52, %v3239_v57  ;;  %v9587_v52 = vld [vmem:[#allocation30_spill] sm:$0xff]  ;;  %v8082_v25 = vmul.f32 0.2, %v8058_v3 }
 0x2c1   : > { %2763 = vmatmul.mubr.bf16.gmra.mxu1 %v7933_v55  ;;  %v2927_v18 = vpop.f32.mrf.mxu0  ;;  %v8062_v55 = vadd.f32 %v7916_v39, %v7951_v5  ;;  %v8087_v57 = vadd.f32 %v9588_v27, %v7077_v33  ;;  %v8090_v48 = vpack.c.bf16 %v2073_v62, %v2072_v22 }
 0x2c2   : > { %v3243_v35 = vmul.f32 0.2, %v2924_v56  ;;  %2772 = vmatprep.mubr.bf16.mxu1 %v7935_v10  ;;  %v3498_v8 = vmax.f32 %v2922_v42, %v3242_v43  ;;  %v8068_v10 = vmul.f32 0.2, %v8042_v53  ;;  %v2928_v20 = vadd.f32 %v2927_v18, %v7996_v49 }
 0x2c3   : > { %v2929_v51 = vpop.f32.mrf.mxu0  ;;  %v8079_v42 = vadd.f32 %v9587_v52, %v7077_v33  ;;  %v2011_v9 = vmul.f32 0.2, %v8062_v55  ;;  %v1523_v43 = vmax.f32 %v8030_v17, %v8054_v63  ;;  %v2010_v18 = vmul.f32 0.2, %v1894_v2 }
 0x2c4   : > { %v3499_v54 = vmax.f32 %v2924_v56, %v3243_v35  ;;  %v2930_v5 = vadd.f32 %v2929_v51, %v7988_v31  ;;  %v3750_v40 = vpack.c.bf16 %v3498_v8, %v3494_v19  ;;  %v1525_v8 = vmax.f32 %v8035_v24, %v8065_v60  ;;  %v9589_v51 = vld [vmem:[#allocation33_spill] sm:$0xff] }
 0x2c5   : > { %v2931_v37 = vpop.f32.mrf.mxu0  ;;  %v8103_v62 = vadd.f32 %v9589_v51, %v7077_v33  ;;  %v1527_v17 = vmax.f32 %v8042_v53, %v8068_v10  ;;  %v1401_v21 = vmul.f32 0.2, %v8079_v42  ;;  %v8112_v63 = vadd.f32 %v7916_v39, %v8002_v45 }
 0x2c6   : > { %v2932_v59 = vadd.f32 %v2931_v37, %v7996_v49  ;;  %v3751_v38 = vpack.c.bf16 %v3499_v54, %v3495_v32  ;;  %v3247_v35 = vmul.f32 0.2, %v2930_v5  ;;  %v3246_v32 = vmul.f32 0.2, %v2928_v20 }
 0x2c7   : > { %v2933_v29 = vpop.f32.mrf.mxu0  ;;  %v1531_v54 = vmax.f32 %v8058_v3, %v8082_v25  ;;  %v8119_v19 = vmul.f32 0.2, %v8087_v57  ;;  %v2074_v53 = vmax.f32 %v1894_v2, %v2010_v18  ;;  %v1902_v10 = vadd.f32 %v7916_v39, %v7968_v50 }
 0x2c8   : > { %v3250_v1 = vmul.f32 0.2, %v2932_v59  ;;  %v2934_v56 = vadd.f32 %v2933_v29, %v7988_v31  ;;  %4657 = vmatprep.mubr.bf16.mxu0 %v3751_v38  ;;  %v1407_v52 = vmul.f32 0.2, %v8103_v62  ;;  %v8129_v25 = vadd.f32 %v7916_v39, %v7985_v26 }
 0x2c9   : > { %2773 = vmatmul.mubr.bf16.gmra.mxu1 %v7941_v6  ;;  %v2937_v0 = vpop.f32.mrf.mxu0  ;;  %4658 = vmatmul.mubr.bf16.vlgmr.msra.gmra.mxu0 %v3750_v40  ;;  %v2075_v6 = vmax.f32 %v8062_v55, %v2011_v9  ;;  %v8114_v24 = vpop.f32.mrf.mxu1  ;;  %v3503_v55 = vmax.f32 %v2930_v5, %v3247_v35  ;;  %v3502_v9 = vmax.f32 %v2928_v20, %v3246_v32  ;;  %v2013_v2 = vmul.f32 0.2, %v8112_v63 }
 0x2ca   : > { %v3251_v58 = vmul.f32 0.2, %v2934_v56  ;;  %2782 = vmatprep.mubr.bf16.mxu1 %v8090_v48  ;;  %v3506_v37 = vmax.f32 %v2932_v59, %v3250_v1  ;;  %v2938_v40 = vadd.f32 %v2937_v0, %v7996_v49  ;;  %v8143_v26 = vpack.c.bf16 %v1519_v15, %v1517_v30 }
 0x2cb   : > { %v2939_v60 = vpop.f32.mrf.mxu0  ;;  %v8132_v59 = vpop.f32.mrf.mxu1  ;;  %v8134_v29 = vpack.c.bf16 %v2075_v6, %v2074_v53  ;;  %v1529_v18 = vmax.f32 %v8079_v42, %v1401_v21  ;;  %v1910_v35 = vadd.f32 %v7916_v39, %v7954_v4  ;;  %v2012_v0 = vmul.f32 0.2, %v1902_v10 }
 0x2cc   : > { %v3507_v22 = vmax.f32 %v2934_v56, %v3251_v58  ;;  %v2940_v38 = vadd.f32 %v2939_v60, %v7988_v31  ;;  %v3754_v27 = vpack.c.bf16 %v3506_v37, %v3502_v9  ;;  %v8149_v32 = vpack.c.bf16 %v1523_v43, %v1521_v13 }
 0x2cd   : > { %v2941_v45 = vpop.f32.mrf.mxu0  ;;  %v8151_v58 = vpack.c.bf16 %v1527_v17, %v1525_v8  ;;  %v3254_v16 = vmul.f32 0.2, %v2938_v40  ;;  %v8154_v34 = vpack.c.bf16 %v1531_v54, %v1529_v18  ;;  %v1533_v44 = vmax.f32 %v8087_v57, %v8119_v19  ;;  %v6265_v15 = vpop.f32.mrf.mxu1 }
 0x2ce   : > { %v2942_v3 = vadd.f32 %v2941_v45, %v7996_v49  ;;  %v3755_v5 = vpack.c.bf16 %v3507_v22, %v3503_v55  ;;  %v3255_v1 = vmul.f32 0.2, %v2940_v38  ;;  %v2015_v4 = vmul.f32 0.2, %v8129_v25 }
 0x2cf   : > { %v2943_v50 = vpop.f32.mrf.mxu0  ;;  %v2077_v30 = vmax.f32 %v8112_v63, %v2013_v2  ;;  %v1535_v13 = vmax.f32 %v8103_v62, %v1407_v52  ;;  %v2014_v21 = vmul.f32 0.2, %v1910_v35  ;;  %v2076_v6 = vmax.f32 %v1902_v10, %v2012_v0  ;;  %v9590_v62 = vld [vmem:[#allocation34_spill] sm:$0xff] }
 0x2d0   : > { %v3258_v56 = vmul.f32 0.2, %v2942_v3  ;;  %v2944_v20 = vadd.f32 %v2943_v50, %v7988_v31  ;;  %4667 = vmatprep.mubr.bf16.mxu0 %v3755_v5  ;;  %v3511_v43 = vmax.f32 %v2940_v38, %v3255_v1  ;;  %v8163_v60 = vadd.f32 %v7916_v39, %v8096_v28  ;;  %v1936_v28 = vpop.f32.mrf.mxu1 }
 0x2d1   : > { %2783 = vmatmul.mubr.bf16.gmra.mxu1 %v8004_v23  ;;  %v2947_v51 = vpop.f32.mrf.mxu0  ;;  %4668 = vmatmul.mubr.bf16.gmra.mxu0 %v3754_v27  ;;  %v3510_v19 = vmax.f32 %v2938_v40, %v3254_v16  ;;  %v8170_v53 = vadd.f32 %v9590_v62, %v7077_v33  ;;  %v2079_v55 = vmax.f32 %v8129_v25, %v2015_v4  ;;  %v9591_v27 = vld [vmem:[#allocation6_spill] sm:$0xff] }
 0x2d2   : > { %v3259_v11 = vmul.f32 0.2, %v2944_v20  ;;  %2792 = vmatprep.mubr.bf16.mxu1 %v8134_v29  ;;  %v3514_v8 = vmax.f32 %v2942_v3, %v3258_v56  ;;  %v2948_v37 = vadd.f32 %v2947_v51, %v7996_v49  ;;  %v8175_v10 = vadd.f32 %v7916_v39, %v8044_v47 }
 0x2d3   : > { %v2949_v42 = vpop.f32.mrf.mxu0  ;;  %v8177_v45 = vpack.c.bf16 %v2077_v30, %v2076_v6  ;;  %v8181_v52 = vadd.f32 %v7916_v39, %v8011_v12  ;;  %v8184_v2 = vpack.c.bf16 %v1535_v13, %v1533_v44  ;;  %v2078_v25 = vmax.f32 %v1910_v35, %v2014_v21 }
 0x2d4   : > { %v3515_v17 = vmax.f32 %v2944_v20, %v3259_v11  ;;  %v2950_v54 = vadd.f32 %v2949_v42, %v7988_v31  ;;  %v3758_v9 = vpack.c.bf16 %v3514_v8, %v3510_v19  ;;  %v8191_v1 = vrot.slane %v7981_v14, %v9591_v27 }
 0x2d5   : > { %v2951_v57 = vpop.f32.mrf.mxu0  ;;  %v8195_v12 = vadd.f32 %v7916_v39, %v8072_v41  ;;  %v2017_v56 = vmul.f32 0.2, %v8163_v60  ;;  %v3262_v20 = vmul.f32 0.2, %v2948_v37  ;;  %v2016_v35 = vmul.f32 0.2, %v8175_v10 }
 0x2d6   : > { %v2952_v63 = vadd.f32 %v2951_v57, %v7996_v49  ;;  %v3759_v22 = vpack.c.bf16 %v3515_v17, %v3511_v43  ;;  %v3263_v50 = vmul.f32 0.2, %v2950_v54  ;;  %v8202_v0 = vadd.f32 %v7916_v39, %v8114_v24  ;;  %v9592_v41 = vld [vmem:[#allocation7_spill] sm:$0xff] }
 0x2d7   : > { %v2953_v38 = vpop.f32.mrf.mxu0  ;;  %v8206_v11 = vpack.c.bf16 %v2079_v55, %v2078_v25  ;;  %v8210_v44 = vrot.slane %v7981_v14, %v9592_v41  ;;  %v8213_v4 = vmul.f32 0.2, %v8181_v52  ;;  %v8216_v30 = vadd.f32 %v7916_v39, %v6265_v15 }
 0x2d8   : > { %v3266_v40 = vmul.f32 0.2, %v2952_v63  ;;  %v2954_v3 = vadd.f32 %v2953_v38, %v7988_v31  ;;  %4677 = vmatprep.mubr.bf16.mxu0 %v3759_v22  ;;  %v8219_v24 = vadd.f32 %v7916_v39, %v1936_v28  ;;  %v3519_v43 = vmax.f32 %v2950_v54, %v3263_v50 }
 0x2d9   : > { %v8186_v5 = vpop.f32.mrf.mxu1  ;;  %2793 = vmatmul.mubr.bf16.gmra.mxu1 %v8014_v46  ;;  %v2957_v47 = vpop.f32.mrf.mxu0  ;;  %4678 = vmatmul.mubr.bf16.gmra.mxu0 %v3758_v9  ;;  %v8226_v6 = vmul.f32 0.2, %v8195_v12  ;;  %v2081_v57 = vmax.f32 %v8163_v60, %v2017_v56  ;;  %v3518_v15 = vmax.f32 %v2948_v37, %v3262_v20  ;;  %v2022_v22 = vmul.f32 0.2, %v8202_v0 }
 0x2da   : > { %v3267_v18 = vmul.f32 0.2, %v2954_v3  ;;  %2802 = vmatprep.mubr.bf16.mxu1 %v8177_v45  ;;  %v3522_v42 = vmax.f32 %v2952_v63, %v3266_v40  ;;  %v2958_v8 = vadd.f32 %v2957_v47, %v7996_v49  ;;  %v2080_v63 = vmax.f32 %v8175_v10, %v2016_v35 }
 0x2db   : > { %v8204_v51 = vpop.f32.mrf.mxu1  ;;  %v2959_v16 = vpop.f32.mrf.mxu0  ;;  %v1934_v54 = vadd.f32 %v7916_v39, %v8132_v59  ;;  %v8239_v60 = vadd.f32 %v7983_v36, %v7077_v33  ;;  %v2023_v37 = vmul.f32 0.2, %v8216_v30  ;;  %v2021_v10 = vmul.f32 0.2, %v8219_v24 }
 0x2dc   : > { %v3523_v13 = vmax.f32 %v2954_v3, %v3267_v18  ;;  %v2960_v17 = vadd.f32 %v2959_v16, %v7988_v31  ;;  %v3762_v38 = vpack.c.bf16 %v3522_v42, %v3518_v15  ;;  %v3270_v25 = vmul.f32 0.2, %v2958_v8 }
 0x2dd   : > { %v8223_v21 = vpop.f32.mrf.mxu1  ;;  %v2961_v14 = vpop.f32.mrf.mxu0  ;;  %v2082_v47 = vmax.f32 %v8181_v52, %v8213_v4  ;;  %v2083_v56 = vmax.f32 %v8195_v12, %v8226_v6  ;;  %v8249_v33 = vpack.c.bf16 %v2081_v57, %v2080_v63  ;;  %v2020_v36 = vmul.f32 0.2, %v1934_v54 }
 0x2de   : > { %v2962_v19 = vadd.f32 %v2961_v14, %v7996_v49  ;;  %v3763_v28 = vpack.c.bf16 %v3523_v13, %v3519_v43  ;;  %v3271_v9 = vmul.f32 0.2, %v2960_v17  ;;  %v2086_v43 = vmax.f32 %v8202_v0, %v2022_v22 }
 0x2df   : > { %v8234_v62 = vpop.f32.mrf.mxu1  ;;  %v2963_v55 = vpop.f32.mrf.mxu0  ;;  %v2087_v14 = vmax.f32 %v8216_v30, %v2023_v37  ;;  %v2085_v6 = vmax.f32 %v8219_v24, %v2021_v10  ;;  %v3526_v57 = vmax.f32 %v2958_v8, %v3270_v25  ;;  %v2084_v0 = vmax.f32 %v1934_v54, %v2020_v36 }
 0x2e0   : > { %v3274_v40 = vmul.f32 0.2, %v2962_v19  ;;  %v2964_v3 = vadd.f32 %v2963_v55, %v7988_v31  ;;  %4687 = vmatprep.mubr.bf16.mxu0 %v3763_v28  ;;  %v3527_v52 = vmax.f32 %v2960_v17, %v3271_v9 }
 0x2e1   : > { %v2564_v59 = vpop.f32.mrf.mxu1  ;;  %2803 = vmatmul.mubr.bf16.gmra.mxu1 %v8024_v61  ;;  %v2967_v50 = vpop.f32.mrf.mxu0  ;;  %4688 = vmatmul.mubr.bf16.gmra.mxu0 %v3762_v38  ;;  %v8265_v54 = vpack.c.bf16 %v2085_v6, %v2084_v0  ;;  %v8267_v36 = vpack.c.bf16 %v2087_v14, %v2086_v43 }
 0x2e2   : > { %v3275_v20 = vmul.f32 0.2, %v2964_v3  ;;  %2812 = vmatprep.mubr.bf16.mxu1 %v8206_v11  ;;  %v3530_v18 = vmax.f32 %v2962_v19, %v3274_v40  ;;  %v2565_v35 = vadd.f32 %v2564_v59, %v8191_v1  ;;  %v2968_v16 = vadd.f32 %v2967_v50, %v7996_v49 }
 0x2e3   : > { %v2566_v42 = vpop.f32.mrf.mxu1  ;;  %v2969_v13 = vpop.f32.mrf.mxu0 }
 0x2e4   : > { %v3531_v4 = vmax.f32 %v2964_v3, %v3275_v20  ;;  %v2567_v12 = vadd.f32 %v2566_v42, %v8210_v44  ;;  %v2970_v15 = vadd.f32 %v2969_v13, %v7988_v31  ;;  %v3236_v55 = vmul.f32 0.2, %v2565_v35 }
 0x2e5   : > { %v2568_v19 = vpop.f32.mrf.mxu1  ;;  %v2971_v63 = vpop.f32.mrf.mxu0  ;;  %v3766_v17 = vpack.c.bf16 %v3530_v18, %v3526_v57  ;;  %v3278_v22 = vmul.f32 0.2, %v2968_v16  ;;  %v8263_v20 = vpack.c.bf16 %v2083_v56, %v2082_v47 }
 0x2e6   : > { %v2569_v28 = vadd.f32 %v2568_v19, %v8191_v1  ;;  %v2972_v38 = vadd.f32 %v2971_v63, %v7996_v49  ;;  %v3767_v40 = vpack.c.bf16 %v3531_v4, %v3527_v52  ;;  %v3237_v9 = vmul.f32 0.2, %v2567_v12 }
 0x2e7   : > { %v2570_v3 = vpop.f32.mrf.mxu1  ;;  %v2973_v59 = vpop.f32.mrf.mxu0  ;;  %v3279_v30 = vmul.f32 0.2, %v2970_v15  ;;  %v3492_v18 = vmax.f32 %v2565_v35, %v3236_v55  ;;  %v3534_v4 = vmax.f32 %v2968_v16, %v3278_v22 }
 0x2e8   : > { %v3240_v37 = vmul.f32 0.2, %v2569_v28  ;;  %v3282_v24 = vmul.f32 0.2, %v2972_v38  ;;  %v2571_v8 = vadd.f32 %v2570_v3, %v8210_v44  ;;  %4697 = vmatprep.mubr.bf16.mxu0 %v3767_v40  ;;  %v2974_v10 = vadd.f32 %v2973_v59, %v7988_v31 }
 0x2e9   : > { %v2574_v25 = vpop.f32.mrf.mxu1  ;;  %2813 = vmatmul.mubr.bf16.gmra.mxu1 %v8026_v7  ;;  %v2977_v50 = vpop.f32.mrf.mxu0  ;;  %4698 = vmatmul.mubr.bf16.gmra.mxu0 %v3766_v17  ;;  %v3493_v6 = vmax.f32 %v2567_v12, %v3237_v9  ;;  %v3535_v40 = vmax.f32 %v2970_v15, %v3279_v30 }
 0x2ea   : > { %v3496_v42 = vmax.f32 %v2569_v28, %v3240_v37  ;;  %v3241_v13 = vmul.f32 0.2, %v2571_v8  ;;  %v2575_v52 = vadd.f32 %v2574_v25, %v8191_v1  ;;  %2822 = vmatprep.mubr.bf16.mxu1 %v8249_v33  ;;  %v3538_v57 = vmax.f32 %v2972_v38, %v3282_v24 }
 0x2eb   : > { %v3283_v19 = vmul.f32 0.2, %v2974_v10  ;;  %v8272_v63 = vadd.f32 %v2977_v50, %v7996_v49  ;;  %v2576_v47 = vpop.f32.mrf.mxu1  ;;  %v2979_v56 = vpop.f32.mrf.mxu0 }
 0x2ec   : > { %v8274_v43 = vpack.c.bf16 %v3496_v42, %v3492_v18  ;;  %v3497_v35 = vmax.f32 %v2571_v8, %v3241_v13  ;;  %v3244_v55 = vmul.f32 0.2, %v2575_v52  ;;  %v2577_v28 = vadd.f32 %v2576_v47, %v8210_v44 }
 0x2ed   : > { %v3539_v14 = vmax.f32 %v2974_v10, %v3283_v19  ;;  %v2980_v0 = vadd.f32 %v2979_v56, %v7988_v31  ;;  %v2578_v17 = vpop.f32.mrf.mxu1  ;;  %v2981_v16 = vpop.f32.mrf.mxu0  ;;  %v3286_v38 = vmul.f32 0.2, %v8272_v63  ;;  %v3770_v12 = vpack.c.bf16 %v3538_v57, %v3534_v4 }
 0x2ee   : > { %v2579_v22 = vadd.f32 %v2578_v17, %v8191_v1  ;;  %v2982_v3 = vadd.f32 %v2981_v16, %v7996_v49  ;;  %v8281_v59 = vpack.c.bf16 %v3497_v35, %v3493_v6  ;;  %v3245_v15 = vmul.f32 0.2, %v2577_v28 }
 0x2ef   : > { %v3287_v9 = vmul.f32 0.2, %v2980_v0  ;;  %v2580_v30 = vpop.f32.mrf.mxu1  ;;  %v2983_v37 = vpop.f32.mrf.mxu0  ;;  %v3771_v24 = vpack.c.bf16 %v3539_v14, %v3535_v40  ;;  %v8286_v18 = vmul.f32 0.2, %v8170_v53  ;;  %v8290_v42 = vadd.f32 %v7916_v39, %v8204_v51 }
 0x2f0   : > { %v3248_v8 = vmul.f32 0.2, %v2579_v22  ;;  %v3290_v10 = vmul.f32 0.2, %v2982_v3  ;;  %v2581_v25 = vadd.f32 %v2580_v30, %v8210_v44  ;;  %v2984_v50 = vadd.f32 %v2983_v37, %v7988_v31 }
 0x2f1   : > { %v8294_v13 = vadd.f32 %v7916_v39, %v8234_v62  ;;  %v3500_v4 = vmax.f32 %v2575_v52, %v3244_v55  ;;  %4707 = vmatprep.mubr.bf16.mxu0 %v3771_v24  ;;  %v2584_v57 = vpop.f32.mrf.mxu1  ;;  %2823 = vmatmul.mubr.bf16.gmra.mxu1 %v8143_v26  ;;  %v2987_v19 = vpop.f32.mrf.mxu0  ;;  %v3542_v47 = vmax.f32 %v8272_v63, %v3286_v38 }
 0x2f2   : > { %v3504_v56 = vmax.f32 %v2579_v22, %v3248_v8  ;;  %v3249_v6 = vmul.f32 0.2, %v2581_v25  ;;  %v3291_v40 = vmul.f32 0.2, %v2984_v50  ;;  %4708 = vmatmul.mubr.bf16.gmra.mxu0 %v3770_v12  ;;  %2832 = vmatprep.mubr.bf16.mxu1 %v8263_v20  ;;  %v3501_v51 = vmax.f32 %v2577_v28, %v3245_v15 }
 0x2f3   : > { %v3546_v35 = vmax.f32 %v2982_v3, %v3290_v10  ;;  %v2585_v14 = vadd.f32 %v2584_v57, %v8191_v1  ;;  %v8301_v62 = vadd.f32 %v2987_v19, %v7996_v49  ;;  %v2586_v52 = vpop.f32.mrf.mxu1  ;;  %v2989_v55 = vpop.f32.mrf.mxu0  ;;  %v3543_v17 = vmax.f32 %v2980_v0, %v3287_v9 }
 0x2f4   : > { %v8303_v16 = vpack.c.bf16 %v3504_v56, %v3500_v4  ;;  %v3505_v30 = vmax.f32 %v2581_v25, %v3249_v6  ;;  %v3547_v63 = vmax.f32 %v2984_v50, %v3291_v40  ;;  %v2587_v12 = vadd.f32 %v2586_v52, %v8210_v44 }
 0x2f5   : > { %v3252_v38 = vmul.f32 0.2, %v2585_v14  ;;  %v3294_v22 = vmul.f32 0.2, %v8301_v62  ;;  %v2990_v28 = vadd.f32 %v2989_v55, %v7988_v31  ;;  %v2588_v3 = vpop.f32.mrf.mxu1  ;;  %v2991_v15 = vpop.f32.mrf.mxu0  ;;  %v8314_v0 = vadd.f32 %v7916_v39, %v8186_v5 }
 0x2f6   : > { %v2589_v37 = vadd.f32 %v2588_v3, %v8191_v1  ;;  %v2992_v24 = vadd.f32 %v2991_v15, %v7996_v49  ;;  %v3775_v8 = vpack.c.bf16 %v3547_v63, %v3543_v17  ;;  %v8310_v10 = vpack.c.bf16 %v3505_v30, %v3501_v51 }
 0x2f7   : > { %v3774_v9 = vpack.c.bf16 %v3546_v35, %v3542_v47  ;;  %v3253_v25 = vmul.f32 0.2, %v2587_v12  ;;  %v3295_v50 = vmul.f32 0.2, %v2990_v28  ;;  %v2590_v4 = vpop.f32.mrf.mxu1  ;;  %v2993_v57 = vpop.f32.mrf.mxu0  ;;  %v8319_v52 = vmul.f32 0.2, %v8290_v42 }
 0x2f8   : > { %v3256_v19 = vmul.f32 0.2, %v2589_v37  ;;  %v3298_v56 = vmul.f32 0.2, %v2992_v24  ;;  %v2591_v6 = vadd.f32 %v2590_v4, %v8210_v44  ;;  %v2994_v40 = vadd.f32 %v2993_v57, %v7988_v31  ;;  %4717 = vmatprep.mubr.bf16.mxu0 %v3775_v8 }
 0x2f9   : > { %v8323_v51 = vadd.f32 %v7916_v39, %v8223_v21  ;;  %v8326_v5 = vmul.f32 0.2, %v8294_v13  ;;  %v3508_v47 = vmax.f32 %v2585_v14, %v3252_v38  ;;  %v2594_v35 = vpop.f32.mrf.mxu1  ;;  %2833 = vmatmul.mubr.bf16.gmra.mxu1 %v8149_v32  ;;  %v2997_v55 = vpop.f32.mrf.mxu0  ;;  %v3550_v17 = vmax.f32 %v8301_v62, %v3294_v22 }
 0x2fa   : > { %v3512_v30 = vmax.f32 %v2589_v37, %v3256_v19  ;;  %v3257_v63 = vmul.f32 0.2, %v2591_v6  ;;  %v3299_v3 = vmul.f32 0.2, %v2994_v40  ;;  %4718 = vmatmul.mubr.bf16.gmra.mxu0 %v3774_v9  ;;  %2842 = vmatprep.mubr.bf16.mxu1 %v8265_v54  ;;  %v3509_v15 = vmax.f32 %v2587_v12, %v3253_v25 }
 0x2fb   : > { %v3554_v8 = vmax.f32 %v2992_v24, %v3298_v56  ;;  %v2595_v39 = vadd.f32 %v2594_v35, %v8191_v1  ;;  %v2998_v21 = vadd.f32 %v2997_v55, %v7996_v49  ;;  %v2596_v4 = vpop.f32.mrf.mxu1  ;;  %v2999_v14 = vpop.f32.mrf.mxu0  ;;  %v3551_v38 = vmax.f32 %v2990_v28, %v3295_v50 }
 0x2fc   : > { %v8333_v57 = vpack.c.bf16 %v3512_v30, %v3508_v47  ;;  %v3513_v41 = vmax.f32 %v2591_v6, %v3257_v63  ;;  %v3555_v27 = vmax.f32 %v2994_v40, %v3299_v3  ;;  %v2597_v37 = vadd.f32 %v2596_v4, %v8210_v44 }
 0x2fd   : > { %v3260_v62 = vmul.f32 0.2, %v2595_v39  ;;  %v3302_v22 = vmul.f32 0.2, %v2998_v21  ;;  %v3000_v9 = vadd.f32 %v2999_v14, %v7988_v31  ;;  %v2598_v19 = vpop.f32.mrf.mxu1  ;;  %v3001_v12 = vpop.f32.mrf.mxu0  ;;  %v8342_v28 = vmul.f32 0.2, %v8314_v0 }
 0x2fe   : > { %9593 = vst [vmem:[#allocation9_spill] sm:$0xff] %v8333_v57  ;;  %v2599_v24 = vadd.f32 %v2598_v19, %v8191_v1  ;;  %v3002_v25 = vadd.f32 %v3001_v12, %v7996_v49  ;;  %v3779_v56 = vpack.c.bf16 %v3555_v27, %v3551_v38  ;;  %v8339_v35 = vpack.c.bf16 %v3513_v41, %v3509_v15 }
 0x2ff   : > { %v3778_v50 = vpack.c.bf16 %v3554_v8, %v3550_v17  ;;  %v3261_v6 = vmul.f32 0.2, %v2597_v37  ;;  %v3303_v40 = vmul.f32 0.2, %v3000_v9  ;;  %v2600_v47 = vpop.f32.mrf.mxu1  ;;  %v3003_v55 = vpop.f32.mrf.mxu0  ;;  %v2088_v27 = vmax.f32 %v8290_v42, %v8319_v52 }
 0x300   : > { %9594 = vst [vmem:[#allocation8_spill] sm:$0xff] %v8339_v35  ;;  %v3264_v30 = vmul.f32 0.2, %v2599_v24  ;;  %v3306_v63 = vmul.f32 0.2, %v3002_v25  ;;  %v2601_v3 = vadd.f32 %v2600_v47, %v8210_v44  ;;  %v3004_v4 = vadd.f32 %v3003_v55, %v7988_v31  ;;  %4727 = vmatprep.mubr.bf16.mxu0 %v3779_v56 }
 0x301   : > { %v8349_v41 = vmul.f32 0.2, %v8323_v51  ;;  %v2089_v17 = vmax.f32 %v8294_v13, %v8326_v5  ;;  %v3516_v15 = vmax.f32 %v2595_v39, %v3260_v62  ;;  %v2604_v8 = vpop.f32.mrf.mxu1  ;;  %2843 = vmatmul.mubr.bf16.gmra.mxu1 %v8151_v58  ;;  %v3007_v14 = vpop.f32.mrf.mxu0  ;;  %v3558_v38 = vmax.f32 %v2998_v21, %v3302_v22 }
 0x302   : > { %v3520_v19 = vmax.f32 %v2599_v24, %v3264_v30  ;;  %v3265_v12 = vmul.f32 0.2, %v2601_v3  ;;  %v3307_v47 = vmul.f32 0.2, %v3004_v4  ;;  %4728 = vmatmul.mubr.bf16.gmra.mxu0 %v3778_v50  ;;  %2852 = vmatprep.mubr.bf16.mxu1 %v8267_v36  ;;  %v3517_v56 = vmax.f32 %v2597_v37, %v3261_v6 }
 0x303   : > { %v3562_v42 = vmax.f32 %v3002_v25, %v3306_v63  ;;  %v2605_v52 = vadd.f32 %v2604_v8, %v8191_v1  ;;  %v3008_v55 = vadd.f32 %v3007_v14, %v7996_v49  ;;  %v2606_v57 = vpop.f32.mrf.mxu1  ;;  %v3009_v13 = vpop.f32.mrf.mxu0  ;;  %v3559_v5 = vmax.f32 %v3000_v9, %v3303_v40 }
 0x304   : > { %v8357_v39 = vpack.c.bf16 %v3520_v19, %v3516_v15  ;;  %v3521_v62 = vmax.f32 %v2601_v3, %v3265_v12  ;;  %v3563_v35 = vmax.f32 %v3004_v4, %v3307_v47  ;;  %v2607_v24 = vadd.f32 %v2606_v57, %v8210_v44 }
 0x305   : > { %v3268_v21 = vmul.f32 0.2, %v2605_v52  ;;  %v3310_v22 = vmul.f32 0.2, %v3008_v55  ;;  %v3010_v50 = vadd.f32 %v3009_v13, %v7988_v31  ;;  %v2608_v30 = vpop.f32.mrf.mxu1  ;;  %v3011_v37 = vpop.f32.mrf.mxu0  ;;  %v3782_v9 = vpack.c.bf16 %v3562_v42, %v3558_v38 }
 0x306   : > { %v2609_v25 = vadd.f32 %v2608_v30, %v8191_v1  ;;  %v3012_v6 = vadd.f32 %v3011_v37, %v7996_v49  ;;  %v3783_v63 = vpack.c.bf16 %v3563_v35, %v3559_v5  ;;  %v8363_v8 = vpack.c.bf16 %v3521_v62, %v3517_v56 }
 0x307   : > { %v3269_v40 = vmul.f32 0.2, %v2607_v24  ;;  %v3311_v15 = vmul.f32 0.2, %v3010_v50  ;;  %v2610_v3 = vpop.f32.mrf.mxu1  ;;  %v3013_v4 = vpop.f32.mrf.mxu0  ;;  %v8365_v14 = vpack.c.bf16 %v2089_v17, %v2088_v27  ;;  %v8370_v13 = vmul.f32 0.2, %v8239_v60 }
 0x308   : > { %v3272_v19 = vmul.f32 0.2, %v2609_v25  ;;  %v3314_v57 = vmul.f32 0.2, %v3012_v6  ;;  %v2611_v12 = vadd.f32 %v2610_v3, %v8210_v44  ;;  %v3014_v47 = vadd.f32 %v3013_v4, %v7988_v31  ;;  %4737 = vmatprep.mubr.bf16.mxu0 %v3783_v63 }
 0x309   : > { %v2090_v35 = vmax.f32 %v8314_v0, %v8342_v28  ;;  %v2091_v38 = vmax.f32 %v8323_v51, %v8349_v41  ;;  %v3524_v56 = vmax.f32 %v2605_v52, %v3268_v21  ;;  %v2614_v42 = vpop.f32.mrf.mxu1  ;;  %2853 = vmatmul.mubr.bf16.gmra.mxu1 %v8154_v34  ;;  %v3017_v27 = vpop.f32.mrf.mxu0  ;;  %v3566_v17 = vmax.f32 %v3008_v55, %v3310_v22 }
 0x30a   : > { %v3528_v5 = vmax.f32 %v2609_v25, %v3272_v19  ;;  %v3273_v62 = vmul.f32 0.2, %v2611_v12  ;;  %v3315_v30 = vmul.f32 0.2, %v3014_v47  ;;  %4738 = vmatmul.mubr.bf16.gmra.mxu0 %v3782_v9  ;;  %2862 = vmatprep.mubr.bf16.mxu1 %v8365_v14  ;;  %v3525_v37 = vmax.f32 %v2607_v24, %v3269_v40 }
 0x30b   : > { %v3570_v63 = vmax.f32 %v3012_v6, %v3314_v57  ;;  %v2615_v3 = vadd.f32 %v2614_v42, %v8191_v1  ;;  %v3018_v0 = vadd.f32 %v3017_v27, %v7996_v49  ;;  %v2616_v28 = vpop.f32.mrf.mxu1  ;;  %v3019_v51 = vpop.f32.mrf.mxu0  ;;  %v3567_v41 = vmax.f32 %v3010_v50, %v3311_v15 }
 0x30c   : > { %v8380_v52 = vpack.c.bf16 %v3528_v5, %v3524_v56  ;;  %v3529_v21 = vmax.f32 %v2611_v12, %v3273_v62  ;;  %v3571_v4 = vmax.f32 %v3014_v47, %v3315_v30  ;;  %v2617_v25 = vadd.f32 %v2616_v28, %v8210_v44 }
 0x30d   : > { %v3276_v55 = vmul.f32 0.2, %v2615_v3  ;;  %v3318_v22 = vmul.f32 0.2, %v3018_v0  ;;  %v3020_v9 = vadd.f32 %v3019_v51, %v7988_v31  ;;  %v2618_v19 = vpop.f32.mrf.mxu1  ;;  %v3021_v24 = vpop.f32.mrf.mxu0  ;;  %v3786_v50 = vpack.c.bf16 %v3570_v63, %v3566_v17 }
 0x30e   : > { %v2619_v6 = vadd.f32 %v2618_v19, %v8191_v1  ;;  %v3022_v40 = vadd.f32 %v3021_v24, %v7996_v49  ;;  %v3787_v57 = vpack.c.bf16 %v3571_v4, %v3567_v41  ;;  %v8386_v42 = vpack.c.bf16 %v3529_v21, %v3525_v37 }
 0x30f   : > { %v3277_v15 = vmul.f32 0.2, %v2617_v25  ;;  %v3319_v56 = vmul.f32 0.2, %v3020_v9  ;;  %v2620_v12 = vpop.f32.mrf.mxu1  ;;  %v3023_v47 = vpop.f32.mrf.mxu0  ;;  %v8388_v27 = vpack.c.bf16 %v2091_v38, %v2090_v35  ;;  %v1537_v51 = vmax.f32 %v8170_v53, %v8286_v18 }
 0x310   : > { %v3280_v5 = vmul.f32 0.2, %v2619_v6  ;;  %v3322_v62 = vmul.f32 0.2, %v3022_v40  ;;  %v2621_v30 = vadd.f32 %v2620_v12, %v8210_v44  ;;  %v3024_v28 = vadd.f32 %v3023_v47, %v7988_v31  ;;  %4747 = vmatprep.mubr.bf16.mxu0 %v3787_v57 }
 0x311   : > { %v1539_v37 = vmax.f32 %v8239_v60, %v8370_v13  ;;  %v3532_v17 = vmax.f32 %v2615_v3, %v3276_v55  ;;  %v2624_v63 = vpop.f32.mrf.mxu1  ;;  %2863 = vmatmul.mubr.bf16.gmra.mxu1 %v8184_v2  ;;  %v3027_v41 = vpop.f32.mrf.mxu0  ;;  %v3574_v35 = vmax.f32 %v3018_v0, %v3318_v22  ;;  %v3533_v19 = vmax.f32 %v2617_v25, %v3277_v15 }
 0x312   : > { %v3536_v38 = vmax.f32 %v2619_v6, %v3280_v5  ;;  %v3281_v21 = vmul.f32 0.2, %v2621_v30  ;;  %v3323_v4 = vmul.f32 0.2, %v3024_v28  ;;  %4748 = vmatmul.mubr.bf16.gmra.mxu0 %v3786_v50  ;;  %2872 = vmatprep.mubr.bf16.mxu1 %v8388_v27  ;;  %v3578_v24 = vmax.f32 %v3022_v40, %v3322_v62 }
 0x313   : > { %v2625_v57 = vadd.f32 %v2624_v63, %v8191_v1  ;;  %v3028_v53 = vadd.f32 %v3027_v41, %v7996_v49  ;;  %v2626_v18 = vpop.f32.mrf.mxu1  ;;  %v3029_v60 = vpop.f32.mrf.mxu0  ;;  %v3575_v13 = vmax.f32 %v3020_v9, %v3319_v56  ;;  %v8408_v9 = vpack.c.bf16 %v1539_v37, %v1537_v51 }
 0x314   : > { %v8400_v3 = vpack.c.bf16 %v3536_v38, %v3532_v17  ;;  %v3537_v55 = vmax.f32 %v2621_v30, %v3281_v21  ;;  %v3579_v12 = vmax.f32 %v3024_v28, %v3323_v4  ;;  %v2627_v6 = vadd.f32 %v2626_v18, %v8210_v44 }
 0x315   : > { %v3284_v0 = vmul.f32 0.2, %v2625_v57  ;;  %v3326_v22 = vmul.f32 0.2, %v3028_v53  ;;  %v3030_v50 = vadd.f32 %v3029_v60, %v7988_v31  ;;  %v2628_v47 = vpop.f32.mrf.mxu1  ;;  %v3031_v25 = vpop.f32.mrf.mxu0  ;;  %v3790_v56 = vpack.c.bf16 %v3578_v24, %v3574_v35 }
 0x316   : > { %v2629_v40 = vadd.f32 %v2628_v47, %v8191_v1  ;;  %v3032_v15 = vadd.f32 %v3031_v25, %v7996_v49  ;;  %v3791_v5 = vpack.c.bf16 %v3579_v12, %v3575_v13  ;;  %v8406_v62 = vpack.c.bf16 %v3537_v55, %v3533_v19 }
 0x317   : > { %v3285_v30 = vmul.f32 0.2, %v2627_v6  ;;  %v3327_v28 = vmul.f32 0.2, %v3030_v50  ;;  %v2630_v17 = vpop.f32.mrf.mxu1  ;;  %v3033_v63 = vpop.f32.mrf.mxu0  ;;  %v3540_v18 = vmax.f32 %v2625_v57, %v3284_v0  ;;  %v3582_v13 = vmax.f32 %v3028_v53, %v3326_v22 }
 0x318   : > { %v3288_v41 = vmul.f32 0.2, %v2629_v40  ;;  %v3330_v38 = vmul.f32 0.2, %v3032_v15  ;;  %v2631_v21 = vadd.f32 %v2630_v17, %v8210_v44  ;;  %v3034_v4 = vadd.f32 %v3033_v63, %v7988_v31  ;;  %4757 = vmatprep.mubr.bf16.mxu0 %v3791_v5 }
 0x319   : > { %v2634_v60 = vpop.f32.mrf.mxu1  ;;  %2873 = vmatmul.mubr.bf16.gmra.mxu1 %v8408_v9  ;;  %v3037_v19 = vpop.f32.mrf.mxu0  ;;  %v3541_v24 = vmax.f32 %v2627_v6, %v3285_v30  ;;  %v3583_v0 = vmax.f32 %v3030_v50, %v3327_v28  ;;  %v6638_v50 = vld [vmem:[%s9522_s7 + $0x70] ss:$8 sps:$4 sm:$0xff]  }
 0x31a   : > { %v3544_v51 = vmax.f32 %v2629_v40, %v3288_v41  ;;  %v3289_v37 = vmul.f32 0.2, %v2631_v21  ;;  %v3331_v35 = vmul.f32 0.2, %v3034_v4  ;;  %4758 = vmatmul.mubr.bf16.gmra.mxu0 %v3790_v56  ;;  %3135 = vmatprep.mubr.bf16.mxu1 %v8090_v48  ;;  %v3586_v55 = vmax.f32 %v3032_v15, %v3330_v38 }
 0x31b   : > { %v2635_v12 = vadd.f32 %v2634_v60, %v8191_v1  ;;  %v8416_v47 = vadd.f32 %v3037_v19, %v7996_v49  ;;  %v2636_v25 = vpop.f32.mrf.mxu1  ;;  %v3039_v57 = vpop.f32.mrf.mxu0  ;;  %v6643_v19 = vld [vmem:[%s9522_s7 + $0x64] ss:$8 sps:$4 sm:$0xff]  }
 0x31c   : > { %v8418_v5 = vpack.c.bf16 %v3544_v51, %v3540_v18  ;;  %v3545_v17 = vmax.f32 %v2631_v21, %v3289_v37  ;;  %v3587_v53 = vmax.f32 %v3034_v4, %v3331_v35  ;;  %v2637_v56 = vadd.f32 %v2636_v25, %v8210_v44 }
 0x31d   : > { %v3292_v22 = vmul.f32 0.2, %v2635_v12  ;;  %v3334_v40 = vmul.f32 0.2, %v8416_v47  ;;  %v3040_v48 = vadd.f32 %v3039_v57, %v7988_v31  ;;  %v2638_v6 = vpop.f32.mrf.mxu1  ;;  %v3041_v15 = vpop.f32.mrf.mxu0  ;;  %v3794_v38 = vpack.c.bf16 %v3586_v55, %v3582_v13 }
 0x31e   : > { %v2639_v30 = vadd.f32 %v2638_v6, %v8191_v1  ;;  %v3042_v63 = vadd.f32 %v3041_v15, %v7996_v49  ;;  %v3795_v28 = vpack.c.bf16 %v3587_v53, %v3583_v0  ;;  %v8428_v41 = vpack.c.bf16 %v3545_v17, %v3541_v24  ;;  %v6641_v6 = vld [vmem:[%s9522_s7 + $0x60] ss:$8 sps:$4 sm:$0xff]  }
 0x31f   : > { %v3293_v21 = vmul.f32 0.2, %v2637_v56  ;;  %v3335_v4 = vmul.f32 0.2, %v3040_v48  ;;  %v2640_v18 = vpop.f32.mrf.mxu1  ;;  %v3043_v60 = vpop.f32.mrf.mxu0  ;;  %v3548_v57 = vmax.f32 %v2635_v12, %v3292_v22  ;;  %v3590_v13 = vmax.f32 %v8416_v47, %v3334_v40 }
 0x320   : > { %v3296_v51 = vmul.f32 0.2, %v2639_v30  ;;  %v3338_v37 = vmul.f32 0.2, %v3042_v63  ;;  %v2641_v35 = vadd.f32 %v2640_v18, %v8210_v44  ;;  %v3044_v25 = vadd.f32 %v3043_v60, %v7988_v31  ;;  %4767 = vmatprep.mubr.bf16.mxu0 %v3795_v28 }
 0x321   : > { %v2644_v0 = vpop.f32.mrf.mxu1  ;;  %v3047_v24 = vpop.f32.mrf.mxu0  ;;  %3136 = vmatmul.mubr.bf16.vlgmr.msra.gmra.mxu1 %v8004_v23  ;;  %v3549_v15 = vmax.f32 %v2637_v56, %v3293_v21  ;;  %v6646_v23 = vld [vmem:[%s9522_s7 + $0x54] ss:$8 sps:$4 sm:$0xff]   ;;  %v3591_v47 = vmax.f32 %v3040_v48, %v3335_v4 }
 0x322   : > { %v3552_v55 = vmax.f32 %v2639_v30, %v3296_v51  ;;  %v3297_v17 = vmul.f32 0.2, %v2641_v35  ;;  %v3339_v53 = vmul.f32 0.2, %v3044_v25  ;;  %4273 = vmatpush1.bf16.msra.mxu1 %v6638_v50  ;;  %4768 = vmatmul.mubr.bf16.gmra.mxu0 %v3794_v38  ;;  %v3594_v18 = vmax.f32 %v3042_v63, %v3338_v37 }
 0x323   : > { %v2645_v28 = vadd.f32 %v2644_v0, %v8191_v1  ;;  %3145 = vmatprep.mubr.bf16.mxu1 %v8134_v29  ;;  %v2646_v12 = vpop.f32.mrf.mxu1  ;;  %v3049_v22 = vpop.f32.mrf.mxu0  ;;  %4274 = vmatprep.subr.bf16.mxu1 %v6643_v19  ;;  %v3048_v56 = vadd.f32 %v3047_v24, %v7996_v49  ;;  %v6644_v24 = vld [vmem:[%s9522_s7 + $0x50] ss:$8 sps:$4 sm:$0xff]  }
 0x324   : > { %v8445_v40 = vpack.c.bf16 %v3552_v55, %v3548_v57  ;;  %v3553_v30 = vmax.f32 %v2641_v35, %v3297_v17  ;;  %v3595_v50 = vmax.f32 %v3044_v25, %v3339_v53  ;;  %v2647_v63 = vadd.f32 %v2646_v12, %v8210_v44 }
 0x325   : > { %v3300_v38 = vmul.f32 0.2, %v2645_v28  ;;  %v3050_v21 = vadd.f32 %v3049_v22, %v7988_v31  ;;  %v2648_v29 = vpop.f32.mrf.mxu1  ;;  %v3051_v60 = vpop.f32.mrf.mxu0  ;;  %v3798_v4 = vpack.c.bf16 %v3594_v18, %v3590_v13  ;;  %v6649_v13 = vld [vmem:[%s9522_s7 + $0x44] ss:$8 sps:$4 sm:$0xff]  }
 0x326   : > { %v2649_v19 = vadd.f32 %v2648_v29, %v8191_v1  ;;  %v3052_v51 = vadd.f32 %v3051_v60, %v7996_v49  ;;  %4275 = vmatpush1.bf16.msra.mxu1 %v6641_v6  ;;  %v3799_v37 = vpack.c.bf16 %v3595_v50, %v3591_v47  ;;  %v8452_v48 = vpack.c.bf16 %v3553_v30, %v3549_v15 }
 0x327   : > { %v3301_v35 = vmul.f32 0.2, %v2647_v63  ;;  %v3343_v25 = vmul.f32 0.2, %v3050_v21  ;;  %v2650_v57 = vpop.f32.mrf.mxu1  ;;  %v3053_v0 = vpop.f32.mrf.mxu0  ;;  %4276 = vmatprep.subr.bf16.mxu1 %v6646_v23  ;;  %v3342_v6 = vmul.f32 0.2, %v3048_v56  ;;  %v3556_v22 = vmax.f32 %v2645_v28, %v3300_v38 }
 0x328   : > { %v3304_v55 = vmul.f32 0.2, %v2649_v19  ;;  %v3346_v17 = vmul.f32 0.2, %v3052_v51  ;;  %v2651_v53 = vadd.f32 %v2650_v57, %v8210_v44  ;;  %v3054_v12 = vadd.f32 %v3053_v0, %v7988_v31  ;;  %4777 = vmatprep.mubr.bf16.mxu0 %v3799_v37 }
 0x329   : > { %v2654_v15 = vpop.f32.mrf.mxu1  ;;  %v3057_v18 = vpop.f32.mrf.mxu0  ;;  %3146 = vmatmul.mubr.bf16.gmra.mxu1 %v8014_v46  ;;  %v3557_v50 = vmax.f32 %v2647_v63, %v3301_v35  ;;  %v6647_v46 = vld [vmem:[%s9522_s7 + $0x40] ss:$8 sps:$4 sm:$0xff]   ;;  %v3599_v28 = vmax.f32 %v3050_v21, %v3343_v25  ;;  %v3598_v63 = vmax.f32 %v3048_v56, %v3342_v6 }
 0x32a   : > { %v3560_v47 = vmax.f32 %v2649_v19, %v3304_v55  ;;  %v3305_v30 = vmul.f32 0.2, %v2651_v53  ;;  %v3347_v23 = vmul.f32 0.2, %v3054_v12  ;;  %4778 = vmatmul.mubr.bf16.gmra.mxu0 %v3798_v4  ;;  %3155 = vmatprep.mubr.bf16.mxu1 %v8177_v45  ;;  %v3602_v29 = vmax.f32 %v3052_v51, %v3346_v17  ;;  %v6652_v45 = vld [vmem:[%s9522_s7 + $0x34] ss:$8 sps:$4 sm:$0xff]  }
 0x32b   : > { %v2655_v60 = vadd.f32 %v2654_v15, %v8191_v1  ;;  %v8466_v37 = vadd.f32 %v3057_v18, %v7996_v49  ;;  %v2656_v57 = vpop.f32.mrf.mxu1  ;;  %v3059_v0 = vpop.f32.mrf.mxu0  ;;  %4277 = vmatpush1.bf16.msra.mxu1 %v6644_v24 }
 0x32c   : > { %v8471_v38 = vpack.c.bf16 %v3560_v47, %v3556_v22  ;;  %v3561_v19 = vmax.f32 %v2651_v53, %v3305_v30  ;;  %v3603_v4 = vmax.f32 %v3054_v12, %v3347_v23  ;;  %4278 = vmatprep.subr.bf16.mxu1 %v6649_v13  ;;  %v2657_v35 = vadd.f32 %v2656_v57, %v8210_v44  ;;  %v6650_v53 = vld [vmem:[%s9522_s7 + $0x30] ss:$8 sps:$4 sm:$0xff]  }
 0x32d   : > { %v3308_v51 = vmul.f32 0.2, %v2655_v60  ;;  %v3060_v24 = vadd.f32 %v3059_v0, %v7988_v31  ;;  %v2658_v55 = vpop.f32.mrf.mxu1  ;;  %v3061_v17 = vpop.f32.mrf.mxu0  ;;  %v3802_v13 = vpack.c.bf16 %v3602_v29, %v3598_v63  ;;  %v3350_v56 = vmul.f32 0.2, %v8466_v37 }
 0x32e   : > { %v2659_v15 = vadd.f32 %v2658_v55, %v8191_v1  ;;  %v3062_v21 = vadd.f32 %v3061_v17, %v7996_v49  ;;  %v3803_v25 = vpack.c.bf16 %v3603_v4, %v3599_v28  ;;  %v8483_v12 = vpack.c.bf16 %v3561_v19, %v3557_v50  ;;  %v6655_v50 = vld [vmem:[%s9522_s7 + $0x24] ss:$8 sps:$4 sm:$0xff]  }
 0x32f   : > { %v3309_v6 = vmul.f32 0.2, %v2657_v35  ;;  %v3351_v18 = vmul.f32 0.2, %v3060_v24  ;;  %v2660_v22 = vpop.f32.mrf.mxu1  ;;  %v3063_v47 = vpop.f32.mrf.mxu0  ;;  %4279 = vmatpush1.bf16.msra.mxu1 %v6647_v46  ;;  %v3564_v19 = vmax.f32 %v2655_v60, %v3308_v51  ;;  %v3606_v55 = vmax.f32 %v8466_v37, %v3350_v56 }
 0x330   : > { %v3312_v30 = vmul.f32 0.2, %v2659_v15  ;;  %v3354_v23 = vmul.f32 0.2, %v3062_v21  ;;  %v2661_v57 = vadd.f32 %v2660_v22, %v8210_v44  ;;  %v3064_v0 = vadd.f32 %v3063_v47, %v7988_v31  ;;  %4787 = vmatprep.mubr.bf16.mxu0 %v3803_v25  ;;  %4280 = vmatprep.subr.bf16.mxu1 %v6652_v45 }
 0x331   : > { %v2664_v29 = vpop.f32.mrf.mxu1  ;;  %v3067_v28 = vpop.f32.mrf.mxu0  ;;  %3156 = vmatmul.mubr.bf16.gmra.mxu1 %v8024_v61  ;;  %v3565_v17 = vmax.f32 %v2657_v35, %v3309_v6  ;;  %v6653_v61 = vld [vmem:[%s9522_s7 + $0x20] ss:$8 sps:$4 sm:$0xff]   ;;  %v3607_v60 = vmax.f32 %v3060_v24, %v3351_v18 }
 0x332   : > { %v3568_v4 = vmax.f32 %v2659_v15, %v3312_v30  ;;  %v3313_v63 = vmul.f32 0.2, %v2661_v57  ;;  %v3355_v46 = vmul.f32 0.2, %v3064_v0  ;;  %4788 = vmatmul.mubr.bf16.gmra.mxu0 %v3802_v13  ;;  %3165 = vmatprep.mubr.bf16.mxu1 %v8206_v11  ;;  %v3610_v25 = vmax.f32 %v3062_v21, %v3354_v23  ;;  %v6658_v11 = vld [vmem:[%s9522_s7 + $0x14] ss:$8 sps:$4 sm:$0xff]  }
 0x333   : > { %v2665_v45 = vadd.f32 %v2664_v29, %v8191_v1  ;;  %v2666_v22 = vpop.f32.mrf.mxu1  ;;  %v3069_v47 = vpop.f32.mrf.mxu0  ;;  %4281 = vmatpush1.bf16.msra.mxu1 %v6650_v53  ;;  %v3068_v35 = vadd.f32 %v3067_v28, %v7996_v49  ;;  %v6656_v28 = vld [vmem:[%s9522_s7 + $0x10] ss:$8 sps:$4 sm:$0xff]  }
 0x334   : > { %v8498_v51 = vpack.c.bf16 %v3568_v4, %v3564_v19  ;;  %v3569_v15 = vmax.f32 %v2661_v57, %v3313_v63  ;;  %v3611_v13 = vmax.f32 %v3064_v0, %v3355_v46  ;;  %4282 = vmatprep.subr.bf16.mxu1 %v6655_v50  ;;  %v2667_v21 = vadd.f32 %v2666_v22, %v8210_v44 }
 0x335   : > { %v3316_v37 = vmul.f32 0.2, %v2665_v45  ;;  %v3070_v53 = vadd.f32 %v3069_v47, %v7988_v31  ;;  %v2668_v56 = vpop.f32.mrf.mxu1  ;;  %v3071_v6 = vpop.f32.mrf.mxu0  ;;  %v3806_v57 = vpack.c.bf16 %v3610_v25, %v3606_v55  ;;  %v6661_v55 = vld [vmem:[%s9522_s7 + $0x4] ss:$8 sps:$4 sm:$0xff]  }
 0x336   : > { %v2669_v24 = vadd.f32 %v2668_v56, %v8191_v1  ;;  %v3072_v18 = vadd.f32 %v3071_v6, %v7996_v49  ;;  %v3807_v30 = vpack.c.bf16 %v3611_v13, %v3607_v60  ;;  %v8508_v23 = vpack.c.bf16 %v3569_v15, %v3565_v17 }
 0x337   : > { %v3317_v0 = vmul.f32 0.2, %v2667_v21  ;;  %v3359_v50 = vmul.f32 0.2, %v3070_v53  ;;  %v2670_v29 = vpop.f32.mrf.mxu1  ;;  %v3073_v19 = vpop.f32.mrf.mxu0  ;;  %4283 = vmatpush1.bf16.msra.mxu1 %v6653_v61  ;;  %v3358_v17 = vmul.f32 0.2, %v3068_v35  ;;  %v3572_v61 = vmax.f32 %v2665_v45, %v3316_v37 }
 0x338   : > { %v3320_v4 = vmul.f32 0.2, %v2669_v24  ;;  %v3362_v63 = vmul.f32 0.2, %v3072_v18  ;;  %v2671_v46 = vadd.f32 %v2670_v29, %v8210_v44  ;;  %v3074_v22 = vadd.f32 %v3073_v19, %v7988_v31  ;;  %4797 = vmatprep.mubr.bf16.mxu0 %v3807_v30  ;;  %4284 = vmatprep.subr.bf16.mxu1 %v6658_v11 }
 0x339   : > { %v2674_v25 = vpop.f32.mrf.mxu1  ;;  %v3077_v47 = vpop.f32.mrf.mxu0  ;;  %3166 = vmatmul.mubr.bf16.gmra.mxu1 %v8026_v7  ;;  %v3573_v56 = vmax.f32 %v2667_v21, %v3317_v0  ;;  %v6659_v7 = vld [vmem:[%s9522_s7] ss:$8 sps:$4 sm:$0xff]   ;;  %v3615_v45 = vmax.f32 %v3070_v53, %v3359_v50  ;;  %v3614_v21 = vmax.f32 %v3068_v35, %v3358_v17 }
 0x33a   : > { %v3576_v60 = vmax.f32 %v2669_v24, %v3320_v4  ;;  %v3321_v15 = vmul.f32 0.2, %v2671_v46  ;;  %v3363_v13 = vmul.f32 0.2, %v3074_v22  ;;  %4798 = vmatmul.mubr.bf16.gmra.mxu0 %v3806_v57  ;;  %3175 = vmatprep.mubr.bf16.mxu1 %v8249_v33  ;;  %v3618_v6 = vmax.f32 %v3072_v18, %v3362_v63  ;;  %v6664_v33 = vld [vmem:[%s9522_s7 + $0xf4] ss:$8 sps:$4 sm:$0xff]  }
 0x33b   : > { %v2675_v11 = vadd.f32 %v2674_v25, %v8191_v1  ;;  %v8522_v30 = vadd.f32 %v3077_v47, %v7996_v49  ;;  %v2676_v29 = vpop.f32.mrf.mxu1  ;;  %v3079_v19 = vpop.f32.mrf.mxu0  ;;  %4285 = vmatpush1.bf16.msra.mxu1 %v6656_v28 }
 0x33c   : > { %v8527_v37 = vpack.c.bf16 %v3576_v60, %v3572_v61  ;;  %v3577_v24 = vmax.f32 %v2671_v46, %v3321_v15  ;;  %v3619_v57 = vmax.f32 %v3074_v22, %v3363_v13  ;;  %4286 = vmatprep.subr.bf16.mxu1 %v6661_v55  ;;  %v2677_v0 = vadd.f32 %v2676_v29, %v8210_v44  ;;  %v6662_v46 = vld [vmem:[%s9522_s7 + $0xf0] ss:$8 sps:$4 sm:$0xff]  }
 0x33d   : > { %v3324_v18 = vmul.f32 0.2, %v2675_v11  ;;  %v3080_v28 = vadd.f32 %v3079_v19, %v7988_v31  ;;  %v2678_v4 = vpop.f32.mrf.mxu1  ;;  %v3081_v63 = vpop.f32.mrf.mxu0  ;;  %v3810_v55 = vpack.c.bf16 %v3618_v6, %v3614_v21  ;;  %v3366_v35 = vmul.f32 0.2, %v8522_v30 }
 0x33e   : > { %v2679_v25 = vadd.f32 %v2678_v4, %v8191_v1  ;;  %v3082_v53 = vadd.f32 %v3081_v63, %v7996_v49  ;;  %v3811_v50 = vpack.c.bf16 %v3619_v57, %v3615_v45  ;;  %v8539_v22 = vpack.c.bf16 %v3577_v24, %v3573_v56  ;;  %v6667_v56 = vld [vmem:[%s9522_s7 + $0xe4] ss:$8 sps:$4 sm:$0xff]  }
 0x33f   : > { %v3325_v17 = vmul.f32 0.2, %v2677_v0  ;;  %v3367_v47 = vmul.f32 0.2, %v3080_v28  ;;  %v2680_v61 = vpop.f32.mrf.mxu1  ;;  %v3083_v60 = vpop.f32.mrf.mxu0  ;;  %4287 = vmatpush1.bf16.msra.mxu1 %v6659_v7  ;;  %v3580_v24 = vmax.f32 %v2675_v11, %v3324_v18  ;;  %v3622_v4 = vmax.f32 %v8522_v30, %v3366_v35 }
 0x340   : > { %v3328_v15 = vmul.f32 0.2, %v2679_v25  ;;  %v3370_v13 = vmul.f32 0.2, %v3082_v53  ;;  %v2681_v29 = vadd.f32 %v2680_v61, %v8210_v44  ;;  %v3084_v19 = vadd.f32 %v3083_v60, %v7988_v31  ;;  %4807 = vmatprep.mubr.bf16.mxu0 %v3811_v50  ;;  %4288 = vmatprep.subr.bf16.mxu1 %v6664_v33 }
 0x341   : > { %v2684_v6 = vpop.f32.mrf.mxu1  ;;  %v3087_v45 = vpop.f32.mrf.mxu0  ;;  %3176 = vmatmul.mubr.bf16.gmra.mxu1 %v8143_v26  ;;  %v3581_v63 = vmax.f32 %v2677_v0, %v3325_v17  ;;  %v6665_v26 = vld [vmem:[%s9522_s7 + $0xe0] ss:$8 sps:$4 sm:$0xff]   ;;  %v3623_v11 = vmax.f32 %v3080_v28, %v3367_v47 }
 0x342   : > { %v3584_v57 = vmax.f32 %v2679_v25, %v3328_v15  ;;  %v3329_v21 = vmul.f32 0.2, %v2681_v29  ;;  %v3371_v7 = vmul.f32 0.2, %v3084_v19  ;;  %4808 = vmatmul.mubr.bf16.gmra.mxu0 %v3810_v55  ;;  %3185 = vmatprep.mubr.bf16.mxu1 %v8263_v20  ;;  %v3626_v50 = vmax.f32 %v3082_v53, %v3370_v13  ;;  %v6670_v20 = vld [vmem:[%s9522_s7 + $0xd4] ss:$8 sps:$4 sm:$0xff]  }
 0x343   : > { %v2685_v33 = vadd.f32 %v2684_v6, %v8191_v1  ;;  %v2686_v61 = vpop.f32.mrf.mxu1  ;;  %v3089_v60 = vpop.f32.mrf.mxu0  ;;  %4289 = vmatpush2.bf16.msra.mxu1 %v6662_v46  ;;  %v3088_v0 = vadd.f32 %v3087_v45, %v7996_v49  ;;  %v6668_v45 = vld [vmem:[%s9522_s7 + $0xd0] ss:$8 sps:$4 sm:$0xff]  }
 0x344   : > { %v8554_v18 = vpack.c.bf16 %v3584_v57, %v3580_v24  ;;  %v3585_v25 = vmax.f32 %v2681_v29, %v3329_v21  ;;  %v3627_v55 = vmax.f32 %v3084_v19, %v3371_v7  ;;  %4290 = vmatprep.subr.bf16.mxu1 %v6667_v56  ;;  %v2687_v53 = vadd.f32 %v2686_v61, %v8210_v44 }
 0x345   : > { %v3332_v30 = vmul.f32 0.2, %v2685_v33  ;;  %v3090_v46 = vadd.f32 %v3089_v60, %v7988_v31  ;;  %v2688_v35 = vpop.f32.mrf.mxu1  ;;  %v3091_v17 = vpop.f32.mrf.mxu0  ;;  %v3814_v29 = vpack.c.bf16 %v3626_v50, %v3622_v4  ;;  %v6673_v4 = vld [vmem:[%s9522_s7 + $0xc4] ss:$8 sps:$4 sm:$0xff]  }
 0x346   : > { %v2689_v28 = vadd.f32 %v2688_v35, %v8191_v1  ;;  %v3092_v47 = vadd.f32 %v3091_v17, %v7996_v49  ;;  %v3815_v15 = vpack.c.bf16 %v3627_v55, %v3623_v11  ;;  %v8564_v13 = vpack.c.bf16 %v3585_v25, %v3581_v63 }
 0x347   : > { %v3333_v19 = vmul.f32 0.2, %v2687_v53  ;;  %v3375_v56 = vmul.f32 0.2, %v3090_v46  ;;  %v2690_v6 = vpop.f32.mrf.mxu1  ;;  %v3093_v24 = vpop.f32.mrf.mxu0  ;;  %4291 = vmatpush2.bf16.msra.mxu1 %v6665_v26  ;;  %v3374_v63 = vmul.f32 0.2, %v3088_v0  ;;  %v3588_v26 = vmax.f32 %v2685_v33, %v3332_v30 }
 0x348   : > { %v3336_v57 = vmul.f32 0.2, %v2689_v28  ;;  %v3378_v21 = vmul.f32 0.2, %v3092_v47  ;;  %v2691_v7 = vadd.f32 %v2690_v6, %v8210_v44  ;;  %v3094_v61 = vadd.f32 %v3093_v24, %v7988_v31  ;;  %4817 = vmatprep.mubr.bf16.mxu0 %v3815_v15  ;;  %4292 = vmatprep.subr.bf16.mxu1 %v6670_v20 }
 0x349   : > { %v2694_v50 = vpop.f32.mrf.mxu1  ;;  %v3097_v60 = vpop.f32.mrf.mxu0  ;;  %3186 = vmatmul.mubr.bf16.gmra.mxu1 %v8149_v32  ;;  %v3589_v35 = vmax.f32 %v2687_v53, %v3333_v19  ;;  %v6671_v32 = vld [vmem:[%s9522_s7 + $0xc0] ss:$8 sps:$4 sm:$0xff]   ;;  %v3631_v33 = vmax.f32 %v3090_v46, %v3375_v56  ;;  %v3630_v53 = vmax.f32 %v3088_v0, %v3374_v63 }
 0x34a   : > { %v3592_v11 = vmax.f32 %v2689_v28, %v3336_v57  ;;  %v3337_v25 = vmul.f32 0.2, %v2691_v7  ;;  %v3379_v55 = vmul.f32 0.2, %v3094_v61  ;;  %4818 = vmatmul.mubr.bf16.gmra.mxu0 %v3814_v29  ;;  %3195 = vmatprep.mubr.bf16.mxu1 %v8265_v54  ;;  %v3634_v17 = vmax.f32 %v3092_v47, %v3378_v21  ;;  %v6676_v54 = vld [vmem:[%s9522_s7 + $0xb4] ss:$8 sps:$4 sm:$0xff]  }
 0x34b   : > { %v2695_v20 = vadd.f32 %v2694_v50, %v8191_v1  ;;  %v8578_v15 = vadd.f32 %v3097_v60, %v7996_v49  ;;  %v2696_v6 = vpop.f32.mrf.mxu1  ;;  %v3099_v24 = vpop.f32.mrf.mxu0  ;;  %4293 = vmatpush2.bf16.msra.mxu1 %v6668_v45 }
 0x34c   : > { %v8583_v30 = vpack.c.bf16 %v3592_v11, %v3588_v26  ;;  %v3593_v28 = vmax.f32 %v2691_v7, %v3337_v25  ;;  %v3635_v29 = vmax.f32 %v3094_v61, %v3379_v55  ;;  %4294 = vmatprep.subr.bf16.mxu1 %v6673_v4  ;;  %v2697_v19 = vadd.f32 %v2696_v6, %v8210_v44  ;;  %v6674_v7 = vld [vmem:[%s9522_s7 + $0xb0] ss:$8 sps:$4 sm:$0xff]  }
 0x34d   : > { %v3340_v47 = vmul.f32 0.2, %v2695_v20  ;;  %v3100_v45 = vadd.f32 %v3099_v24, %v7988_v31  ;;  %v2698_v57 = vpop.f32.mrf.mxu1  ;;  %v3101_v21 = vpop.f32.mrf.mxu0  ;;  %v3818_v4 = vpack.c.bf16 %v3634_v17, %v3630_v53  ;;  %v3382_v0 = vmul.f32 0.2, %v8578_v15 }
 0x34e   : > { %v2699_v50 = vadd.f32 %v2698_v57, %v8191_v1  ;;  %v3102_v46 = vadd.f32 %v3101_v21, %v7996_v49  ;;  %v3819_v56 = vpack.c.bf16 %v3635_v29, %v3631_v33  ;;  %v8595_v61 = vpack.c.bf16 %v3593_v28, %v3589_v35  ;;  %v6679_v35 = vld [vmem:[%s9522_s7 + $0xa4] ss:$8 sps:$4 sm:$0xff]  }
 0x34f   : > { %v3341_v63 = vmul.f32 0.2, %v2697_v19  ;;  %v3383_v60 = vmul.f32 0.2, %v3100_v45  ;;  %v2700_v26 = vpop.f32.mrf.mxu1  ;;  %v3103_v11 = vpop.f32.mrf.mxu0  ;;  %4295 = vmatpush2.bf16.msra.mxu1 %v6671_v32  ;;  %v3596_v28 = vmax.f32 %v2695_v20, %v3340_v47  ;;  %v3638_v57 = vmax.f32 %v8578_v15, %v3382_v0 }
 0x350   : > { %v3344_v25 = vmul.f32 0.2, %v2699_v50  ;;  %v3386_v55 = vmul.f32 0.2, %v3102_v46  ;;  %v2701_v6 = vadd.f32 %v2700_v26, %v8210_v44  ;;  %v3104_v24 = vadd.f32 %v3103_v11, %v7988_v31  ;;  %4827 = vmatprep.mubr.bf16.mxu0 %v3819_v56  ;;  %4296 = vmatprep.subr.bf16.mxu1 %v6676_v54 }
 0x351   : > { %v2704_v17 = vpop.f32.mrf.mxu1  ;;  %v3107_v33 = vpop.f32.mrf.mxu0  ;;  %3196 = vmatmul.mubr.bf16.gmra.mxu1 %v8151_v58  ;;  %v3597_v21 = vmax.f32 %v2697_v19, %v3341_v63  ;;  %v6677_v58 = vld [vmem:[%s9522_s7 + $0xa0] ss:$8 sps:$4 sm:$0xff]   ;;  %v3639_v20 = vmax.f32 %v3100_v45, %v3383_v60 }
 0x352   : > { %v3600_v29 = vmax.f32 %v2699_v50, %v3344_v25  ;;  %v3345_v53 = vmul.f32 0.2, %v2701_v6  ;;  %v3387_v32 = vmul.f32 0.2, %v3104_v24  ;;  %4828 = vmatmul.mubr.bf16.gmra.mxu0 %v3818_v4  ;;  %3205 = vmatprep.mubr.bf16.mxu1 %v8267_v36  ;;  %v3642_v56 = vmax.f32 %v3102_v46, %v3386_v55  ;;  %v6682_v36 = vld [vmem:[%s9522_s7 + $0x94] ss:$8 sps:$4 sm:$0xff]  }
 0x353   : > { %v2705_v54 = vadd.f32 %v2704_v17, %v8191_v1  ;;  %v2706_v26 = vpop.f32.mrf.mxu1  ;;  %v3109_v11 = vpop.f32.mrf.mxu0  ;;  %4297 = vmatpush2.bf16.msra.mxu1 %v6674_v7  ;;  %v3108_v19 = vadd.f32 %v3107_v33, %v7996_v49  ;;  %v6680_v33 = vld [vmem:[%s9522_s7 + $0x90] ss:$8 sps:$4 sm:$0xff]  }
 0x354   : > { %v8610_v47 = vpack.c.bf16 %v3600_v29, %v3596_v28  ;;  %v3601_v50 = vmax.f32 %v2701_v6, %v3345_v53  ;;  %v3643_v4 = vmax.f32 %v3104_v24, %v3387_v32  ;;  %4298 = vmatprep.subr.bf16.mxu1 %v6679_v35  ;;  %v2707_v46 = vadd.f32 %v2706_v26, %v8210_v44 }
 0x355   : > { %v3348_v15 = vmul.f32 0.2, %v2705_v54  ;;  %v3110_v7 = vadd.f32 %v3109_v11, %v7988_v31  ;;  %v2708_v0 = vpop.f32.mrf.mxu1  ;;  %v3111_v63 = vpop.f32.mrf.mxu0  ;;  %v3822_v6 = vpack.c.bf16 %v3642_v56, %v3638_v57  ;;  %v6685_v57 = vld [vmem:[%s9522_s7 + $0x84] ss:$8 sps:$4 sm:$0xff]  }
 0x356   : > { %9595 = vst [vmem:[#allocation11_spill] sm:$0xff] %v8610_v47  ;;  %v2709_v45 = vadd.f32 %v2708_v0, %v8191_v1  ;;  %v3112_v60 = vadd.f32 %v3111_v63, %v7996_v49  ;;  %v3823_v25 = vpack.c.bf16 %v3643_v4, %v3639_v20  ;;  %v8620_v55 = vpack.c.bf16 %v3601_v50, %v3597_v21 }
 0x357   : > { %v3349_v24 = vmul.f32 0.2, %v2707_v46  ;;  %v3391_v35 = vmul.f32 0.2, %v3110_v7  ;;  %v2710_v17 = vpop.f32.mrf.mxu1  ;;  %v3113_v28 = vpop.f32.mrf.mxu0  ;;  %4299 = vmatpush2.bf16.msra.mxu1 %v6677_v58  ;;  %v3390_v21 = vmul.f32 0.2, %v3108_v19  ;;  %v3604_v58 = vmax.f32 %v2705_v54, %v3348_v15 }
 0x358   : > { %v3352_v29 = vmul.f32 0.2, %v2709_v45  ;;  %v3394_v53 = vmul.f32 0.2, %v3112_v60  ;;  %v2711_v32 = vadd.f32 %v2710_v17, %v8210_v44  ;;  %v3114_v26 = vadd.f32 %v3113_v28, %v7988_v31  ;;  %4837 = vmatprep.mubr.bf16.mxu0 %v3823_v25  ;;  %4300 = vmatprep.subr.bf16.mxu1 %v6682_v36 }
 0x359   : > { %v2714_v56 = vpop.f32.mrf.mxu1  ;;  %v3117_v11 = vpop.f32.mrf.mxu0  ;;  %3206 = vmatmul.mubr.bf16.gmra.mxu1 %v8154_v34  ;;  %v3605_v0 = vmax.f32 %v2707_v46, %v3349_v24  ;;  %v6683_v34 = vld [vmem:[%s9522_s7 + $0x80] ss:$8 sps:$4 sm:$0xff]   ;;  %v3647_v54 = vmax.f32 %v3110_v7, %v3391_v35 }
 0x35a   : > { %v3608_v20 = vmax.f32 %v2709_v45, %v3352_v29  ;;  %v3353_v50 = vmul.f32 0.2, %v2711_v32  ;;  %v3395_v4 = vmul.f32 0.2, %v3114_v26  ;;  %4838 = vmatmul.mubr.bf16.gmra.mxu0 %v3822_v6  ;;  %3215 = vmatprep.mubr.bf16.mxu1 %v8365_v14  ;;  %v3650_v63 = vmax.f32 %v3112_v60, %v3394_v53 }
 0x35b   : > { %v2715_v36 = vadd.f32 %v2714_v56, %v8191_v1  ;;  %v3118_v25 = vadd.f32 %v3117_v11, %v7996_v49  ;;  %v2716_v17 = vpop.f32.mrf.mxu1  ;;  %v3119_v28 = vpop.f32.mrf.mxu0  ;;  %4301 = vmatpush2.bf16.msra.mxu1 %v6680_v33  ;;  %v3646_v14 = vmax.f32 %v3108_v19, %v3390_v21 }
 0x35c   : > { %v8637_v15 = vpack.c.bf16 %v3608_v20, %v3604_v58  ;;  %v3609_v45 = vmax.f32 %v2711_v32, %v3353_v50  ;;  %v3651_v6 = vmax.f32 %v3114_v26, %v3395_v4  ;;  %4302 = vmatprep.subr.bf16.mxu1 %v6685_v57  ;;  %v2717_v60 = vadd.f32 %v2716_v17, %v8210_v44 }
 0x35d   : > { %v3356_v46 = vmul.f32 0.2, %v2715_v36  ;;  %v3120_v24 = vadd.f32 %v3119_v28, %v7988_v31  ;;  %v2718_v29 = vpop.f32.mrf.mxu1  ;;  %v3121_v53 = vpop.f32.mrf.mxu0  ;;  %v3826_v7 = vpack.c.bf16 %v3650_v63, %v3646_v14  ;;  %v3398_v35 = vmul.f32 0.2, %v3118_v25 }
 0x35e   : > { %9596 = vst [vmem:[#allocation10_spill] sm:$0xff] %v8637_v15  ;;  %v2719_v33 = vadd.f32 %v2718_v29, %v8191_v1  ;;  %v3122_v56 = vadd.f32 %v3121_v53, %v7996_v49  ;;  %v3827_v11 = vpack.c.bf16 %v3651_v6, %v3647_v54  ;;  %v8643_v47 = vpack.c.bf16 %v3609_v45, %v3605_v0 }
 0x35f   : > { %v3357_v32 = vmul.f32 0.2, %v2717_v60  ;;  %v3399_v26 = vmul.f32 0.2, %v3120_v24  ;;  %v2720_v57 = vpop.f32.mrf.mxu1  ;;  %v3123_v19 = vpop.f32.mrf.mxu0  ;;  %4303 = vmatpush2.bf16.msra.mxu1 %v6683_v34  ;;  %v3612_v0 = vmax.f32 %v2715_v36, %v3356_v46  ;;  %v3654_v45 = vmax.f32 %v3118_v25, %v3398_v35 }
 0x360   : > { %v3360_v21 = vmul.f32 0.2, %v2719_v33  ;;  %v3402_v58 = vmul.f32 0.2, %v3122_v56  ;;  %v2721_v20 = vadd.f32 %v2720_v57, %v8210_v44  ;;  %v3124_v50 = vadd.f32 %v3123_v19, %v7988_v31  ;;  %4847 = vmatprep.mubr.bf16.mxu0 %v3827_v11 }
 0x361   : > { %v2724_v4 = vpop.f32.mrf.mxu1  ;;  %v3127_v17 = vpop.f32.mrf.mxu0  ;;  %3216 = vmatmul.mubr.bf16.gmra.mxu1 %v8184_v2  ;;  %v3613_v34 = vmax.f32 %v2717_v60, %v3357_v32  ;;  %v3655_v57 = vmax.f32 %v3120_v24, %v3399_v26 }
 0x362   : > { %v3616_v28 = vmax.f32 %v2719_v33, %v3360_v21  ;;  %v3361_v63 = vmul.f32 0.2, %v2721_v20  ;;  %v3403_v54 = vmul.f32 0.2, %v3124_v50  ;;  %4848 = vmatmul.mubr.bf16.gmra.mxu0 %v3826_v7  ;;  %3225 = vmatprep.mubr.bf16.mxu1 %v8388_v27  ;;  %v3658_v6 = vmax.f32 %v3122_v56, %v3402_v58 }
 0x363   : > { %v2725_v14 = vadd.f32 %v2724_v4, %v8191_v1  ;;  %v2726_v29 = vpop.f32.mrf.mxu1  ;;  %v3129_v53 = vpop.f32.mrf.mxu0  ;;  %v3128_v36 = vadd.f32 %v3127_v17, %v7996_v49 }
 0x364   : > { %v8650_v11 = vpack.c.bf16 %v3616_v28, %v3612_v0  ;;  %v3617_v19 = vmax.f32 %v2721_v20, %v3361_v63  ;;  %v3659_v15 = vmax.f32 %v3124_v50, %v3403_v54  ;;  %v2727_v46 = vadd.f32 %v2726_v29, %v8210_v44 }
 0x365   : > { %v3364_v2 = vmul.f32 0.2, %v2725_v14  ;;  %v3130_v33 = vadd.f32 %v3129_v53, %v7988_v31  ;;  %v2728_v27 = vpop.f32.mrf.mxu1  ;;  %v3131_v25 = vpop.f32.mrf.mxu0  ;;  %v3830_v24 = vpack.c.bf16 %v3658_v6, %v3654_v45  ;;  %v3406_v0 = vmul.f32 0.2, %v3128_v36 }
 0x366   : > { %v2729_v60 = vadd.f32 %v2728_v27, %v8191_v1  ;;  %v3132_v56 = vadd.f32 %v3131_v25, %v7996_v49  ;;  %v3831_v7 = vpack.c.bf16 %v3659_v15, %v3655_v57  ;;  %v8657_v35 = vpack.c.bf16 %v3617_v19, %v3613_v34 }
 0x367   : > { %v3365_v32 = vmul.f32 0.2, %v2727_v46  ;;  %v3407_v26 = vmul.f32 0.2, %v3130_v33  ;;  %v2730_v21 = vpop.f32.mrf.mxu1  ;;  %v3133_v58 = vpop.f32.mrf.mxu0  ;;  %v3620_v63 = vmax.f32 %v2725_v14, %v3364_v2 }
 0x368   : > { %v3368_v20 = vmul.f32 0.2, %v2729_v60  ;;  %v3410_v50 = vmul.f32 0.2, %v3132_v56  ;;  %v2731_v4 = vadd.f32 %v2730_v21, %v8210_v44  ;;  %v3134_v17 = vadd.f32 %v3133_v58, %v7988_v31  ;;  %4857 = vmatprep.mubr.bf16.mxu0 %v3831_v7 }
 0x369   : > { %v2734_v28 = vpop.f32.mrf.mxu1  ;;  %3226 = vmatmul.mubr.bf16.gmra.mxu1 %v8408_v9  ;;  %v3621_v45 = vmax.f32 %v2727_v46, %v3365_v32  ;;  %v3663_v6 = vmax.f32 %v3130_v33, %v3407_v26  ;;  %v3662_v7 = vmax.f32 %v3128_v36, %v3406_v0 }
 0x36a   : > { %v3624_v15 = vmax.f32 %v2729_v60, %v3368_v20  ;;  %v3369_v54 = vmul.f32 0.2, %v2731_v4  ;;  %v3411_v34 = vmul.f32 0.2, %v3134_v17  ;;  %4858 = vmatmul.mubr.bf16.gmra.mxu0 %v3830_v24  ;;  %4304 = vmatprep.mubr.bf16.mxu1 %v8281_v59  ;;  %v2735_v29 = vadd.f32 %v2734_v28, %v8191_v1 }
 0x36b   : > { %v2736_v53 = vpop.f32.mrf.mxu1  ;;  %v3666_v19 = vmax.f32 %v3132_v56, %v3410_v50 }
 0x36c   : > { %v8664_v57 = vpack.c.bf16 %v3624_v15, %v3620_v63  ;;  %v3625_v27 = vmax.f32 %v2731_v4, %v3369_v54  ;;  %v3667_v25 = vmax.f32 %v3134_v17, %v3411_v34  ;;  %v2737_v9 = vadd.f32 %v2736_v53, %v8210_v44 }
 0x36d   : > { %v2738_v14 = vpop.f32.mrf.mxu1  ;;  %v3372_v2 = vmul.f32 0.2, %v2735_v29  ;;  %v3834_v46 = vpack.c.bf16 %v3666_v19, %v3662_v7 }
 0x36e   : > { %v2739_v60 = vadd.f32 %v2738_v14, %v8191_v1  ;;  %v3835_v24 = vpack.c.bf16 %v3667_v25, %v3663_v6  ;;  %v8668_v21 = vpack.c.bf16 %v3625_v27, %v3621_v45  ;;  %v3373_v33 = vmul.f32 0.2, %v2737_v9 }
 0x36f   : > { %v2740_v59 = vpop.f32.mrf.mxu1  ;;  %v3628_v36 = vmax.f32 %v2735_v29, %v3372_v2 }
 0x370   : > { %v3376_v32 = vmul.f32 0.2, %v2739_v60  ;;  %v2741_v26 = vadd.f32 %v2740_v59, %v8210_v44  ;;  %4867 = vmatprep.mubr.bf16.mxu0 %v3835_v24  ;;  %v3629_v17 = vmax.f32 %v2737_v9, %v3373_v33  ;;  %v9597_v9 = vld [vmem:[#allocation8_spill] sm:$0xff] }
 0x371   : > { %v2744_v56 = vpop.f32.mrf.mxu1  ;;  %4305 = vmatmul.mubr.bf16.vlgmr.msra.gmra.mxu1 %v8274_v43 }
 0x372   : > { %v3632_v58 = vmax.f32 %v2739_v60, %v3376_v32  ;;  %v3377_v20 = vmul.f32 0.2, %v2741_v26  ;;  %v2745_v50 = vadd.f32 %v2744_v56, %v8191_v1  ;;  %4868 = vmatmul.mubr.bf16.gmra.mxu0 %v3834_v46  ;;  %4314 = vmatprep.mubr.bf16.mxu1 %v8310_v10 }
 0x373   : > { %v2746_v4 = vpop.f32.mrf.mxu1 }
 0x374   : > { %v8674_v0 = vpack.c.bf16 %v3632_v58, %v3628_v36  ;;  %v3633_v28 = vmax.f32 %v2741_v26, %v3377_v20  ;;  %v2747_v63 = vadd.f32 %v2746_v4, %v8210_v44  ;;  %v3380_v54 = vmul.f32 0.2, %v2745_v50 }
 0x375   : > { %v2748_v15 = vpop.f32.mrf.mxu1 }
 0x376   : > { %v2749_v34 = vadd.f32 %v2748_v15, %v8191_v1  ;;  %v8678_v43 = vpack.c.bf16 %v3633_v28, %v3629_v17  ;;  %v3381_v6 = vmul.f32 0.2, %v2747_v63  ;;  %v3636_v10 = vmax.f32 %v2745_v50, %v3380_v54  ;;  %v9598_v50 = vld [vmem:[#allocation9_spill] sm:$0xff] }
 0x377   : > { %v2750_v45 = vpop.f32.mrf.mxu1 }
 0x378   : > { %v3384_v29 = vmul.f32 0.2, %v2749_v34  ;;  %v2751_v53 = vadd.f32 %v2750_v45, %v8210_v44  ;;  %v3637_v2 = vmax.f32 %v2747_v63, %v3381_v6 }
 0x379   : > { %v2754_v19 = vpop.f32.mrf.mxu1  ;;  %4315 = vmatmul.mubr.bf16.gmra.mxu1 %v8303_v16 }
 0x37a   : > { %v3640_v27 = vmax.f32 %v2749_v34, %v3384_v29  ;;  %v3385_v25 = vmul.f32 0.2, %v2751_v53  ;;  %v2755_v7 = vadd.f32 %v2754_v19, %v8191_v1  ;;  %4324 = vmatprep.mubr.bf16.mxu1 %v9597_v9 }
 0x37b   : > { %v2756_v14 = vpop.f32.mrf.mxu1 }
 0x37c   : > { %v8684_v60 = vpack.c.bf16 %v3640_v27, %v3636_v10  ;;  %v3641_v24 = vmax.f32 %v2751_v53, %v3385_v25  ;;  %v2757_v59 = vadd.f32 %v2756_v14, %v8210_v44  ;;  %v3388_v33 = vmul.f32 0.2, %v2755_v7 }
 0x37d   : > { %v2758_v46 = vpop.f32.mrf.mxu1 }
 0x37e   : > { %v2759_v32 = vadd.f32 %v2758_v46, %v8191_v1  ;;  %v8688_v26 = vpack.c.bf16 %v3641_v24, %v3637_v2  ;;  %v3389_v56 = vmul.f32 0.2, %v2757_v59  ;;  %v3644_v4 = vmax.f32 %v2755_v7, %v3388_v33 }
 0x37f   : > { %v2760_v16 = vpop.f32.mrf.mxu1 }
 0x380   : > { %v3392_v36 = vmul.f32 0.2, %v2759_v32  ;;  %v2761_v58 = vadd.f32 %v2760_v16, %v8210_v44  ;;  %v3645_v54 = vmax.f32 %v2757_v59, %v3389_v56 }
 0x381   : > { %v2764_v20 = vpop.f32.mrf.mxu1  ;;  %4325 = vmatmul.mubr.bf16.gmra.mxu1 %v9598_v50 }
 0x382   : > { %v3648_v17 = vmax.f32 %v2759_v32, %v3392_v36  ;;  %v3393_v28 = vmul.f32 0.2, %v2761_v58  ;;  %v2765_v63 = vadd.f32 %v2764_v20, %v8191_v1  ;;  %4334 = vmatprep.mubr.bf16.mxu1 %v8363_v8 }
 0x383   : > { %v2766_v15 = vpop.f32.mrf.mxu1 }
 0x384   : > { %v8694_v34 = vpack.c.bf16 %v3648_v17, %v3644_v4  ;;  %v3649_v45 = vmax.f32 %v2761_v58, %v3393_v28  ;;  %v2767_v6 = vadd.f32 %v2766_v15, %v8210_v44  ;;  %v3396_v53 = vmul.f32 0.2, %v2765_v63 }
 0x385   : > { %v2768_v29 = vpop.f32.mrf.mxu1 }
 0x386   : > { %v2769_v19 = vadd.f32 %v2768_v29, %v8191_v1  ;;  %v8698_v10 = vpack.c.bf16 %v3649_v45, %v3645_v54  ;;  %v3397_v25 = vmul.f32 0.2, %v2767_v6  ;;  %v3652_v2 = vmax.f32 %v2765_v63, %v3396_v53 }
 0x387   : > { %v2770_v27 = vpop.f32.mrf.mxu1 }
 0x388   : > { %v3400_v7 = vmul.f32 0.2, %v2769_v19  ;;  %v2771_v9 = vadd.f32 %v2770_v27, %v8210_v44  ;;  %v3653_v16 = vmax.f32 %v2767_v6, %v3397_v25 }
 0x389   : > { %v2774_v14 = vpop.f32.mrf.mxu1  ;;  %4335 = vmatmul.mubr.bf16.gmra.mxu1 %v8357_v39  ;;  %v8702_v8 = vpop.f32.mrf.mxu0 }
 0x38a   : > { %v3656_v24 = vmax.f32 %v2769_v19, %v3400_v7  ;;  %v3401_v59 = vmul.f32 0.2, %v2771_v9  ;;  %v2775_v46 = vadd.f32 %v2774_v14, %v8191_v1  ;;  %4344 = vmatprep.mubr.bf16.mxu1 %v8386_v42 }
 0x38b   : > { %v2776_v33 = vpop.f32.mrf.mxu1  ;;  %v8706_v32 = vpop.f32.mrf.mxu0 }
 0x38c   : > { %v8708_v56 = vpack.c.bf16 %v3656_v24, %v3652_v2  ;;  %v3657_v36 = vmax.f32 %v2771_v9, %v3401_v59  ;;  %v2777_v58 = vadd.f32 %v2776_v33, %v8210_v44  ;;  %v3404_v50 = vmul.f32 0.2, %v2775_v46 }
 0x38d   : > { %v2778_v20 = vpop.f32.mrf.mxu1  ;;  %v8711_v39 = vpop.f32.mrf.mxu0 }
 0x38e   : > { %v2779_v4 = vadd.f32 %v2778_v20, %v8191_v1  ;;  %v8714_v17 = vpack.c.bf16 %v3657_v36, %v3653_v16  ;;  %v3405_v42 = vmul.f32 0.2, %v2777_v58  ;;  %v3660_v6 = vmax.f32 %v2775_v46, %v3404_v50 }
 0x38f   : > { %v2780_v28 = vpop.f32.mrf.mxu1  ;;  %v8716_v63 = vpop.f32.mrf.mxu0 }
 0x390   : > { %v3408_v15 = vmul.f32 0.2, %v2779_v4  ;;  %v2781_v54 = vadd.f32 %v2780_v28, %v8210_v44  ;;  %v3661_v7 = vmax.f32 %v2777_v58, %v3405_v42 }
 0x391   : > { %v2784_v45 = vpop.f32.mrf.mxu1  ;;  %4345 = vmatmul.mubr.bf16.gmra.mxu1 %v8380_v52  ;;  %v8721_v27 = vpop.f32.mrf.mxu0 }
 0x392   : > { %v3664_v29 = vmax.f32 %v2779_v4, %v3408_v15  ;;  %v3409_v53 = vmul.f32 0.2, %v2781_v54  ;;  %v2785_v19 = vadd.f32 %v2784_v45, %v8191_v1  ;;  %4354 = vmatprep.mubr.bf16.mxu1 %v8406_v62 }
 0x393   : > { %v2786_v25 = vpop.f32.mrf.mxu1  ;;  %v8727_v24 = vpop.f32.mrf.mxu0 }
 0x394   : > { %v8724_v9 = vpack.c.bf16 %v3664_v29, %v3660_v6  ;;  %v3665_v14 = vmax.f32 %v2781_v54, %v3409_v53  ;;  %v2787_v2 = vadd.f32 %v2786_v25, %v8210_v44  ;;  %v3412_v52 = vmul.f32 0.2, %v2785_v19 }
 0x395   : > { %v2788_v59 = vpop.f32.mrf.mxu1  ;;  %v8730_v33 = vpop.f32.mrf.mxu0 }
 0x396   : > { %v2789_v46 = vadd.f32 %v2788_v59, %v8191_v1  ;;  %v8732_v16 = vpack.c.bf16 %v3665_v14, %v3661_v7  ;;  %v3413_v20 = vmul.f32 0.2, %v2787_v2  ;;  %v3668_v28 = vmax.f32 %v2785_v19, %v3412_v52 }
 0x397   : > { %v2790_v36 = vpop.f32.mrf.mxu1  ;;  %v8735_v50 = vpop.f32.mrf.mxu0 }
 0x398   : > { %v3416_v62 = vmul.f32 0.2, %v2789_v46  ;;  %v2791_v58 = vadd.f32 %v2790_v36, %v8210_v44  ;;  %v3669_v29 = vmax.f32 %v2787_v2, %v3413_v20 }
 0x399   : > { %v2794_v4 = vpop.f32.mrf.mxu1  ;;  %4355 = vmatmul.mubr.bf16.gmra.mxu1 %v8400_v3  ;;  %v8739_v45 = vpop.f32.mrf.mxu0 }
 0x39a   : > { %v3672_v42 = vmax.f32 %v2789_v46, %v3416_v62  ;;  %v3417_v15 = vmul.f32 0.2, %v2791_v58  ;;  %v2795_v54 = vadd.f32 %v2794_v4, %v8191_v1  ;;  %4364 = vmatprep.mubr.bf16.mxu1 %v8428_v41 }
 0x39b   : > { %v2796_v6 = vpop.f32.mrf.mxu1  ;;  %v8745_v14 = vpop.f32.mrf.mxu0 }
 0x39c   : > { %v8742_v53 = vpack.c.bf16 %v3672_v42, %v3668_v28  ;;  %v3673_v25 = vmax.f32 %v2791_v58, %v3417_v15  ;;  %v2797_v7 = vadd.f32 %v2796_v6, %v8210_v44  ;;  %9599 = vst [vmem:[#allocation13_spill] sm:$0xff] %v8745_v14  ;;  %v3420_v3 = vmul.f32 0.2, %v2795_v54 }
 0x39d   : > { %v2798_v59 = vpop.f32.mrf.mxu1  ;;  %v8748_v52 = vpop.f32.mrf.mxu0 }
 0x39e   : > { %v2799_v19 = vadd.f32 %v2798_v59, %v8191_v1  ;;  %9600 = vst [vmem:[#allocation12_spill] sm:$0xff] %v8748_v52  ;;  %v8750_v46 = vpack.c.bf16 %v3673_v25, %v3669_v29  ;;  %v3421_v62 = vmul.f32 0.2, %v2797_v7  ;;  %v3676_v4 = vmax.f32 %v2795_v54, %v3420_v3 }
 0x39f   : > { %v2800_v36 = vpop.f32.mrf.mxu1  ;;  %v8753_v20 = vpop.f32.mrf.mxu0 }
 0x3a0   : > { %v3424_v41 = vmul.f32 0.2, %v2799_v19  ;;  %v2801_v2 = vadd.f32 %v2800_v36, %v8210_v44  ;;  %9601 = vst [vmem:[#allocation15_spill] sm:$0xff] %v8753_v20  ;;  %v3677_v25 = vmax.f32 %v2797_v7, %v3421_v62 }
 0x3a1   : > { %v2804_v58 = vpop.f32.mrf.mxu1  ;;  %4365 = vmatmul.mubr.bf16.gmra.mxu1 %v8418_v5  ;;  %v8757_v6 = vpop.f32.mrf.mxu0 }
 0x3a2   : > { %v3680_v28 = vmax.f32 %v2799_v19, %v3424_v41  ;;  %v3425_v42 = vmul.f32 0.2, %v2801_v2  ;;  %v2805_v15 = vadd.f32 %v2804_v58, %v8191_v1  ;;  %9602 = vst [vmem:[#allocation14_spill] sm:$0xff] %v8757_v6  ;;  %4374 = vmatprep.mubr.bf16.mxu1 %v8452_v48 }
 0x3a3   : > { %v2806_v29 = vpop.f32.mrf.mxu1  ;;  %v8763_v20 = vpop.f32.mrf.mxu0 }
 0x3a4   : > { %v8760_v59 = vpack.c.bf16 %v3680_v28, %v3676_v4  ;;  %v3681_v52 = vmax.f32 %v2801_v2, %v3425_v42  ;;  %v2807_v36 = vadd.f32 %v2806_v29, %v8210_v44  ;;  %9603 = vst [vmem:[#allocation17_spill] sm:$0xff] %v8763_v20  ;;  %v3428_v5 = vmul.f32 0.2, %v2805_v15 }
 0x3a5   : > { %v2808_v14 = vpop.f32.mrf.mxu1  ;;  %v8766_v3 = vpop.f32.mrf.mxu0 }
 0x3a6   : > { %v2809_v54 = vadd.f32 %v2808_v14, %v8191_v1  ;;  %9604 = vst [vmem:[#allocation16_spill] sm:$0xff] %v8766_v3  ;;  %v8768_v19 = vpack.c.bf16 %v3681_v52, %v3677_v25  ;;  %v3429_v58 = vmul.f32 0.2, %v2807_v36  ;;  %v3684_v4 = vmax.f32 %v2805_v15, %v3428_v5 }
 0x3a7   : > { %v2810_v41 = vpop.f32.mrf.mxu1  ;;  %v8771_v62 = vpop.f32.mrf.mxu0 }
 0x3a8   : > { %v3432_v48 = vmul.f32 0.2, %v2809_v54  ;;  %v2811_v7 = vadd.f32 %v2810_v41, %v8210_v44  ;;  %9605 = vst [vmem:[#allocation19_spill] sm:$0xff] %v8771_v62  ;;  %v3685_v25 = vmax.f32 %v2807_v36, %v3429_v58 }
 0x3a9   : > { %v2814_v2 = vpop.f32.mrf.mxu1  ;;  %4375 = vmatmul.mubr.bf16.gmra.mxu1 %v8445_v40  ;;  %v8775_v14 = vpop.f32.mrf.mxu0 }
 0x3aa   : > { %v3688_v28 = vmax.f32 %v2809_v54, %v3432_v48  ;;  %v3433_v42 = vmul.f32 0.2, %v2811_v7  ;;  %v2815_v29 = vadd.f32 %v2814_v2, %v8191_v1  ;;  %9606 = vst [vmem:[#allocation21_spill] sm:$0xff] %v8775_v14  ;;  %4384 = vmatprep.mubr.bf16.mxu1 %v8483_v12 }
 0x3ab   : > { %v2816_v52 = vpop.f32.mrf.mxu1  ;;  %v8781_v62 = vpop.f32.mrf.mxu0 }
 0x3ac   : > { %v8778_v3 = vpack.c.bf16 %v3688_v28, %v3684_v4  ;;  %v3689_v20 = vmax.f32 %v2811_v7, %v3433_v42  ;;  %v2817_v41 = vadd.f32 %v2816_v52, %v8210_v44  ;;  %9607 = vst [vmem:[#allocation23_spill] sm:$0xff] %v8781_v62  ;;  %v3436_v40 = vmul.f32 0.2, %v2815_v29 }
 0x3ad   : > { %v2818_v6 = vpop.f32.mrf.mxu1  ;;  %v8784_v5 = vpop.f32.mrf.mxu0 }
 0x3ae   : > { %v2819_v15 = vadd.f32 %v2818_v6, %v8191_v1  ;;  %9608 = vst [vmem:[#allocation18_spill] sm:$0xff] %v8784_v5  ;;  %v8786_v54 = vpack.c.bf16 %v3689_v20, %v3685_v25  ;;  %v3437_v2 = vmul.f32 0.2, %v2817_v41  ;;  %v3692_v4 = vmax.f32 %v2815_v29, %v3436_v40 }
 0x3af   : > { %v2820_v48 = vpop.f32.mrf.mxu1  ;;  %v8789_v58 = vpop.f32.mrf.mxu0 }
 0x3b0   : > { %v3440_v12 = vmul.f32 0.2, %v2819_v15  ;;  %v2821_v36 = vadd.f32 %v2820_v48, %v8210_v44  ;;  %9609 = vst [vmem:[#allocation5_spill] sm:$0xff] %v8789_v58  ;;  %v3693_v25 = vmax.f32 %v2817_v41, %v3437_v2 }
 0x3b1   : > { %v2824_v7 = vpop.f32.mrf.mxu1  ;;  %4385 = vmatmul.mubr.bf16.gmra.mxu1 %v8471_v38 }
 0x3b2   : > { %v3696_v28 = vmax.f32 %v2819_v15, %v3440_v12  ;;  %v3441_v42 = vmul.f32 0.2, %v2821_v36  ;;  %v2825_v52 = vadd.f32 %v2824_v7, %v8191_v1  ;;  %v8793_v6 = vpop.f32.mrf.mxu0  ;;  %4394 = vmatprep.mubr.bf16.mxu1 %v8508_v23 }
 0x3b3   : > { %9610 = vst [vmem:[#allocation20_spill] sm:$0xff] %v8793_v6  ;;  %v2826_v20 = vpop.f32.mrf.mxu1 }
 0x3b4   : > { %v8796_v5 = vpack.c.bf16 %v3696_v28, %v3692_v4  ;;  %v3697_v62 = vmax.f32 %v2821_v36, %v3441_v42  ;;  %v2827_v48 = vadd.f32 %v2826_v20, %v8210_v44  ;;  %v8799_v58 = vpop.f32.mrf.mxu0  ;;  %v3444_v38 = vmul.f32 0.2, %v2825_v52 }
 0x3b5   : > { %9611 = vst [vmem:[#allocation22_spill] sm:$0xff] %v8799_v58  ;;  %v2828_v14 = vpop.f32.mrf.mxu1 }
 0x3b6   : > { %v2829_v29 = vadd.f32 %v2828_v14, %v8191_v1  ;;  %v8802_v40 = vpop.f32.mrf.mxu0  ;;  %v8804_v15 = vpack.c.bf16 %v3697_v62, %v3693_v25  ;;  %v3445_v7 = vmul.f32 0.2, %v2827_v48  ;;  %v3700_v4 = vmax.f32 %v2825_v52, %v3444_v38 }
 0x3b7   : > { %9612 = vst [vmem:[#allocation24_spill] sm:$0xff] %v8802_v40  ;;  %v2830_v12 = vpop.f32.mrf.mxu1 }
 0x3b8   : > { %v3448_v23 = vmul.f32 0.2, %v2829_v29  ;;  %v2831_v41 = vadd.f32 %v2830_v12, %v8210_v44  ;;  %v8807_v2 = vpop.f32.mrf.mxu0  ;;  %v3701_v25 = vmax.f32 %v2827_v48, %v3445_v7 }
 0x3b9   : > { %9613 = vst [vmem:[#allocation25_spill] sm:$0xff] %v8807_v2  ;;  %v2834_v36 = vpop.f32.mrf.mxu1  ;;  %4395 = vmatmul.mubr.bf16.gmra.mxu1 %v8498_v51 }
 0x3ba   : > { %v3704_v28 = vmax.f32 %v2829_v29, %v3448_v23  ;;  %v3449_v42 = vmul.f32 0.2, %v2831_v41  ;;  %v2835_v20 = vadd.f32 %v2834_v36, %v8191_v1  ;;  %v8811_v14 = vpop.f32.mrf.mxu0  ;;  %4404 = vmatprep.mubr.bf16.mxu1 %v8539_v22 }
 0x3bb   : > { %9614 = vst [vmem:[#allocation26_spill] sm:$0xff] %v8811_v14  ;;  %v2836_v62 = vpop.f32.mrf.mxu1 }
 0x3bc   : > { %v8814_v40 = vpack.c.bf16 %v3704_v28, %v3700_v4  ;;  %v3705_v58 = vmax.f32 %v2831_v41, %v3449_v42  ;;  %v2837_v12 = vadd.f32 %v2836_v62, %v8210_v44  ;;  %v8817_v2 = vpop.f32.mrf.mxu0  ;;  %v3452_v51 = vmul.f32 0.2, %v2835_v20 }
 0x3bd   : > { %9615 = vst [vmem:[#allocation27_spill] sm:$0xff] %v8817_v2  ;;  %v2838_v6 = vpop.f32.mrf.mxu1 }
 0x3be   : > { %v2839_v52 = vadd.f32 %v2838_v6, %v8191_v1  ;;  %v8820_v38 = vpop.f32.mrf.mxu0  ;;  %v8822_v29 = vpack.c.bf16 %v3705_v58, %v3701_v25  ;;  %v3453_v36 = vmul.f32 0.2, %v2837_v12  ;;  %v3708_v4 = vmax.f32 %v2835_v20, %v3452_v51 }
 0x3bf   : > { %9616 = vst [vmem:[#allocation28_spill] sm:$0xff] %v8820_v38  ;;  %v2840_v23 = vpop.f32.mrf.mxu1 }
 0x3c0   : > { %v3456_v22 = vmul.f32 0.2, %v2839_v52  ;;  %v2841_v48 = vadd.f32 %v2840_v23, %v8210_v44  ;;  %v8825_v7 = vpop.f32.mrf.mxu0  ;;  %v3709_v25 = vmax.f32 %v2837_v12, %v3453_v36 }
 0x3c1   : > { %9617 = vst [vmem:[#allocation29_spill] sm:$0xff] %v8825_v7  ;;  %v2844_v41 = vpop.f32.mrf.mxu1  ;;  %4405 = vmatmul.mubr.bf16.gmra.mxu1 %v8527_v37 }
 0x3c2   : > { %v3712_v28 = vmax.f32 %v2839_v52, %v3456_v22  ;;  %v3457_v42 = vmul.f32 0.2, %v2841_v48  ;;  %v2845_v62 = vadd.f32 %v2844_v41, %v8191_v1  ;;  %4414 = vmatprep.mubr.bf16.mxu1 %v8564_v13  ;;  %v8830_v6 = vpop.f32.mrf.mxu0 }
 0x3c3   : > { %9618 = vst [vmem:[#allocation31_spill] sm:$0xff] %v8830_v6  ;;  %v2846_v58 = vpop.f32.mrf.mxu1 }
 0x3c4   : > { %v8832_v38 = vpack.c.bf16 %v3712_v28, %v3708_v4  ;;  %v3713_v2 = vmax.f32 %v2841_v48, %v3457_v42  ;;  %v2847_v23 = vadd.f32 %v2846_v58, %v8210_v44  ;;  %v3460_v14 = vmul.f32 0.2, %v2845_v62  ;;  %v8838_v51 = vpop.f32.mrf.mxu0 }
 0x3c5   : > { %v2848_v7 = vpop.f32.mrf.mxu1  ;;  %9619 = vst [vmem:[#allocation30_spill] sm:$0xff] %v8838_v51 }
 0x3c6   : > { %v2849_v37 = vadd.f32 %v2848_v7, %v8191_v1  ;;  %v8836_v20 = vpack.c.bf16 %v3713_v2, %v3709_v25  ;;  %v3461_v22 = vmul.f32 0.2, %v2847_v23  ;;  %v3716_v12 = vmax.f32 %v2845_v62, %v3460_v14  ;;  %v8844_v7 = vpop.f32.mrf.mxu0 }
 0x3c7   : > { %v2850_v52 = vpop.f32.mrf.mxu1  ;;  %9620 = vst [vmem:[#allocation32_spill] sm:$0xff] %v8844_v7 }
 0x3c8   : > { %v3464_v13 = vmul.f32 0.2, %v2849_v37  ;;  %v2851_v41 = vadd.f32 %v2850_v52, %v8210_v44  ;;  %v3717_v28 = vmax.f32 %v2847_v23, %v3461_v22  ;;  %v8852_v62 = vpop.f32.mrf.mxu0 }
 0x3c9   : > { %v2854_v6 = vpop.f32.mrf.mxu1  ;;  %4415 = vmatmul.mubr.bf16.gmra.mxu1 %v8554_v18  ;;  %9621 = vst [vmem:[#allocation33_spill] sm:$0xff] %v8852_v62 }
 0x3ca   : > { %v3720_v36 = vmax.f32 %v2849_v37, %v3464_v13  ;;  %v3465_v48 = vmul.f32 0.2, %v2851_v41  ;;  %v2855_v4 = vadd.f32 %v2854_v6, %v8191_v1  ;;  %4424 = vmatprep.mubr.bf16.mxu1 %v8595_v61 }
 0x3cb   : > { %v2856_v2 = vpop.f32.mrf.mxu1 }
 0x3cc   : > { %v8846_v42 = vpack.c.bf16 %v3720_v36, %v3716_v12  ;;  %v3721_v58 = vmax.f32 %v2851_v41, %v3465_v48  ;;  %v2857_v25 = vadd.f32 %v2856_v2, %v8210_v44  ;;  %v3468_v51 = vmul.f32 0.2, %v2855_v4  ;;  %v8858_v36 = vpop.f32.mrf.mxu0 }
 0x3cd   : > { %v2858_v52 = vpop.f32.mrf.mxu1  ;;  %9622 = vst [vmem:[#allocation34_spill] sm:$0xff] %v8858_v36 }
 0x3ce   : > { %v2859_v18 = vadd.f32 %v2858_v52, %v8191_v1  ;;  %v8850_v14 = vpack.c.bf16 %v3721_v58, %v3717_v28  ;;  %v3469_v37 = vmul.f32 0.2, %v2857_v25  ;;  %v3724_v23 = vmax.f32 %v2855_v4, %v3468_v51  ;;  %v8866_v4 = vpop.f32.mrf.mxu0 }
 0x3cf   : > { %v2860_v6 = vpop.f32.mrf.mxu1  ;;  %9624 = vst [vmem:[#allocation9_spill] sm:$0xff] %v8866_v4 }
 0x3d0   : > { %v3472_v61 = vmul.f32 0.2, %v2859_v18  ;;  %v2861_v13 = vadd.f32 %v2860_v6, %v8210_v44  ;;  %v3725_v2 = vmax.f32 %v2857_v25, %v3469_v37  ;;  %v9625_v25 = vld [vmem:[#allocation11_spill] sm:$0xff] }
 0x3d1   : > { %v2864_v7 = vpop.f32.mrf.mxu1  ;;  %4425 = vmatmul.mubr.bf16.gmra.mxu1 %v8583_v30 }
 0x3d2   : > { %v3728_v22 = vmax.f32 %v2859_v18, %v3472_v61  ;;  %v3473_v41 = vmul.f32 0.2, %v2861_v13  ;;  %v2865_v12 = vadd.f32 %v2864_v7, %v8191_v1  ;;  %4434 = vmatprep.mubr.bf16.mxu1 %v8620_v55 }
 0x3d3   : > { %v2866_v48 = vpop.f32.mrf.mxu1 }
 0x3d4   : > { %v8860_v28 = vpack.c.bf16 %v3728_v22, %v3724_v23  ;;  %v3729_v58 = vmax.f32 %v2861_v13, %v3473_v41  ;;  %v2867_v52 = vadd.f32 %v2866_v48, %v8210_v44  ;;  %v3476_v62 = vmul.f32 0.2, %v2865_v12  ;;  %v8872_v41 = vpop.f32.mrf.mxu0 }
 0x3d5   : > { %v2868_v6 = vpop.f32.mrf.mxu1  ;;  %9626 = vst [vmem:[#allocation11_spill] sm:$0xff] %v8872_v41 }
 0x3d6   : > { %9623 = vst [vmem:[#allocation8_spill] sm:$0xff] %v8860_v28  ;;  %v2869_v30 = vadd.f32 %v2868_v6, %v8191_v1  ;;  %v8864_v51 = vpack.c.bf16 %v3729_v58, %v3725_v2  ;;  %v3477_v18 = vmul.f32 0.2, %v2867_v52  ;;  %v3732_v37 = vmax.f32 %v2865_v12, %v3476_v62  ;;  %v8880_v12 = vpop.f32.mrf.mxu0 }
 0x3d7   : > { %v2870_v7 = vpop.f32.mrf.mxu1  ;;  %9627 = vst [vmem:[#allocation35_spill] sm:$0xff] %v8880_v12 }
 0x3d8   : > { %v3480_v55 = vmul.f32 0.2, %v2869_v30  ;;  %v2871_v61 = vadd.f32 %v2870_v7, %v8210_v44  ;;  %v3733_v2 = vmax.f32 %v2867_v52, %v3477_v18  ;;  %v9628_v52 = vld [vmem:[#allocation10_spill] sm:$0xff] }
 0x3d9   : > { %v2874_v36 = vpop.f32.mrf.mxu1  ;;  %4435 = vmatmul.mubr.bf16.gmra.mxu1 %v9625_v25 }
 0x3da   : > { %v3736_v13 = vmax.f32 %v2869_v30, %v3480_v55  ;;  %v3481_v23 = vmul.f32 0.2, %v2871_v61  ;;  %v2875_v22 = vadd.f32 %v2874_v36, %v8191_v1  ;;  %4444 = vmatprep.mubr.bf16.mxu1 %v8643_v47 }
 0x3db   : > { %v2876_v48 = vpop.f32.mrf.mxu1 }
 0x3dc   : > { %v8874_v58 = vpack.c.bf16 %v3736_v13, %v3732_v37  ;;  %v3737_v6 = vmax.f32 %v2871_v61, %v3481_v23  ;;  %v2877_v4 = vadd.f32 %v2876_v48, %v8210_v44  ;;  %v3484_v28 = vmul.f32 0.2, %v2875_v22  ;;  %v8885_v13 = vpop.f32.mrf.mxu0 }
 0x3dd   : > { %v2878_v7 = vpop.f32.mrf.mxu1  ;;  %9629 = vst [vmem:[#allocation10_spill] sm:$0xff] %v8885_v13 }
 0x3de   : > { %v2879_v25 = vadd.f32 %v2878_v7, %v8191_v1  ;;  %v8878_v62 = vpack.c.bf16 %v3737_v6, %v3733_v2  ;;  %v3485_v30 = vmul.f32 0.2, %v2877_v4  ;;  %v3740_v18 = vmax.f32 %v2875_v22, %v3484_v28  ;;  %v8894_v28 = vpop.f32.mrf.mxu0 }
 0x3df   : > { %v2880_v36 = vpop.f32.mrf.mxu1  ;;  %9632 = vst [vmem:[#allocation38_spill] sm:$0xff] %v8894_v28 }
 0x3e0   : > { %v3488_v47 = vmul.f32 0.2, %v2879_v25  ;;  %v2881_v55 = vadd.f32 %v2880_v36, %v8210_v44  ;;  %v3741_v23 = vmax.f32 %v2877_v4, %v3485_v30 }
 0x3e1   : > { %v3137_v41 = vpop.f32.mrf.mxu1  ;;  %4445 = vmatmul.mubr.bf16.gmra.mxu1 %v9628_v52 }
 0x3e2   : > { %v3744_v61 = vmax.f32 %v2879_v25, %v3488_v47  ;;  %v3489_v37 = vmul.f32 0.2, %v2881_v55  ;;  %4454 = vmatprep.mubr.bf16.mxu1 %v8657_v35  ;;  %v3138_v7 = vadd.f32 %v3137_v41, %v7996_v49  ;;  %v8899_v41 = vpop.f32.mrf.mxu0 }
 0x3e3   : > { %v3139_v1 = vpop.f32.mrf.mxu1 }
 0x3e4   : > { %v8887_v48 = vpack.c.bf16 %v3744_v61, %v3740_v18  ;;  %v3745_v2 = vmax.f32 %v2881_v55, %v3489_v37  ;;  %v3140_v6 = vadd.f32 %v3139_v1, %v7988_v31  ;;  %v3414_v4 = vmul.f32 0.2, %v3138_v7  ;;  %v8904_v12 = vpop.f32.mrf.mxu0 }
 0x3e5   : > { %v3141_v44 = vpop.f32.mrf.mxu1 }
 0x3e6   : > { %9630 = vst [vmem:[#allocation36_spill] sm:$0xff] %v8887_v48  ;;  %v3142_v36 = vadd.f32 %v3141_v44, %v7996_v49  ;;  %v8892_v52 = vpack.c.bf16 %v3745_v2, %v3741_v23  ;;  %v3415_v35 = vmul.f32 0.2, %v3140_v6  ;;  %v3670_v2 = vmax.f32 %v3138_v7, %v3414_v4 }
 0x3e7   : > { %v3143_v22 = vpop.f32.mrf.mxu1 }
 0x3e8   : > { %9631 = vst [vmem:[#allocation37_spill] sm:$0xff] %v8892_v52  ;;  %v3418_v25 = vmul.f32 0.2, %v3142_v36  ;;  %v3144_v47 = vadd.f32 %v3143_v22, %v7988_v31  ;;  %v3671_v37 = vmax.f32 %v3140_v6, %v3415_v35 }
 0x3e9   : > { %v3147_v30 = vpop.f32.mrf.mxu1  ;;  %4455 = vmatmul.mubr.bf16.gmra.mxu1 %v8650_v11 }
 0x3ea   : > { %v3419_v55 = vmul.f32 0.2, %v3144_v47  ;;  %4464 = vmatprep.mubr.bf16.mxu1 %v8668_v21  ;;  %v3674_v18 = vmax.f32 %v3142_v36, %v3418_v25  ;;  %v3148_v44 = vadd.f32 %v3147_v30, %v7996_v49  ;;  %v8909_v25 = vpop.f32.mrf.mxu0 }
 0x3eb   : > { %v3149_v61 = vpop.f32.mrf.mxu1 }
 0x3ec   : > { %v3675_v1 = vmax.f32 %v3144_v47, %v3419_v55  ;;  %v3150_v23 = vadd.f32 %v3149_v61, %v7988_v31  ;;  %v3838_v11 = vpack.c.bf16 %v3674_v18, %v3670_v2  ;;  %v3422_v6 = vmul.f32 0.2, %v3148_v44 }
 0x3ed   : > { %v3151_v28 = vpop.f32.mrf.mxu1 }
 0x3ee   : > { %v3152_v22 = vadd.f32 %v3151_v28, %v7996_v49  ;;  %v3839_v13 = vpack.c.bf16 %v3675_v1, %v3671_v37  ;;  %v3423_v21 = vmul.f32 0.2, %v3150_v23  ;;  %v3678_v18 = vmax.f32 %v3148_v44, %v3422_v6 }
 0x3ef   : > { %v3153_v48 = vpop.f32.mrf.mxu1 }
 0x3f0   : > { %v3426_v52 = vmul.f32 0.2, %v3152_v22  ;;  %v3154_v36 = vadd.f32 %v3153_v48, %v7988_v31  ;;  %4877 = vmatprep.mubr.bf16.mxu0 %v3839_v13  ;;  %v3679_v4 = vmax.f32 %v3150_v23, %v3423_v21 }
 0x3f1   : > { %v3157_v35 = vpop.f32.mrf.mxu1  ;;  %4465 = vmatmul.mubr.bf16.gmra.mxu1 %v8664_v57  ;;  %4878 = vmatmul.mubr.bf16.gmra.mxu0 %v3838_v11  ;;  %v8914_v57 = vpop.f32.mrf.mxu0 }
 0x3f2   : > { %v3427_v7 = vmul.f32 0.2, %v3154_v36  ;;  %4474 = vmatprep.mubr.bf16.mxu1 %v8678_v43  ;;  %v3682_v28 = vmax.f32 %v3152_v22, %v3426_v52  ;;  %v3158_v48 = vadd.f32 %v3157_v35, %v7996_v49 }
 0x3f3   : > { %v3159_v47 = vpop.f32.mrf.mxu1  ;;  %v8919_v21 = vpop.f32.mrf.mxu0 }
 0x3f4   : > { %v3683_v30 = vmax.f32 %v3154_v36, %v3427_v7  ;;  %v3160_v55 = vadd.f32 %v3159_v47, %v7988_v31  ;;  %v3842_v1 = vpack.c.bf16 %v3682_v28, %v3678_v18  ;;  %v3430_v23 = vmul.f32 0.2, %v3158_v48 }
 0x3f5   : > { %v3161_v13 = vpop.f32.mrf.mxu1 }
 0x3f6   : > { %v3162_v61 = vadd.f32 %v3161_v13, %v7996_v49  ;;  %v3843_v37 = vpack.c.bf16 %v3683_v30, %v3679_v4  ;;  %v3431_v43 = vmul.f32 0.2, %v3160_v55  ;;  %v3686_v47 = vmax.f32 %v3158_v48, %v3430_v23 }
 0x3f7   : > { %v3163_v2 = vpop.f32.mrf.mxu1 }
 0x3f8   : > { %v3434_v11 = vmul.f32 0.2, %v3162_v61  ;;  %v3164_v52 = vadd.f32 %v3163_v2, %v7988_v31  ;;  %4887 = vmatprep.mubr.bf16.mxu0 %v3843_v37  ;;  %v3687_v35 = vmax.f32 %v3160_v55, %v3431_v43 }
 0x3f9   : > { %v3167_v22 = vpop.f32.mrf.mxu1  ;;  %4475 = vmatmul.mubr.bf16.gmra.mxu1 %v8674_v0  ;;  %4888 = vmatmul.mubr.bf16.gmra.mxu0 %v3842_v1  ;;  %v8924_v0 = vpop.f32.mrf.mxu0 }
 0x3fa   : > { %v3435_v44 = vmul.f32 0.2, %v3164_v52  ;;  %4484 = vmatprep.mubr.bf16.mxu1 %v8688_v26  ;;  %v3690_v36 = vmax.f32 %v3162_v61, %v3434_v11  ;;  %v3168_v4 = vadd.f32 %v3167_v22, %v7996_v49 }
 0x3fb   : > { %v3169_v6 = vpop.f32.mrf.mxu1  ;;  %v8929_v11 = vpop.f32.mrf.mxu0 }
 0x3fc   : > { %v3691_v7 = vmax.f32 %v3164_v52, %v3435_v44  ;;  %v3170_v28 = vadd.f32 %v3169_v6, %v7988_v31  ;;  %v3846_v37 = vpack.c.bf16 %v3690_v36, %v3686_v47  ;;  %v3438_v55 = vmul.f32 0.2, %v3168_v4 }
 0x3fd   : > { %v3171_v30 = vpop.f32.mrf.mxu1 }
 0x3fe   : > { %v3172_v18 = vadd.f32 %v3171_v30, %v7996_v49  ;;  %v3847_v13 = vpack.c.bf16 %v3691_v7, %v3687_v35  ;;  %v3439_v26 = vmul.f32 0.2, %v3170_v28  ;;  %v3694_v6 = vmax.f32 %v3168_v4, %v3438_v55 }
 0x3ff   : > { %v3173_v1 = vpop.f32.mrf.mxu1 }
 0x400   : > { %v3442_v2 = vmul.f32 0.2, %v3172_v18  ;;  %v3174_v61 = vadd.f32 %v3173_v1, %v7988_v31  ;;  %4897 = vmatprep.mubr.bf16.mxu0 %v3847_v13  ;;  %v3695_v22 = vmax.f32 %v3170_v28, %v3439_v26 }
 0x401   : > { %v3177_v43 = vpop.f32.mrf.mxu1  ;;  %4485 = vmatmul.mubr.bf16.gmra.mxu1 %v8684_v60  ;;  %4898 = vmatmul.mubr.bf16.gmra.mxu0 %v3846_v37  ;;  %v8934_v60 = vpop.f32.mrf.mxu0 }
 0x402   : > { %v3443_v48 = vmul.f32 0.2, %v3174_v61  ;;  %4494 = vmatprep.mubr.bf16.mxu1 %v8698_v10  ;;  %v3698_v52 = vmax.f32 %v3172_v18, %v3442_v2  ;;  %v3178_v35 = vadd.f32 %v3177_v43, %v7996_v49 }
 0x403   : > { %v3179_v23 = vpop.f32.mrf.mxu1  ;;  %v8939_v2 = vpop.f32.mrf.mxu0 }
 0x404   : > { %v3699_v44 = vmax.f32 %v3174_v61, %v3443_v48  ;;  %v3180_v36 = vadd.f32 %v3179_v23, %v7988_v31  ;;  %v3850_v13 = vpack.c.bf16 %v3698_v52, %v3694_v6  ;;  %v3446_v28 = vmul.f32 0.2, %v3178_v35 }
 0x405   : > { %v3181_v7 = vpop.f32.mrf.mxu1 }
 0x406   : > { %v3182_v47 = vadd.f32 %v3181_v7, %v7996_v49  ;;  %v3851_v30 = vpack.c.bf16 %v3699_v44, %v3695_v22  ;;  %v3447_v10 = vmul.f32 0.2, %v3180_v36  ;;  %v3702_v23 = vmax.f32 %v3178_v35, %v3446_v28 }
 0x407   : > { %v3183_v37 = vpop.f32.mrf.mxu1 }
 0x408   : > { %v3450_v1 = vmul.f32 0.2, %v3182_v47  ;;  %v3184_v18 = vadd.f32 %v3183_v37, %v7988_v31  ;;  %4907 = vmatprep.mubr.bf16.mxu0 %v3851_v30  ;;  %v3703_v43 = vmax.f32 %v3180_v36, %v3447_v10 }
 0x409   : > { %v3187_v26 = vpop.f32.mrf.mxu1  ;;  %4495 = vmatmul.mubr.bf16.gmra.mxu1 %v8694_v34  ;;  %4908 = vmatmul.mubr.bf16.gmra.mxu0 %v3850_v13  ;;  %v8944_v34 = vpop.f32.mrf.mxu0 }
 0x40a   : > { %v3451_v4 = vmul.f32 0.2, %v3184_v18  ;;  %4504 = vmatprep.mubr.bf16.mxu1 %v8714_v17  ;;  %v3706_v61 = vmax.f32 %v3182_v47, %v3450_v1  ;;  %v3188_v22 = vadd.f32 %v3187_v26, %v7996_v49 }
 0x40b   : > { %v3189_v55 = vpop.f32.mrf.mxu1  ;;  %v8949_v1 = vpop.f32.mrf.mxu0 }
 0x40c   : > { %v3707_v48 = vmax.f32 %v3184_v18, %v3451_v4  ;;  %v3190_v52 = vadd.f32 %v3189_v55, %v7988_v31  ;;  %v3854_v30 = vpack.c.bf16 %v3706_v61, %v3702_v23  ;;  %v3454_v36 = vmul.f32 0.2, %v3188_v22 }
 0x40d   : > { %v3191_v44 = vpop.f32.mrf.mxu1 }
 0x40e   : > { %v3192_v6 = vadd.f32 %v3191_v44, %v7996_v49  ;;  %v3855_v7 = vpack.c.bf16 %v3707_v48, %v3703_v43  ;;  %v3455_v17 = vmul.f32 0.2, %v3190_v52  ;;  %v3710_v55 = vmax.f32 %v3188_v22, %v3454_v36 }
 0x40f   : > { %v3193_v13 = vpop.f32.mrf.mxu1 }
 0x410   : > { %v3458_v37 = vmul.f32 0.2, %v3192_v6  ;;  %v3194_v47 = vadd.f32 %v3193_v13, %v7988_v31  ;;  %4917 = vmatprep.mubr.bf16.mxu0 %v3855_v7  ;;  %v3711_v26 = vmax.f32 %v3190_v52, %v3455_v17 }
 0x411   : > { %v3197_v10 = vpop.f32.mrf.mxu1  ;;  %4505 = vmatmul.mubr.bf16.gmra.mxu1 %v8708_v56  ;;  %4918 = vmatmul.mubr.bf16.gmra.mxu0 %v3854_v30  ;;  %v8954_v56 = vpop.f32.mrf.mxu0 }
 0x412   : > { %v3459_v35 = vmul.f32 0.2, %v3194_v47  ;;  %4514 = vmatprep.mubr.bf16.mxu1 %v8732_v16  ;;  %v3714_v18 = vmax.f32 %v3192_v6, %v3458_v37  ;;  %v3198_v43 = vadd.f32 %v3197_v10, %v7996_v49 }
 0x413   : > { %v3199_v28 = vpop.f32.mrf.mxu1  ;;  %v8959_v37 = vpop.f32.mrf.mxu0 }
 0x414   : > { %v3715_v4 = vmax.f32 %v3194_v47, %v3459_v35  ;;  %v3200_v61 = vadd.f32 %v3199_v28, %v7988_v31  ;;  %v3858_v7 = vpack.c.bf16 %v3714_v18, %v3710_v55  ;;  %v3462_v52 = vmul.f32 0.2, %v3198_v43 }
 0x415   : > { %v3201_v48 = vpop.f32.mrf.mxu1 }
 0x416   : > { %v3202_v23 = vadd.f32 %v3201_v48, %v7996_v49  ;;  %v3859_v44 = vpack.c.bf16 %v3715_v4, %v3711_v26  ;;  %v3463_v16 = vmul.f32 0.2, %v3200_v61  ;;  %v3718_v28 = vmax.f32 %v3198_v43, %v3462_v52 }
 0x417   : > { %v3203_v30 = vpop.f32.mrf.mxu1 }
 0x418   : > { %v3466_v13 = vmul.f32 0.2, %v3202_v23  ;;  %v3204_v6 = vadd.f32 %v3203_v30, %v7988_v31  ;;  %4927 = vmatprep.mubr.bf16.mxu0 %v3859_v44  ;;  %v3719_v10 = vmax.f32 %v3200_v61, %v3463_v16 }
 0x419   : > { %v3207_v17 = vpop.f32.mrf.mxu1  ;;  %4515 = vmatmul.mubr.bf16.gmra.mxu1 %v8724_v9  ;;  %4928 = vmatmul.mubr.bf16.gmra.mxu0 %v3858_v7  ;;  %v8964_v9 = vpop.f32.mrf.mxu0 }
 0x41a   : > { %v3467_v22 = vmul.f32 0.2, %v3204_v6  ;;  %4524 = vmatprep.mubr.bf16.mxu1 %v8750_v46  ;;  %v3722_v47 = vmax.f32 %v3202_v23, %v3466_v13  ;;  %v3208_v26 = vadd.f32 %v3207_v17, %v7996_v49 }
 0x41b   : > { %v3209_v36 = vpop.f32.mrf.mxu1  ;;  %v8969_v13 = vpop.f32.mrf.mxu0 }
 0x41c   : > { %v3723_v35 = vmax.f32 %v3204_v6, %v3467_v22  ;;  %v3210_v18 = vadd.f32 %v3209_v36, %v7988_v31  ;;  %v3862_v44 = vpack.c.bf16 %v3722_v47, %v3718_v28  ;;  %v3470_v61 = vmul.f32 0.2, %v3208_v26 }
 0x41d   : > { %v3211_v4 = vpop.f32.mrf.mxu1 }
 0x41e   : > { %v3212_v55 = vadd.f32 %v3211_v4, %v7996_v49  ;;  %v3863_v48 = vpack.c.bf16 %v3723_v35, %v3719_v10  ;;  %v3471_v46 = vmul.f32 0.2, %v3210_v18  ;;  %v3726_v36 = vmax.f32 %v3208_v26, %v3470_v61 }
 0x41f   : > { %v3213_v7 = vpop.f32.mrf.mxu1 }
 0x420   : > { %v3474_v30 = vmul.f32 0.2, %v3212_v55  ;;  %v3214_v23 = vadd.f32 %v3213_v7, %v7988_v31  ;;  %4937 = vmatprep.mubr.bf16.mxu0 %v3863_v48  ;;  %v3727_v17 = vmax.f32 %v3210_v18, %v3471_v46 }
 0x421   : > { %v3217_v16 = vpop.f32.mrf.mxu1  ;;  %4525 = vmatmul.mubr.bf16.gmra.mxu1 %v8742_v53  ;;  %4938 = vmatmul.mubr.bf16.gmra.mxu0 %v3862_v44  ;;  %v8974_v53 = vpop.f32.mrf.mxu0 }
 0x422   : > { %v3475_v43 = vmul.f32 0.2, %v3214_v23  ;;  %4534 = vmatprep.mubr.bf16.mxu1 %v8768_v19  ;;  %v3730_v6 = vmax.f32 %v3212_v55, %v3474_v30  ;;  %v3218_v10 = vadd.f32 %v3217_v16, %v7996_v49  ;;  %v3940_v16 = vld [vmem:[%s9523_s8] sm:$0x3] }
 0x423   : > { %v3219_v52 = vpop.f32.mrf.mxu1  ;;  %v8979_v30 = vpop.f32.mrf.mxu0 }
 0x424   : > { %v3731_v22 = vmax.f32 %v3214_v23, %v3475_v43  ;;  %v3220_v47 = vadd.f32 %v3219_v52, %v7988_v31  ;;  %v3866_v48 = vpack.c.bf16 %v3730_v6, %v3726_v36  ;;  %v3478_v18 = vmul.f32 0.2, %v3218_v10  ;;  %9633 = vst [vmem:[#allocation39_spill] sm:$0xff] %v8979_v30 }
 0x425   : > { %v3221_v35 = vpop.f32.mrf.mxu1 }
 0x426   : > { %v3222_v28 = vadd.f32 %v3221_v35, %v7996_v49  ;;  %v3867_v4 = vpack.c.bf16 %v3731_v22, %v3727_v17  ;;  %v3479_v19 = vmul.f32 0.2, %v3220_v47  ;;  %v3734_v17 = vmax.f32 %v3218_v10, %v3478_v18 }
 0x427   : > { %v3223_v44 = vpop.f32.mrf.mxu1 }
 0x428   : > { %v3482_v7 = vmul.f32 0.2, %v3222_v28  ;;  %v3224_v55 = vadd.f32 %v3223_v44, %v7988_v31  ;;  %4947 = vmatprep.mubr.bf16.mxu0 %v3867_v4  ;;  %v3735_v43 = vmax.f32 %v3220_v47, %v3479_v19  ;;  %v9635_v19 = vld [vmem:[#allocation7_spill] sm:$0xff] }
 0x429   : > { %v3227_v46 = vpop.f32.mrf.mxu1  ;;  %4535 = vmatmul.mubr.bf16.gmra.mxu1 %v8760_v59  ;;  %4948 = vmatmul.mubr.bf16.gmra.mxu0 %v3866_v48  ;;  %v8994_v10 = vrot.slane %v3940_v16, %v9635_v19 }
 0x42a   : > { %v3483_v26 = vmul.f32 0.2, %v3224_v55  ;;  %4544 = vmatprep.mubr.bf16.mxu1 %v8786_v54  ;;  %v3738_v23 = vmax.f32 %v3222_v28, %v3482_v7  ;;  %v3228_v22 = vadd.f32 %v3227_v46, %v7996_v49  ;;  %v9634_v54 = vld [vmem:[#allocation6_spill] sm:$0xff]  ;;  %v8990_v28 = vpop.f32.mrf.mxu0 }
 0x42b   : > { %v3229_v61 = vpop.f32.mrf.mxu1  ;;  %v8988_v4 = vrot.slane %v3940_v16, %v9634_v54 }
 0x42c   : > { %v3739_v6 = vmax.f32 %v3224_v55, %v3483_v26  ;;  %v3230_v52 = vadd.f32 %v3229_v61, %v7988_v31  ;;  %v3870_v48 = vpack.c.bf16 %v3738_v23, %v3734_v17  ;;  %v3486_v55 = vmul.f32 0.2, %v3228_v22  ;;  %v8999_v26 = vpop.f32.mrf.mxu0 }
 0x42d   : > { %v3231_v59 = vpop.f32.mrf.mxu1 }
 0x42e   : > { %v3232_v36 = vadd.f32 %v3231_v59, %v7996_v49  ;;  %v3871_v35 = vpack.c.bf16 %v3739_v6, %v3735_v43  ;;  %v3487_v7 = vmul.f32 0.2, %v3230_v52  ;;  %v3742_v17 = vmax.f32 %v3228_v22, %v3486_v55 }
 0x42f   : > { %v3233_v44 = vpop.f32.mrf.mxu1 }
 0x430   : > { %v3490_v30 = vmul.f32 0.2, %v3232_v36  ;;  %v3234_v47 = vadd.f32 %v3233_v44, %v7988_v31  ;;  %4957 = vmatprep.mubr.bf16.mxu0 %v3871_v35  ;;  %v3743_v61 = vmax.f32 %v3230_v52, %v3487_v7 }
 0x431   : > { %v4306_v18 = vpop.f32.mrf.mxu1  ;;  %4545 = vmatmul.mubr.bf16.gmra.mxu1 %v8778_v3  ;;  %4958 = vmatmul.mubr.bf16.gmra.mxu0 %v3870_v48  ;;  %v9006_v48 = vpop.f32.mrf.mxu0 }
 0x432   : > { %v3491_v49 = vmul.f32 0.2, %v3234_v47  ;;  %v4307_v46 = vadd.f32 %v4306_v18, %v8988_v4  ;;  %4554 = vmatprep.mubr.bf16.mxu1 %v8804_v15  ;;  %v3746_v23 = vmax.f32 %v3232_v36, %v3490_v30 }
 0x433   : > { %v4308_v31 = vpop.f32.mrf.mxu1  ;;  %v9016_v18 = vpop.f32.mrf.mxu0 }
 0x434   : > { %v3747_v43 = vmax.f32 %v3234_v47, %v3491_v49  ;;  %v4660_v16 = vadd.f32 %v8702_v8, %v4307_v46  ;;  %v4309_v6 = vadd.f32 %v4308_v31, %v8994_v10  ;;  %v3874_v30 = vpack.c.bf16 %v3746_v23, %v3742_v17 }
 0x435   : > { %v4310_v3 = vpop.f32.mrf.mxu1 }
 0x436   : > { %v4978_v59 = vmul.f32 0.2, %v4660_v16  ;;  %v4662_v35 = vadd.f32 %v8706_v32, %v4309_v6  ;;  %v4311_v54 = vadd.f32 %v4310_v3, %v8988_v4  ;;  %v3875_v15 = vpack.c.bf16 %v3747_v43, %v3743_v61 }
 0x437   : > { %v4312_v36 = vpop.f32.mrf.mxu1 }
 0x438   : > { %v4979_v52 = vmul.f32 0.2, %v4662_v35  ;;  %v4664_v8 = vadd.f32 %v8711_v39, %v4311_v54  ;;  %v4313_v44 = vadd.f32 %v4312_v36, %v8994_v10  ;;  %4967 = vmatprep.mubr.bf16.mxu0 %v3875_v15  ;;  %v5106_v22 = vmax.f32 %v4660_v16, %v4978_v59 }
 0x439   : > { %v4316_v7 = vpop.f32.mrf.mxu1  ;;  %4555 = vmatmul.mubr.bf16.gmra.mxu1 %v8796_v5  ;;  %4968 = vmatmul.mubr.bf16.gmra.mxu0 %v3874_v30 }
 0x43a   : > { %v5107_v32 = vmax.f32 %v4662_v35, %v4979_v52  ;;  %v4980_v47 = vmul.f32 0.2, %v4664_v8  ;;  %v4666_v19 = vadd.f32 %v8716_v63, %v4313_v44  ;;  %v4317_v55 = vadd.f32 %v4316_v7, %v8988_v4  ;;  %4564 = vmatprep.mubr.bf16.mxu1 %v8822_v29  ;;  %v9024_v29 = vpop.f32.mrf.mxu0 }
 0x43b   : > { %v4318_v49 = vpop.f32.mrf.mxu1 }
 0x43c   : > { %v6083_v39 = vpack.c.bf16 %v5107_v32, %v5106_v22  ;;  %v4981_v46 = vmul.f32 0.2, %v4666_v19  ;;  %v4670_v23 = vadd.f32 %v8721_v27, %v4317_v55  ;;  %v4319_v31 = vadd.f32 %v4318_v49, %v8994_v10  ;;  %v9636_v55 = vld [vmem:[#allocation13_spill] sm:$0xff] }
 0x43d   : > { %v4320_v61 = vpop.f32.mrf.mxu1  ;;  %v5108_v63 = vmax.f32 %v4664_v8, %v4980_v47 }
 0x43e   : > { %5618 = vst [vmem:[%s9020_s27] sm:$0xff] %v6083_v39  ;;  %v5109_v5 = vmax.f32 %v4666_v19, %v4981_v46  ;;  %v4321_v43 = vadd.f32 %v4320_v61, %v8988_v4  ;;  %v4982_v16 = vmul.f32 0.2, %v4670_v23  ;;  %v4672_v6 = vadd.f32 %v8727_v24, %v4319_v31  ;;  %v9034_v24 = vpop.f32.mrf.mxu0  ;;  %v9637_v61 = vld [vmem:[#allocation12_spill] sm:$0xff] }
 0x43f   : > { %v4322_v17 = vpop.f32.mrf.mxu1 }
 0x440   : > { %v6084_v3 = vpack.c.bf16 %v5109_v5, %v5108_v63  ;;  %v4674_v27 = vadd.f32 %v8730_v33, %v4321_v43  ;;  %v4323_v59 = vadd.f32 %v4322_v17, %v8994_v10  ;;  %v4983_v35 = vmul.f32 0.2, %v4672_v6  ;;  %v9040_v39 = vpop.f32.mrf.mxu0 }
 0x441   : > { %v4326_v54 = vpop.f32.mrf.mxu1  ;;  %4565 = vmatmul.mubr.bf16.gmra.mxu1 %v8814_v40  ;;  %v5110_v52 = vmax.f32 %v4670_v23, %v4982_v16 }
 0x442   : > { %5619 = vst [vmem:[%s9020_s27 + $0x8] sm:$0xff] %v6084_v3  ;;  %v4984_v15 = vmul.f32 0.2, %v4674_v27  ;;  %v4676_v30 = vadd.f32 %v8735_v50, %v4323_v59  ;;  %v4327_v36 = vadd.f32 %v4326_v54, %v8988_v4  ;;  %4574 = vmatprep.mubr.bf16.mxu1 %v8836_v20  ;;  %v5111_v8 = vmax.f32 %v4672_v6, %v4983_v35  ;;  %v9049_v17 = vpop.f32.mrf.mxu0 }
 0x443   : > { %v4328_v33 = vpop.f32.mrf.mxu1 }
 0x444   : > { %v4985_v44 = vmul.f32 0.2, %v4676_v30  ;;  %v4680_v22 = vadd.f32 %v8739_v45, %v4327_v36  ;;  %v4329_v7 = vadd.f32 %v4328_v33, %v8994_v10  ;;  %v6085_v40 = vpack.c.bf16 %v5111_v8, %v5110_v52  ;;  %v9640_v33 = vld [vmem:[#allocation17_spill] sm:$0xff] }
 0x445   : > { %v5112_v32 = vmax.f32 %v4674_v27, %v4984_v15  ;;  %v4330_v47 = vpop.f32.mrf.mxu1  ;;  %v9638_v27 = vld [vmem:[#allocation15_spill] sm:$0xff]  ;;  %v9639_v15 = vld [vmem:[#allocation14_spill] sm:$0xff] }
 0x446   : > { %v5113_v50 = vmax.f32 %v4676_v30, %v4985_v44  ;;  %v4986_v19 = vmul.f32 0.2, %v4680_v22  ;;  %v4682_v49 = vadd.f32 %v9636_v55, %v4329_v7  ;;  %v4331_v20 = vadd.f32 %v4330_v47, %v8988_v4  ;;  %5620 = vst [vmem:[%s9020_s27 + $0x10] sm:$0xff] %v6085_v40 }
 0x447   : > { %v4332_v46 = vpop.f32.mrf.mxu1 }
 0x448   : > { %v6086_v23 = vpack.c.bf16 %v5113_v50, %v5112_v32  ;;  %v4987_v31 = vmul.f32 0.2, %v4682_v49  ;;  %v4684_v45 = vadd.f32 %v9637_v61, %v4331_v20  ;;  %v4333_v63 = vadd.f32 %v4332_v46, %v8994_v10  ;;  %v9641_v50 = vld [vmem:[#allocation16_spill] sm:$0xff]  ;;  %v9642_v61 = vld [vmem:[#allocation19_spill] sm:$0xff] }
 0x449   : > { %v4336_v5 = vpop.f32.mrf.mxu1  ;;  %4575 = vmatmul.mubr.bf16.gmra.mxu1 %v8832_v38  ;;  %v5114_v43 = vmax.f32 %v4680_v22, %v4986_v19 }
 0x44a   : > { %5621 = vst [vmem:[%s9020_s27 + $0x18] sm:$0xff] %v6086_v23  ;;  %v5115_v16 = vmax.f32 %v4682_v49, %v4987_v31  ;;  %v4337_v6 = vadd.f32 %v4336_v5, %v8988_v4  ;;  %4584 = vmatprep.mubr.bf16.mxu1 %v8850_v14  ;;  %v4988_v3 = vmul.f32 0.2, %v4684_v45  ;;  %v4686_v59 = vadd.f32 %v9638_v27, %v4333_v63  ;;  %v9057_v14 = vpop.f32.mrf.mxu0 }
 0x44b   : > { %v4338_v35 = vpop.f32.mrf.mxu1 }
 0x44c   : > { %v6087_v54 = vpack.c.bf16 %v5115_v16, %v5114_v43  ;;  %v4690_v30 = vadd.f32 %v9639_v15, %v4337_v6  ;;  %v4339_v36 = vadd.f32 %v4338_v35, %v8994_v10  ;;  %v4989_v52 = vmul.f32 0.2, %v4686_v59  ;;  %v9065_v5 = vpop.f32.mrf.mxu0 }
 0x44d   : > { %v4340_v38 = vpop.f32.mrf.mxu1  ;;  %v5116_v7 = vmax.f32 %v4684_v45, %v4988_v3  ;;  %v9643_v3 = vld [vmem:[#allocation21_spill] sm:$0xff] }
 0x44e   : > { %5622 = vst [vmem:[%s9020_s27 + $0x20] sm:$0xff] %v6087_v54  ;;  %v4990_v8 = vmul.f32 0.2, %v4690_v30  ;;  %v4692_v44 = vadd.f32 %v9640_v33, %v4339_v36  ;;  %v4341_v22 = vadd.f32 %v4340_v38, %v8988_v4  ;;  %v5117_v40 = vmax.f32 %v4686_v59, %v4989_v52  ;;  %v9644_v36 = vld [vmem:[#allocation23_spill] sm:$0xff]  ;;  %v9645_v33 = vld [vmem:[#allocation18_spill] sm:$0xff] }
 0x44f   : > { %v4342_v32 = vpop.f32.mrf.mxu1 }
 0x450   : > { %v4991_v47 = vmul.f32 0.2, %v4692_v44  ;;  %v4694_v19 = vadd.f32 %v9641_v50, %v4341_v22  ;;  %v4343_v55 = vadd.f32 %v4342_v32, %v8994_v10  ;;  %v6088_v49 = vpack.c.bf16 %v5117_v40, %v5116_v7  ;;  %v9646_v32 = vld [vmem:[#allocation8_spill] sm:$0xff]  ;;  %v9647_v50 = vld [vmem:[#allocation5_spill] sm:$0xff] }
 0x451   : > { %v5118_v20 = vmax.f32 %v4690_v30, %v4990_v8  ;;  %v4346_v46 = vpop.f32.mrf.mxu1  ;;  %4585 = vmatmul.mubr.bf16.gmra.mxu1 %v8846_v42  ;;  %v9072_v30 = vpop.f32.mrf.mxu0 }
 0x452   : > { %v5119_v23 = vmax.f32 %v4692_v44, %v4991_v47  ;;  %v4992_v31 = vmul.f32 0.2, %v4694_v19  ;;  %v4696_v63 = vadd.f32 %v9642_v61, %v4343_v55  ;;  %v4347_v45 = vadd.f32 %v4346_v46, %v8988_v4  ;;  %4594 = vmatprep.mubr.bf16.mxu1 %v8864_v51  ;;  %5623 = vst [vmem:[%s9020_s27 + $0x28] sm:$0xff] %v6088_v49  ;;  %v9648_v61 = vld [vmem:[#allocation20_spill] sm:$0xff] }
 0x453   : > { %v4348_v43 = vpop.f32.mrf.mxu1  ;;  %v9082_v49 = vpop.f32.mrf.mxu0 }
 0x454   : > { %v6089_v16 = vpack.c.bf16 %v5119_v23, %v5118_v20  ;;  %v4993_v6 = vmul.f32 0.2, %v4696_v63  ;;  %v4700_v27 = vadd.f32 %v9643_v3, %v4347_v45  ;;  %v4349_v59 = vadd.f32 %v4348_v43, %v8994_v10 }
 0x455   : > { %v4350_v42 = vpop.f32.mrf.mxu1  ;;  %v5120_v35 = vmax.f32 %v4694_v19, %v4992_v31 }
 0x456   : > { %5624 = vst [vmem:[%s9020_s27 + $0x30] sm:$0xff] %v6089_v16  ;;  %v5121_v54 = vmax.f32 %v4696_v63, %v4993_v6  ;;  %v4351_v15 = vadd.f32 %v4350_v42, %v8988_v4  ;;  %v4994_v51 = vmul.f32 0.2, %v4700_v27  ;;  %v4702_v52 = vadd.f32 %v9644_v36, %v4349_v59  ;;  %v9649_v42 = vld [vmem:[#allocation22_spill] sm:$0xff]  ;;  %v9650_v36 = vld [vmem:[#allocation24_spill] sm:$0xff] }
 0x457   : > { %v4352_v38 = vpop.f32.mrf.mxu1 }
 0x458   : > { %v6090_v8 = vpack.c.bf16 %v5121_v54, %v5120_v35  ;;  %v4704_v44 = vadd.f32 %v9645_v33, %v4351_v15  ;;  %v4353_v22 = vadd.f32 %v4352_v38, %v8994_v10  ;;  %v4995_v7 = vmul.f32 0.2, %v4702_v52  ;;  %v9088_v54 = vpop.f32.mrf.mxu0 }
 0x459   : > { %v4356_v40 = vpop.f32.mrf.mxu1  ;;  %4595 = vmatmul.mubr.bf16.gmra.mxu1 %v9646_v32  ;;  %v5122_v20 = vmax.f32 %v4700_v27, %v4994_v51 }
 0x45a   : > { %5625 = vst [vmem:[%s9020_s27 + $0x38] sm:$0xff] %v6090_v8  ;;  %v4996_v47 = vmul.f32 0.2, %v4704_v44  ;;  %v4706_v19 = vadd.f32 %v9647_v50, %v4353_v22  ;;  %v4357_v55 = vadd.f32 %v4356_v40, %v8988_v4  ;;  %4604 = vmatprep.mubr.bf16.mxu1 %v8878_v62  ;;  %v5123_v46 = vmax.f32 %v4702_v52, %v4995_v7  ;;  %v9651_v7 = vld [vmem:[#allocation37_spill] sm:$0xff]  ;;  %v9097_v40 = vpop.f32.mrf.mxu0 }
 0x45b   : > { %v4358_v23 = vpop.f32.mrf.mxu1 }
 0x45c   : > { %v4997_v31 = vmul.f32 0.2, %v4706_v19  ;;  %v4710_v63 = vadd.f32 %v9648_v61, %v4357_v55  ;;  %v4359_v45 = vadd.f32 %v4358_v23, %v8994_v10  ;;  %v6091_v43 = vpack.c.bf16 %v5123_v46, %v5122_v20  ;;  %v9653_v20 = vld [vmem:[#allocation26_spill] sm:$0xff] }
 0x45d   : > { %v5124_v16 = vmax.f32 %v4704_v44, %v4996_v47  ;;  %v4360_v6 = vpop.f32.mrf.mxu1  ;;  %v9652_v47 = vld [vmem:[#allocation25_spill] sm:$0xff] }
 0x45e   : > { %v5125_v3 = vmax.f32 %v4706_v19, %v4997_v31  ;;  %v4998_v59 = vmul.f32 0.2, %v4710_v63  ;;  %v4712_v35 = vadd.f32 %v9649_v42, %v4359_v45  ;;  %v4361_v62 = vadd.f32 %v4360_v6, %v8988_v4  ;;  %5626 = vst [vmem:[%s9020_s27 + $0x40] sm:$0xff] %v6091_v43 }
 0x45f   : > { %v4362_v27 = vpop.f32.mrf.mxu1 }
 0x460   : > { %v6092_v15 = vpack.c.bf16 %v5125_v3, %v5124_v16  ;;  %v4999_v51 = vmul.f32 0.2, %v4712_v35  ;;  %v4714_v52 = vadd.f32 %v9650_v36, %v4361_v62  ;;  %v4363_v38 = vadd.f32 %v4362_v27, %v8994_v10  ;;  %v9105_v16 = vpop.f32.mrf.mxu0 }
 0x461   : > { %v4366_v8 = vpop.f32.mrf.mxu1  ;;  %4605 = vmatmul.mubr.bf16.gmra.mxu1 %v8874_v58  ;;  %v5126_v33 = vmax.f32 %v4710_v63, %v4998_v59  ;;  %v9654_v63 = vld [vmem:[#allocation27_spill] sm:$0xff] }
 0x462   : > { %5627 = vst [vmem:[%s9020_s27 + $0x48] sm:$0xff] %v6092_v15  ;;  %v5127_v44 = vmax.f32 %v4712_v35, %v4999_v51  ;;  %v4367_v22 = vadd.f32 %v4366_v8, %v8988_v4  ;;  %4614 = vmatprep.mubr.bf16.mxu1 %v9651_v7  ;;  %v5000_v32 = vmul.f32 0.2, %v4714_v52  ;;  %v4716_v50 = vadd.f32 %v9652_v47, %v4363_v38  ;;  %v9655_v35 = vld [vmem:[#allocation28_spill] sm:$0xff] }
 0x463   : > { %v4368_v19 = vpop.f32.mrf.mxu1  ;;  %v9656_v38 = vld [vmem:[#allocation36_spill] sm:$0xff] }
 0x464   : > { %v6093_v55 = vpack.c.bf16 %v5127_v44, %v5126_v33  ;;  %v4720_v46 = vadd.f32 %v9653_v20, %v4367_v22  ;;  %v4369_v23 = vadd.f32 %v4368_v19, %v8994_v10  ;;  %v5001_v31 = vmul.f32 0.2, %v4716_v50  ;;  %v9657_v44 = vld [vmem:[#allocation29_spill] sm:$0xff]  ;;  %v9658_v19 = vld [vmem:[#allocation31_spill] sm:$0xff] }
 0x465   : > { %v4370_v58 = vpop.f32.mrf.mxu1  ;;  %v5128_v6 = vmax.f32 %v4714_v52, %v5000_v32  ;;  %v9112_v52 = vpop.f32.mrf.mxu0 }
 0x466   : > { %5628 = vst [vmem:[%s9020_s27 + $0x50] sm:$0xff] %v6093_v55  ;;  %v5002_v61 = vmul.f32 0.2, %v4720_v46  ;;  %v4722_v45 = vadd.f32 %v9654_v63, %v4369_v23  ;;  %v4371_v43 = vadd.f32 %v4370_v58, %v8988_v4  ;;  %v5129_v3 = vmax.f32 %v4716_v50, %v5001_v31 }
 0x467   : > { %v4372_v59 = vpop.f32.mrf.mxu1 }
 0x468   : > { %v5003_v42 = vmul.f32 0.2, %v4722_v45  ;;  %v4724_v62 = vadd.f32 %v9655_v35, %v4371_v43  ;;  %v4373_v27 = vadd.f32 %v4372_v59, %v8994_v10  ;;  %v6094_v15 = vpack.c.bf16 %v5129_v3, %v5128_v6  ;;  %v9660_v59 = vld [vmem:[#allocation32_spill] sm:$0xff] }
 0x469   : > { %v5130_v51 = vmax.f32 %v4720_v46, %v5002_v61  ;;  %v4376_v36 = vpop.f32.mrf.mxu1  ;;  %4615 = vmatmul.mubr.bf16.gmra.mxu1 %v9656_v38  ;;  %v9119_v61 = vpop.f32.mrf.mxu0 }
 0x46a   : > { %v5131_v8 = vmax.f32 %v4722_v45, %v5003_v42  ;;  %v5004_v33 = vmul.f32 0.2, %v4724_v62  ;;  %v4726_v22 = vadd.f32 %v9657_v44, %v4373_v27  ;;  %v4377_v7 = vadd.f32 %v4376_v36, %v8988_v4  ;;  %5629 = vst [vmem:[%s9020_s27 + $0x58] sm:$0xff] %v6094_v15  ;;  %v9659_v45 = vld [vmem:[#allocation30_spill] sm:$0xff]  ;;  %v9661_v36 = vld [vmem:[#allocation33_spill] sm:$0xff] }
 0x46b   : > { %v4378_v32 = vpop.f32.mrf.mxu1 }
 0x46c   : > { %v6095_v47 = vpack.c.bf16 %v5131_v8, %v5130_v51  ;;  %v5005_v50 = vmul.f32 0.2, %v4726_v22  ;;  %v4730_v55 = vadd.f32 %v9658_v19, %v4377_v7  ;;  %v4379_v20 = vadd.f32 %v4378_v32, %v8994_v10  ;;  %v9127_v8 = vpop.f32.mrf.mxu0  ;;  %v9662_v32 = vld [vmem:[#allocation34_spill] sm:$0xff] }
 0x46d   : > { %v4380_v46 = vpop.f32.mrf.mxu1  ;;  %v5132_v23 = vmax.f32 %v4724_v62, %v5004_v33 }
 0x46e   : > { %5630 = vst [vmem:[%s9020_s27 + $0x60] sm:$0xff] %v6095_v47  ;;  %v5133_v31 = vmax.f32 %v4726_v22, %v5005_v50  ;;  %v4381_v58 = vadd.f32 %v4380_v46, %v8988_v4  ;;  %v5006_v63 = vmul.f32 0.2, %v4730_v55  ;;  %v4732_v43 = vadd.f32 %v9659_v45, %v4379_v20 }
 0x46f   : > { %v4382_v6 = vpop.f32.mrf.mxu1 }
 0x470   : > { %v6096_v3 = vpack.c.bf16 %v5133_v31, %v5132_v23  ;;  %v4734_v42 = vadd.f32 %v9660_v59, %v4381_v58  ;;  %v4383_v35 = vadd.f32 %v4382_v6, %v8994_v10  ;;  %v5007_v27 = vmul.f32 0.2, %v4732_v43  ;;  %v9663_v58 = vld [vmem:[#allocation9_spill] sm:$0xff]  ;;  %v9664_v59 = vld [vmem:[#allocation11_spill] sm:$0xff] }
 0x471   : > { %v4386_v15 = vpop.f32.mrf.mxu1  ;;  %v5134_v33 = vmax.f32 %v4730_v55, %v5006_v63 }
 0x472   : > { %5631 = vst [vmem:[%s9020_s27 + $0x68] sm:$0xff] %v6096_v3  ;;  %v5008_v51 = vmul.f32 0.2, %v4734_v42  ;;  %v4736_v62 = vadd.f32 %v9661_v36, %v4383_v35  ;;  %v4387_v38 = vadd.f32 %v4386_v15, %v8988_v4  ;;  %v5135_v44 = vmax.f32 %v4732_v43, %v5007_v27  ;;  %v9133_v3 = vpop.f32.mrf.mxu0 }
 0x473   : > { %v4388_v22 = vpop.f32.mrf.mxu1 }
 0x474   : > { %v5009_v7 = vmul.f32 0.2, %v4736_v62  ;;  %v4740_v47 = vadd.f32 %v9662_v32, %v4387_v38  ;;  %v4389_v50 = vadd.f32 %v4388_v22, %v8994_v10  ;;  %v6097_v19 = vpack.c.bf16 %v5135_v44, %v5134_v33  ;;  %v9665_v33 = vld [vmem:[#allocation35_spill] sm:$0xff]  ;;  %v9666_v32 = vld [vmem:[#allocation10_spill] sm:$0xff] }
 0x475   : > { %v5136_v20 = vmax.f32 %v4734_v42, %v5008_v51  ;;  %v4390_v46 = vpop.f32.mrf.mxu1 }
 0x476   : > { %v5137_v23 = vmax.f32 %v4736_v62, %v5009_v7  ;;  %v5010_v31 = vmul.f32 0.2, %v4740_v47  ;;  %v4742_v45 = vadd.f32 %v9663_v58, %v4389_v50  ;;  %v4391_v6 = vadd.f32 %v4390_v46, %v8988_v4  ;;  %5632 = vst [vmem:[%s9020_s27 + $0x70] sm:$0xff] %v6097_v19  ;;  %v9140_v62 = vpop.f32.mrf.mxu0  ;;  %v9667_v58 = vld [vmem:[#allocation38_spill] sm:$0xff] }
 0x477   : > { %v4392_v55 = vpop.f32.mrf.mxu1 }
 0x478   : > { %v6098_v63 = vpack.c.bf16 %v5137_v23, %v5136_v20  ;;  %v5011_v43 = vmul.f32 0.2, %v4742_v45  ;;  %v4744_v35 = vadd.f32 %v9664_v59, %v4391_v6  ;;  %v4393_v27 = vadd.f32 %v4392_v55, %v8994_v10 }
 0x479   : > { %v4396_v15 = vpop.f32.mrf.mxu1  ;;  %v5138_v42 = vmax.f32 %v4740_v47, %v5010_v31 }
 0x47a   : > { %5633 = vst [vmem:[%s9020_s27 + $0x78] sm:$0xff] %v6098_v63  ;;  %v5139_v51 = vmax.f32 %v4742_v45, %v5011_v43  ;;  %v4397_v36 = vadd.f32 %v4396_v15, %v8988_v4  ;;  %v5012_v38 = vmul.f32 0.2, %v4744_v35  ;;  %v4746_v44 = vadd.f32 %v9665_v33, %v4393_v27  ;;  %v9148_v45 = vpop.f32.mrf.mxu0 }
 0x47b   : > { %v4398_v22 = vpop.f32.mrf.mxu1 }
 0x47c   : > { %v6099_v7 = vpack.c.bf16 %v5139_v51, %v5138_v42  ;;  %v4750_v50 = vadd.f32 %v9666_v32, %v4397_v36  ;;  %v4399_v19 = vadd.f32 %v4398_v22, %v8994_v10  ;;  %v5013_v20 = vmul.f32 0.2, %v4746_v44  ;;  %v9154_v32 = vpop.f32.mrf.mxu0 }
 0x47d   : > { %v4400_v46 = vpop.f32.mrf.mxu1  ;;  %v5140_v6 = vmax.f32 %v4744_v35, %v5012_v38 }
 0x47e   : > { %5634 = vst [vmem:[%s9020_s27 + $0x80] sm:$0xff] %v6099_v7  ;;  %v5014_v23 = vmul.f32 0.2, %v4750_v50  ;;  %v4752_v47 = vadd.f32 %v9667_v58, %v4399_v19  ;;  %v4401_v31 = vadd.f32 %v4400_v46, %v8988_v4  ;;  %v5141_v55 = vmax.f32 %v4746_v44, %v5013_v20 }
 0x47f   : > { %v4402_v63 = vpop.f32.mrf.mxu1 }
 0x480   : > { %v5015_v43 = vmul.f32 0.2, %v4752_v47  ;;  %v4754_v59 = vadd.f32 %v8899_v41, %v4401_v31  ;;  %v4403_v27 = vadd.f32 %v4402_v63, %v8994_v10  ;;  %v6100_v15 = vpack.c.bf16 %v5141_v55, %v5140_v6 }
 0x481   : > { %v5142_v42 = vmax.f32 %v4750_v50, %v5014_v23  ;;  %v4406_v51 = vpop.f32.mrf.mxu1 }
 0x482   : > { %v5143_v36 = vmax.f32 %v4752_v47, %v5015_v43  ;;  %v5016_v33 = vmul.f32 0.2, %v4754_v59  ;;  %v4756_v22 = vadd.f32 %v8904_v12, %v4403_v27  ;;  %v4407_v7 = vadd.f32 %v4406_v51, %v8988_v4  ;;  %5635 = vst [vmem:[%s9020_s27 + $0x88] sm:$0xff] %v6100_v15  ;;  %v9161_v12 = vpop.f32.mrf.mxu0 }
 0x483   : > { %v4408_v35 = vpop.f32.mrf.mxu1 }
 0x484   : > { %v6101_v38 = vpack.c.bf16 %v5143_v36, %v5142_v42  ;;  %v5017_v44 = vmul.f32 0.2, %v4756_v22  ;;  %v4760_v41 = vadd.f32 %v8909_v25, %v4407_v7  ;;  %v4409_v19 = vadd.f32 %v4408_v35, %v8994_v10  ;;  %v9169_v42 = vpop.f32.mrf.mxu0 }
 0x485   : > { %v4410_v20 = vpop.f32.mrf.mxu1  ;;  %v5144_v50 = vmax.f32 %v4754_v59, %v5016_v33 }
 0x486   : > { %5636 = vst [vmem:[%s9020_s27 + $0x90] sm:$0xff] %v6101_v38  ;;  %v5145_v46 = vmax.f32 %v4756_v22, %v5017_v44  ;;  %v4411_v23 = vadd.f32 %v4410_v20, %v8988_v4  ;;  %v5018_v58 = vmul.f32 0.2, %v4760_v41  ;;  %v4762_v47 = vadd.f32 %v8914_v57, %v4409_v19 }
 0x487   : > { %v4412_v31 = vpop.f32.mrf.mxu1 }
 0x488   : > { %v6102_v6 = vpack.c.bf16 %v5145_v46, %v5144_v50  ;;  %v4764_v55 = vadd.f32 %v8919_v21, %v4411_v23  ;;  %v4413_v25 = vadd.f32 %v4412_v31, %v8994_v10  ;;  %v5019_v63 = vmul.f32 0.2, %v4762_v47  ;;  %v9175_v50 = vpop.f32.mrf.mxu0 }
 0x489   : > { %v4416_v43 = vpop.f32.mrf.mxu1  ;;  %v5146_v51 = vmax.f32 %v4760_v41, %v5018_v58 }
 0x48a   : > { %5637 = vst [vmem:[%s9020_s27 + $0x98] sm:$0xff] %v6102_v6  ;;  %v5020_v27 = vmul.f32 0.2, %v4764_v55  ;;  %v4766_v59 = vadd.f32 %v8924_v0, %v4413_v25  ;;  %v4417_v15 = vadd.f32 %v4416_v43, %v8988_v4  ;;  %v5147_v36 = vmax.f32 %v4762_v47, %v5019_v63 }
 0x48b   : > { %v4418_v57 = vpop.f32.mrf.mxu1 }
 0x48c   : > { %v5021_v33 = vmul.f32 0.2, %v4766_v59  ;;  %v4770_v22 = vadd.f32 %v8929_v11, %v4417_v15  ;;  %v4419_v21 = vadd.f32 %v4418_v57, %v8994_v10  ;;  %v6103_v7 = vpack.c.bf16 %v5147_v36, %v5146_v51 }
 0x48d   : > { %v5148_v35 = vmax.f32 %v4764_v55, %v5020_v27  ;;  %v4420_v38 = vpop.f32.mrf.mxu1 }
 0x48e   : > { %v5149_v44 = vmax.f32 %v4766_v59, %v5021_v33  ;;  %v5022_v19 = vmul.f32 0.2, %v4770_v22  ;;  %v4772_v0 = vadd.f32 %v8934_v60, %v4419_v21  ;;  %v4421_v20 = vadd.f32 %v4420_v38, %v8988_v4  ;;  %5638 = vst [vmem:[%s9020_s27 + $0xa0] sm:$0xff] %v6103_v7  ;;  %v9182_v60 = vpop.f32.mrf.mxu0 }
 0x48f   : > { %v4422_v41 = vpop.f32.mrf.mxu1 }
 0x490   : > { %v6104_v46 = vpack.c.bf16 %v5149_v44, %v5148_v35  ;;  %v5023_v23 = vmul.f32 0.2, %v4772_v0  ;;  %v4774_v11 = vadd.f32 %v8939_v2, %v4421_v20  ;;  %v4423_v58 = vadd.f32 %v4422_v41, %v8994_v10 }
 0x491   : > { %v4426_v47 = vpop.f32.mrf.mxu1  ;;  %v5150_v31 = vmax.f32 %v4770_v22, %v5022_v19  ;;  %v9190_v22 = vpop.f32.mrf.mxu0 }
 0x492   : > { %5639 = vst [vmem:[%s9020_s27 + $0xa8] sm:$0xff] %v6104_v46  ;;  %v5151_v6 = vmax.f32 %v4772_v0, %v5023_v23  ;;  %v4427_v55 = vadd.f32 %v4426_v47, %v8988_v4  ;;  %v5024_v25 = vmul.f32 0.2, %v4774_v11  ;;  %v4776_v63 = vadd.f32 %v8944_v34, %v4423_v58 }
 0x493   : > { %v4428_v43 = vpop.f32.mrf.mxu1  ;;  %v9196_v23 = vpop.f32.mrf.mxu0 }
 0x494   : > { %v6105_v27 = vpack.c.bf16 %v5151_v6, %v5150_v31  ;;  %v4780_v59 = vadd.f32 %v8949_v1, %v4427_v55  ;;  %v4429_v2 = vadd.f32 %v4428_v43, %v8994_v10  ;;  %v5025_v15 = vmul.f32 0.2, %v4776_v63 }
 0x495   : > { %v4430_v51 = vpop.f32.mrf.mxu1  ;;  %v5152_v21 = vmax.f32 %v4774_v11, %v5024_v25 }
 0x496   : > { %5640 = vst [vmem:[%s9020_s27 + $0xb0] sm:$0xff] %v6105_v27  ;;  %v5026_v36 = vmul.f32 0.2, %v4780_v59  ;;  %v4782_v57 = vadd.f32 %v8954_v56, %v4429_v2  ;;  %v4431_v33 = vadd.f32 %v4430_v51, %v8988_v4  ;;  %v5153_v7 = vmax.f32 %v4776_v63, %v5025_v15  ;;  %v9668_v15 = vld [vmem:[#allocation39_spill] sm:$0xff] }
 0x497   : > { %v4432_v34 = vpop.f32.mrf.mxu1 }
 0x498   : > { %v5027_v35 = vmul.f32 0.2, %v4782_v57  ;;  %v4784_v38 = vadd.f32 %v8959_v37, %v4431_v33  ;;  %v4433_v1 = vadd.f32 %v4432_v34, %v8994_v10  ;;  %v6106_v44 = vpack.c.bf16 %v5153_v7, %v5152_v21 }
 0x499   : > { %v5154_v19 = vmax.f32 %v4780_v59, %v5026_v36  ;;  %v4436_v0 = vpop.f32.mrf.mxu1 }
 0x49a   : > { %v5155_v20 = vmax.f32 %v4782_v57, %v5027_v35  ;;  %v5028_v41 = vmul.f32 0.2, %v4784_v38  ;;  %v4786_v56 = vadd.f32 %v8964_v9, %v4433_v1  ;;  %v4437_v46 = vadd.f32 %v4436_v0, %v8988_v4  ;;  %5641 = vst [vmem:[%s9020_s27 + $0xb8] sm:$0xff] %v6106_v44  ;;  %v9203_v9 = vpop.f32.mrf.mxu0 }
 0x49b   : > { %v4438_v11 = vpop.f32.mrf.mxu1 }
 0x49c   : > { %v6107_v58 = vpack.c.bf16 %v5155_v20, %v5154_v19  ;;  %v5029_v47 = vmul.f32 0.2, %v4786_v56  ;;  %v4790_v37 = vadd.f32 %v8969_v13, %v4437_v46  ;;  %v4439_v31 = vadd.f32 %v4438_v11, %v8994_v10  ;;  %v9211_v34 = vpop.f32.mrf.mxu0 }
 0x49d   : > { %v4440_v6 = vpop.f32.mrf.mxu1  ;;  %v5156_v55 = vmax.f32 %v4784_v38, %v5028_v41 }
 0x49e   : > { %5642 = vst [vmem:[%s9020_s27 + $0xc0] sm:$0xff] %v6107_v58  ;;  %v5157_v25 = vmax.f32 %v4786_v56, %v5029_v47  ;;  %v4441_v63 = vadd.f32 %v4440_v6, %v8988_v4  ;;  %v5030_v43 = vmul.f32 0.2, %v4790_v37  ;;  %v4792_v27 = vadd.f32 %v8974_v53, %v4439_v31  ;;  %v9217_v58 = vpop.f32.mrf.mxu0 }
 0x49f   : > { %v4442_v59 = vpop.f32.mrf.mxu1 }
 0x4a0   : > { %v6108_v2 = vpack.c.bf16 %v5157_v25, %v5156_v55  ;;  %v4794_v51 = vadd.f32 %v9668_v15, %v4441_v63  ;;  %v4443_v13 = vadd.f32 %v4442_v59, %v8994_v10  ;;  %v5031_v36 = vmul.f32 0.2, %v4792_v27 }
 0x4a1   : > { %v4446_v57 = vpop.f32.mrf.mxu1  ;;  %v5158_v35 = vmax.f32 %v4790_v37, %v5030_v43 }
 0x4a2   : > { %5643 = vst [vmem:[%s9020_s27 + $0xc8] sm:$0xff] %v6108_v2  ;;  %v5032_v33 = vmul.f32 0.2, %v4794_v51  ;;  %v4796_v21 = vadd.f32 %v8990_v28, %v4443_v13  ;;  %v4447_v7 = vadd.f32 %v4446_v57, %v8988_v4  ;;  %v5159_v38 = vmax.f32 %v4792_v27, %v5031_v36 }
 0x4a3   : > { %v4448_v53 = vpop.f32.mrf.mxu1 }
 0x4a4   : > { %v5033_v1 = vmul.f32 0.2, %v4796_v21  ;;  %v4800_v44 = vadd.f32 %v8999_v26, %v4447_v7  ;;  %v4449_v19 = vadd.f32 %v4448_v53, %v8994_v10  ;;  %v6109_v0 = vpack.c.bf16 %v5159_v38, %v5158_v35 }
 0x4a5   : > { %v5160_v20 = vmax.f32 %v4794_v51, %v5032_v33  ;;  %v4450_v41 = vpop.f32.mrf.mxu1 }
 0x4a6   : > { %v5161_v56 = vmax.f32 %v4796_v21, %v5033_v1  ;;  %v5034_v46 = vmul.f32 0.2, %v4800_v44  ;;  %v4802_v28 = vadd.f32 %v9006_v48, %v4449_v19  ;;  %v4451_v11 = vadd.f32 %v4450_v41, %v8988_v4  ;;  %5644 = vst [vmem:[%s9020_s27 + $0xd0] sm:$0xff] %v6109_v0  ;;  %v9224_v48 = vpop.f32.mrf.mxu0 }
 0x4a7   : > { %v4452_v47 = vpop.f32.mrf.mxu1 }
 0x4a8   : > { %v6110_v37 = vpack.c.bf16 %v5161_v56, %v5160_v20  ;;  %v5035_v31 = vmul.f32 0.2, %v4802_v28  ;;  %v4804_v26 = vadd.f32 %v9016_v18, %v4451_v11  ;;  %v4453_v6 = vadd.f32 %v4452_v47, %v8994_v10  ;;  %v9232_v7 = vpop.f32.mrf.mxu0 }
 0x4a9   : > { %v4456_v55 = vpop.f32.mrf.mxu1  ;;  %v5162_v25 = vmax.f32 %v4800_v44, %v5034_v46 }
 0x4aa   : > { %5645 = vst [vmem:[%s9020_s27 + $0xd8] sm:$0xff] %v6110_v37  ;;  %v5163_v63 = vmax.f32 %v4802_v28, %v5035_v31  ;;  %v4457_v43 = vadd.f32 %v4456_v55, %v8988_v4  ;;  %v5036_v27 = vmul.f32 0.2, %v4804_v26  ;;  %v4806_v59 = vadd.f32 %v9024_v29, %v4453_v6 }
 0x4ab   : > { %v4458_v2 = vpop.f32.mrf.mxu1 }
 0x4ac   : > { %v6111_v15 = vpack.c.bf16 %v5163_v63, %v5162_v25  ;;  %v4810_v51 = vadd.f32 %v9034_v24, %v4457_v43  ;;  %v4459_v18 = vadd.f32 %v4458_v2, %v8994_v10  ;;  %v5037_v13 = vmul.f32 0.2, %v4806_v59 }
 0x4ad   : > { %v4460_v36 = vpop.f32.mrf.mxu1  ;;  %v5164_v35 = vmax.f32 %v4804_v26, %v5036_v27 }
 0x4ae   : > { %5646 = vst [vmem:[%s9020_s27 + $0xe0] sm:$0xff] %v6111_v15  ;;  %v5038_v57 = vmul.f32 0.2, %v4810_v51  ;;  %v4812_v33 = vadd.f32 %v9040_v39, %v4459_v18  ;;  %v4461_v21 = vadd.f32 %v4460_v36, %v8988_v4  ;;  %v5165_v38 = vmax.f32 %v4806_v59, %v5037_v13 }
 0x4af   : > { %v4462_v29 = vpop.f32.mrf.mxu1 }
 0x4b0   : > { %v5039_v53 = vmul.f32 0.2, %v4812_v33  ;;  %v4814_v1 = vadd.f32 %v9049_v17, %v4461_v21  ;;  %v4463_v24 = vadd.f32 %v4462_v29, %v8994_v10  ;;  %v6112_v44 = vpack.c.bf16 %v5165_v38, %v5164_v35 }
 0x4b1   : > { %v5166_v19 = vmax.f32 %v4810_v51, %v5038_v57  ;;  %v4466_v0 = vpop.f32.mrf.mxu1  ;;  %v9236_v20 = vpop.f32.mrf.mxu0 }
 0x4b2   : > { %v5167_v39 = vmax.f32 %v4812_v33, %v5039_v53  ;;  %v5040_v41 = vmul.f32 0.2, %v4814_v1  ;;  %v4816_v56 = vadd.f32 %v9057_v14, %v4463_v24  ;;  %v4467_v46 = vadd.f32 %v4466_v0, %v8988_v4  ;;  %5647 = vst [vmem:[%s9020_s27 + $0xe8] sm:$0xff] %v6112_v44 }
 0x4b3   : > { %v4468_v28 = vpop.f32.mrf.mxu1  ;;  %v9241_v11 = vpop.f32.mrf.mxu0 }
 0x4b4   : > { %v6113_v47 = vpack.c.bf16 %v5167_v39, %v5166_v19  ;;  %v5041_v17 = vmul.f32 0.2, %v4816_v56  ;;  %v4820_v37 = vadd.f32 %v9065_v5, %v4467_v46  ;;  %v4469_v31 = vadd.f32 %v4468_v28, %v8994_v10 }
 0x4b5   : > { %v4470_v26 = vpop.f32.mrf.mxu1  ;;  %v9245_v6 = vpop.f32.mrf.mxu0  ;;  %v5168_v55 = vmax.f32 %v4814_v1, %v5040_v41 }
 0x4b6   : > { %5648 = vst [vmem:[%s9020_s27 + $0xf0] sm:$0xff] %v6113_v47  ;;  %v5169_v25 = vmax.f32 %v4816_v56, %v5041_v17  ;;  %v4471_v14 = vadd.f32 %v4470_v26, %v8988_v4  ;;  %v5042_v63 = vmul.f32 0.2, %v4820_v37  ;;  %v4822_v43 = vadd.f32 %v9072_v30, %v4469_v31 }
 0x4b7   : > { %v4472_v27 = vpop.f32.mrf.mxu1  ;;  %v9250_v59 = vpop.f32.mrf.mxu0 }
 0x4b8   : > { %v6114_v2 = vpack.c.bf16 %v5169_v25, %v5168_v55  ;;  %v4824_v5 = vadd.f32 %v9082_v49, %v4471_v14  ;;  %v4473_v15 = vadd.f32 %v4472_v27, %v8994_v10  ;;  %v5043_v51 = vmul.f32 0.2, %v4822_v43 }
 0x4b9   : > { %v4476_v18 = vpop.f32.mrf.mxu1  ;;  %v9254_v13 = vpop.f32.mrf.mxu0  ;;  %v5170_v30 = vmax.f32 %v4820_v37, %v5042_v63 }
 0x4ba   : > { %5649 = vst [vmem:[%s9020_s27 + $0xf8] sm:$0xff] %v6114_v2  ;;  %v5044_v36 = vmul.f32 0.2, %v4824_v5  ;;  %v4826_v57 = vadd.f32 %v9088_v54, %v4473_v15  ;;  %v4477_v33 = vadd.f32 %v4476_v18, %v8988_v4  ;;  %v5171_v21 = vmax.f32 %v4822_v43, %v5043_v51 }
 0x4bb   : > { %v4478_v35 = vpop.f32.mrf.mxu1  ;;  %v9259_v38 = vpop.f32.mrf.mxu0 }
 0x4bc   : > { %v5045_v29 = vmul.f32 0.2, %v4826_v57  ;;  %v4830_v49 = vadd.f32 %v9097_v40, %v4477_v33  ;;  %v4479_v53 = vadd.f32 %v4478_v35, %v8994_v10  ;;  %v6115_v1 = vpack.c.bf16 %v5171_v21, %v5170_v30 }
 0x4bd   : > { %v5172_v24 = vmax.f32 %v4824_v5, %v5044_v36  ;;  %v4480_v44 = vpop.f32.mrf.mxu1  ;;  %v9263_v19 = vpop.f32.mrf.mxu0 }
 0x4be   : > { %v5173_v54 = vmax.f32 %v4826_v57, %v5045_v29  ;;  %v5046_v0 = vmul.f32 0.2, %v4830_v49  ;;  %v4832_v39 = vadd.f32 %v9105_v16, %v4479_v53  ;;  %v4481_v41 = vadd.f32 %v4480_v44, %v8988_v4  ;;  %5650 = vst [vmem:[%s9020_s27 + $0x100] sm:$0xff] %v6115_v1 }
 0x4bf   : > { %v4482_v56 = vpop.f32.mrf.mxu1  ;;  %v9268_v46 = vpop.f32.mrf.mxu0 }
 0x4c0   : > { %v6116_v28 = vpack.c.bf16 %v5173_v54, %v5172_v24  ;;  %v5047_v40 = vmul.f32 0.2, %v4832_v39  ;;  %v4834_v47 = vadd.f32 %v9112_v52, %v4481_v41  ;;  %v4483_v17 = vadd.f32 %v4482_v56, %v8994_v10 }
 0x4c1   : > { %v4486_v37 = vpop.f32.mrf.mxu1  ;;  %v9272_v31 = vpop.f32.mrf.mxu0  ;;  %v5174_v26 = vmax.f32 %v4830_v49, %v5046_v0 }
 0x4c2   : > { %5651 = vst [vmem:[%s9020_s27 + $0x108] sm:$0xff] %v6116_v28  ;;  %v5175_v55 = vmax.f32 %v4832_v39, %v5047_v40  ;;  %v4487_v16 = vadd.f32 %v4486_v37, %v8988_v4  ;;  %v5048_v25 = vmul.f32 0.2, %v4834_v47  ;;  %v4836_v14 = vadd.f32 %v9119_v61, %v4483_v17 }
 0x4c3   : > { %v4488_v63 = vpop.f32.mrf.mxu1  ;;  %v9277_v43 = vpop.f32.mrf.mxu0 }
 0x4c4   : > { %v6117_v27 = vpack.c.bf16 %v5175_v55, %v5174_v26  ;;  %v4840_v52 = vadd.f32 %v9127_v8, %v4487_v16  ;;  %v4489_v2 = vadd.f32 %v4488_v63, %v8994_v10  ;;  %v5049_v5 = vmul.f32 0.2, %v4836_v14 }
 0x4c5   : > { %v4490_v15 = vpop.f32.mrf.mxu1  ;;  %v9281_v51 = vpop.f32.mrf.mxu0  ;;  %v5176_v61 = vmax.f32 %v4834_v47, %v5048_v25 }
 0x4c6   : > { %5652 = vst [vmem:[%s9020_s27 + $0x110] sm:$0xff] %v6117_v27  ;;  %v5050_v18 = vmul.f32 0.2, %v4840_v52  ;;  %v4842_v36 = vadd.f32 %v9133_v3, %v4489_v2  ;;  %v4491_v57 = vadd.f32 %v4490_v15, %v8988_v4  ;;  %v5177_v33 = vmax.f32 %v4836_v14, %v5049_v5 }
 0x4c7   : > { %v4492_v30 = vpop.f32.mrf.mxu1  ;;  %v9286_v21 = vpop.f32.mrf.mxu0 }
 0x4c8   : > { %v5051_v35 = vmul.f32 0.2, %v4842_v36  ;;  %v4844_v8 = vadd.f32 %v9140_v62, %v4491_v57  ;;  %v4493_v29 = vadd.f32 %v4492_v30, %v8994_v10  ;;  %v6118_v49 = vpack.c.bf16 %v5177_v33, %v5176_v61 }
 0x4c9   : > { %v5178_v53 = vmax.f32 %v4840_v52, %v5050_v18  ;;  %v4496_v1 = vpop.f32.mrf.mxu1  ;;  %v9290_v24 = vpop.f32.mrf.mxu0 }
 0x4ca   : > { %v5179_v3 = vmax.f32 %v4842_v36, %v5051_v35  ;;  %v5052_v44 = vmul.f32 0.2, %v4844_v8  ;;  %v4846_v54 = vadd.f32 %v9148_v45, %v4493_v29  ;;  %v4497_v0 = vadd.f32 %v4496_v1, %v8988_v4  ;;  %5653 = vst [vmem:[%s9020_s27 + $0x118] sm:$0xff] %v6118_v49 }
 0x4cb   : > { %v4498_v39 = vpop.f32.mrf.mxu1  ;;  %v9295_v41 = vpop.f32.mrf.mxu0 }
 0x4cc   : > { %v6119_v56 = vpack.c.bf16 %v5179_v3, %v5178_v53  ;;  %v5053_v62 = vmul.f32 0.2, %v4846_v54  ;;  %v4850_v28 = vadd.f32 %v9154_v32, %v4497_v0  ;;  %v4499_v40 = vadd.f32 %v4498_v39, %v8994_v10 }
 0x4cd   : > { %v4500_v47 = vpop.f32.mrf.mxu1  ;;  %v9299_v17 = vpop.f32.mrf.mxu0  ;;  %v5180_v37 = vmax.f32 %v4844_v8, %v5052_v44 }
 0x4ce   : > { %5654 = vst [vmem:[%s9020_s27 + $0x120] sm:$0xff] %v6119_v56  ;;  %v5181_v26 = vmax.f32 %v4846_v54, %v5053_v62  ;;  %v4501_v45 = vadd.f32 %v4500_v47, %v8988_v4  ;;  %v5054_v55 = vmul.f32 0.2, %v4850_v28  ;;  %v4852_v16 = vadd.f32 %v9161_v12, %v4499_v40 }
 0x4cf   : > { %v4502_v25 = vpop.f32.mrf.mxu1  ;;  %v9306_v52 = vpop.f32.mrf.mxu0 }
 0x4d0   : > { %v6120_v14 = vpack.c.bf16 %v5181_v26, %v5180_v37  ;;  %v4854_v63 = vadd.f32 %v9169_v42, %v4501_v45  ;;  %v4503_v32 = vadd.f32 %v4502_v25, %v8994_v10  ;;  %v5055_v27 = vmul.f32 0.2, %v4852_v16 }
 0x4d1   : > { %v4506_v2 = vpop.f32.mrf.mxu1  ;;  %v5182_v36 = vmax.f32 %v4850_v28, %v5054_v55  ;;  %v9313_v8 = vpop.f32.mrf.mxu0 }
 0x4d2   : > { %5655 = vst [vmem:[%s9020_s27 + $0x128] sm:$0xff] %v6120_v14  ;;  %v5056_v5 = vmul.f32 0.2, %v4854_v63  ;;  %v4856_v15 = vadd.f32 %v9175_v50, %v4503_v32  ;;  %v4507_v18 = vadd.f32 %v4506_v2, %v8988_v4  ;;  %v5183_v57 = vmax.f32 %v4852_v16, %v5055_v27 }
 0x4d3   : > { %v4508_v12 = vpop.f32.mrf.mxu1  ;;  %v9319_v0 = vpop.f32.mrf.mxu0 }
 0x4d4   : > { %v5057_v61 = vmul.f32 0.2, %v4856_v15  ;;  %v4860_v33 = vadd.f32 %v9182_v60, %v4507_v18  ;;  %v4509_v42 = vadd.f32 %v4508_v12, %v8994_v10  ;;  %v6121_v30 = vpack.c.bf16 %v5183_v57, %v5182_v36 }
 0x4d5   : > { %v5184_v35 = vmax.f32 %v4854_v63, %v5056_v5  ;;  %v4510_v29 = vpop.f32.mrf.mxu1  ;;  %v9327_v55 = vpop.f32.mrf.mxu0 }
 0x4d6   : > { %v5185_v49 = vmax.f32 %v4856_v15, %v5057_v61  ;;  %v5058_v53 = vmul.f32 0.2, %v4860_v33  ;;  %v4862_v50 = vadd.f32 %v9190_v22, %v4509_v42  ;;  %v4511_v1 = vadd.f32 %v4510_v29, %v8988_v4  ;;  %5656 = vst [vmem:[%s9020_s27 + $0x130] sm:$0xff] %v6121_v30 }
 0x4d7   : > { %v4512_v3 = vpop.f32.mrf.mxu1  ;;  %v9334_v36 = vpop.f32.mrf.mxu0 }
 0x4d8   : > { %v6122_v44 = vpack.c.bf16 %v5185_v49, %v5184_v35  ;;  %v5059_v54 = vmul.f32 0.2, %v4862_v50  ;;  %v4864_v60 = vadd.f32 %v9196_v23, %v4511_v1  ;;  %v4513_v39 = vadd.f32 %v4512_v3, %v8994_v10 }
 0x4d9   : > { %v4516_v56 = vpop.f32.mrf.mxu1  ;;  %v5186_v62 = vmax.f32 %v4860_v33, %v5058_v53  ;;  %v9340_v49 = vpop.f32.mrf.mxu0 }
 0x4da   : > { %5657 = vst [vmem:[%s9020_s27 + $0x138] sm:$0xff] %v6122_v44  ;;  %v5187_v28 = vmax.f32 %v4862_v50, %v5059_v54  ;;  %v4517_v40 = vadd.f32 %v4516_v56, %v8988_v4  ;;  %v5060_v22 = vmul.f32 0.2, %v4864_v60  ;;  %v4866_v47 = vadd.f32 %v9203_v9, %v4513_v39 }
 0x4db   : > { %v4518_v37 = vpop.f32.mrf.mxu1 }
 0x4dc   : > { %v6123_v26 = vpack.c.bf16 %v5187_v28, %v5186_v62  ;;  %v4870_v45 = vadd.f32 %v9211_v34, %v4517_v40  ;;  %v4519_v23 = vadd.f32 %v4518_v37, %v8994_v10  ;;  %v5061_v16 = vmul.f32 0.2, %v4866_v47  ;;  %v9348_v62 = vpop.f32.mrf.mxu0 }
 0x4dd   : > { %v4520_v25 = vpop.f32.mrf.mxu1  ;;  %v5188_v27 = vmax.f32 %v4864_v60, %v5060_v22 }
 0x4de   : > { %5658 = vst [vmem:[%s9020_s27 + $0x140] sm:$0xff] %v6123_v26  ;;  %v5062_v14 = vmul.f32 0.2, %v4870_v45  ;;  %v4872_v63 = vadd.f32 %v9217_v58, %v4519_v23  ;;  %v4521_v32 = vadd.f32 %v4520_v25, %v8988_v4  ;;  %v5189_v2 = vmax.f32 %v4866_v47, %v5061_v16  ;;  %v9355_v25 = vpop.f32.mrf.mxu0 }
 0x4df   : > { %v4522_v9 = vpop.f32.mrf.mxu1 }
 0x4e0   : > { %v5063_v5 = vmul.f32 0.2, %v4872_v63  ;;  %v4874_v15 = vadd.f32 %v9224_v48, %v4521_v32  ;;  %v4523_v34 = vadd.f32 %v4522_v9, %v8994_v10  ;;  %v6124_v18 = vpack.c.bf16 %v5189_v2, %v5188_v27 }
 0x4e1   : > { %v5190_v57 = vmax.f32 %v4870_v45, %v5062_v14  ;;  %v4526_v12 = vpop.f32.mrf.mxu1 }
 0x4e2   : > { %v5191_v61 = vmax.f32 %v4872_v63, %v5063_v5  ;;  %v5064_v33 = vmul.f32 0.2, %v4874_v15  ;;  %v4876_v58 = vadd.f32 %v9232_v7, %v4523_v34  ;;  %v4527_v42 = vadd.f32 %v4526_v12, %v8988_v4  ;;  %5659 = vst [vmem:[%s9020_s27 + $0x148] sm:$0xff] %v6124_v18  ;;  %v9361_v18 = vpop.f32.mrf.mxu0 }
 0x4e3   : > { %v4528_v30 = vpop.f32.mrf.mxu1 }
 0x4e4   : > { %v6125_v35 = vpack.c.bf16 %v5191_v61, %v5190_v57  ;;  %v5065_v29 = vmul.f32 0.2, %v4876_v58  ;;  %v4880_v48 = vadd.f32 %v9236_v20, %v4527_v42  ;;  %v4529_v53 = vadd.f32 %v4528_v30, %v8994_v10 }
 0x4e5   : > { %v4530_v50 = vpop.f32.mrf.mxu1  ;;  %v5192_v1 = vmax.f32 %v4874_v15, %v5064_v33 }
 0x4e6   : > { %5660 = vst [vmem:[%s9020_s27 + $0x150] sm:$0xff] %v6125_v35  ;;  %v5193_v3 = vmax.f32 %v4876_v58, %v5065_v29  ;;  %v4531_v44 = vadd.f32 %v4530_v50, %v8988_v4  ;;  %v5066_v7 = vmul.f32 0.2, %v4880_v48  ;;  %v4882_v54 = vadd.f32 %v9241_v11, %v4529_v53 }
 0x4e7   : > { %v4532_v60 = vpop.f32.mrf.mxu1 }
 0x4e8   : > { %v6126_v39 = vpack.c.bf16 %v5193_v3, %v5192_v1  ;;  %v4884_v56 = vadd.f32 %v9245_v6, %v4531_v44  ;;  %v4533_v20 = vadd.f32 %v4532_v60, %v8994_v10  ;;  %v5067_v28 = vmul.f32 0.2, %v4882_v54 }
 0x4e9   : > { %v4536_v40 = vpop.f32.mrf.mxu1  ;;  %v5194_v26 = vmax.f32 %v4880_v48, %v5066_v7  ;;  %v9369_v48 = vpop.f32.mrf.mxu0 }
 0x4ea   : > { %5661 = vst [vmem:[%s9020_s27 + $0x158] sm:$0xff] %v6126_v39  ;;  %v5068_v22 = vmul.f32 0.2, %v4884_v56  ;;  %v4886_v47 = vadd.f32 %v9250_v59, %v4533_v20  ;;  %v4537_v37 = vadd.f32 %v4536_v40, %v8988_v4  ;;  %v5195_v45 = vmax.f32 %v4882_v54, %v5067_v28 }
 0x4eb   : > { %v4538_v11 = vpop.f32.mrf.mxu1 }
 0x4ec   : > { %v5069_v23 = vmul.f32 0.2, %v4886_v47  ;;  %v4890_v16 = vadd.f32 %v9254_v13, %v4537_v37  ;;  %v4539_v6 = vadd.f32 %v4538_v11, %v8994_v10  ;;  %v6127_v14 = vpack.c.bf16 %v5195_v45, %v5194_v26 }
 0x4ed   : > { %v5196_v63 = vmax.f32 %v4884_v56, %v5068_v22  ;;  %v4540_v32 = vpop.f32.mrf.mxu1  ;;  %v9376_v56 = vpop.f32.mrf.mxu0 }
 0x4ee   : > { %v5197_v27 = vmax.f32 %v4886_v47, %v5069_v23  ;;  %v5070_v2 = vmul.f32 0.2, %v4890_v16  ;;  %v4892_v59 = vadd.f32 %v9259_v38, %v4539_v6  ;;  %v4541_v9 = vadd.f32 %v4540_v32, %v8988_v4  ;;  %5662 = vst [vmem:[%s9020_s27 + $0x160] sm:$0xff] %v6127_v14 }
 0x4ef   : > { %v4542_v5 = vpop.f32.mrf.mxu1  ;;  %v9382_v23 = vpop.f32.mrf.mxu0 }
 0x4f0   : > { %v6128_v15 = vpack.c.bf16 %v5197_v27, %v5196_v63  ;;  %v5071_v34 = vmul.f32 0.2, %v4892_v59  ;;  %v4894_v13 = vadd.f32 %v9263_v19, %v4541_v9  ;;  %v4543_v57 = vadd.f32 %v4542_v5, %v8994_v10 }
 0x4f1   : > { %v4546_v12 = vpop.f32.mrf.mxu1  ;;  %v5198_v61 = vmax.f32 %v4890_v16, %v5070_v2  ;;  %v9390_v5 = vpop.f32.mrf.mxu0 }
 0x4f2   : > { %5663 = vst [vmem:[%s9020_s27 + $0x168] sm:$0xff] %v6128_v15  ;;  %v5199_v33 = vmax.f32 %v4892_v59, %v5071_v34  ;;  %v4547_v58 = vadd.f32 %v4546_v12, %v8988_v4  ;;  %v5072_v38 = vmul.f32 0.2, %v4894_v13  ;;  %v4896_v42 = vadd.f32 %v9268_v46, %v4543_v57 }
 0x4f3   : > { %v4548_v30 = vpop.f32.mrf.mxu1 }
 0x4f4   : > { %v6129_v35 = vpack.c.bf16 %v5199_v33, %v5198_v61  ;;  %v4900_v29 = vadd.f32 %v9272_v31, %v4547_v58  ;;  %v4549_v19 = vadd.f32 %v4548_v30, %v8994_v10  ;;  %v5073_v53 = vmul.f32 0.2, %v4896_v42 }
 0x4f5   : > { %v4550_v50 = vpop.f32.mrf.mxu1  ;;  %v5200_v7 = vmax.f32 %v4894_v13, %v5072_v38 }
 0x4f6   : > { %5664 = vst [vmem:[%s9020_s27 + $0x170] sm:$0xff] %v6129_v35  ;;  %v5074_v1 = vmul.f32 0.2, %v4900_v29  ;;  %v4902_v3 = vadd.f32 %v9277_v43, %v4549_v19  ;;  %v4551_v44 = vadd.f32 %v4550_v50, %v8988_v4  ;;  %v5201_v54 = vmax.f32 %v4896_v42, %v5073_v53  ;;  %v9397_v42 = vpop.f32.mrf.mxu0 }
 0x4f7   : > { %v4552_v46 = vpop.f32.mrf.mxu1 }
 0x4f8   : > { %v5075_v60 = vmul.f32 0.2, %v4902_v3  ;;  %v4904_v39 = vadd.f32 %v9281_v51, %v4551_v44  ;;  %v4553_v31 = vadd.f32 %v4552_v46, %v8994_v10  ;;  %v6130_v20 = vpack.c.bf16 %v5201_v54, %v5200_v7  ;;  %v9403_v7 = vpop.f32.mrf.mxu0 }
 0x4f9   : > { %v5202_v28 = vmax.f32 %v4900_v29, %v5074_v1  ;;  %v4556_v40 = vpop.f32.mrf.mxu1 }
 0x4fa   : > { %v5203_v22 = vmax.f32 %v4902_v3, %v5075_v60  ;;  %v5076_v47 = vmul.f32 0.2, %v4904_v39  ;;  %v4906_v43 = vadd.f32 %v9286_v21, %v4553_v31  ;;  %v4557_v37 = vadd.f32 %v4556_v40, %v8988_v4  ;;  %5665 = vst [vmem:[%s9020_s27 + $0x178] sm:$0xff] %v6130_v20 }
 0x4fb   : > { %v4558_v26 = vpop.f32.mrf.mxu1 }
 0x4fc   : > { %v6131_v45 = vpack.c.bf16 %v5203_v22, %v5202_v28  ;;  %v5077_v11 = vmul.f32 0.2, %v4906_v43  ;;  %v4910_v51 = vadd.f32 %v9290_v24, %v4557_v37  ;;  %v4559_v16 = vadd.f32 %v4558_v26, %v8994_v10 }
 0x4fd   : > { %v4560_v6 = vpop.f32.mrf.mxu1  ;;  %v5204_v14 = vmax.f32 %v4904_v39, %v5076_v47  ;;  %v9411_v47 = vpop.f32.mrf.mxu0 }
 0x4fe   : > { %5666 = vst [vmem:[%s9020_s27 + $0x180] sm:$0xff] %v6131_v45  ;;  %v5205_v63 = vmax.f32 %v4906_v43, %v5077_v11  ;;  %v4561_v32 = vadd.f32 %v4560_v6, %v8988_v4  ;;  %v5078_v21 = vmul.f32 0.2, %v4910_v51  ;;  %v4912_v27 = vadd.f32 %v9295_v41, %v4559_v16 }
 0x4ff   : > { %v4562_v2 = vpop.f32.mrf.mxu1 }
 0x500   : > { %v6132_v59 = vpack.c.bf16 %v5205_v63, %v5204_v14  ;;  %v4914_v9 = vadd.f32 %v9299_v17, %v4561_v32  ;;  %v4563_v24 = vadd.f32 %v4562_v2, %v8994_v10  ;;  %v5079_v15 = vmul.f32 0.2, %v4912_v27  ;;  %v4955_v63 = vpop.f32.mrf.mxu0 }
 0x501   : > { %v4566_v34 = vpop.f32.mrf.mxu1  ;;  %v5206_v61 = vmax.f32 %v4910_v51, %v5078_v21 }
 0x502   : > { %5667 = vst [vmem:[%s9020_s27 + $0x188] sm:$0xff] %v6132_v59  ;;  %v5080_v13 = vmul.f32 0.2, %v4914_v9  ;;  %v4916_v57 = vadd.f32 %v9306_v52, %v4563_v24  ;;  %v4567_v12 = vadd.f32 %v4566_v34, %v8988_v4  ;;  %v5207_v33 = vmax.f32 %v4912_v27, %v5079_v15 }
 0x503   : > { %v4568_v41 = vpop.f32.mrf.mxu1 }
 0x504   : > { %v5081_v58 = vmul.f32 0.2, %v4916_v57  ;;  %v4920_v38 = vadd.f32 %v9313_v8, %v4567_v12  ;;  %v4569_v17 = vadd.f32 %v4568_v41, %v8994_v10  ;;  %v6133_v30 = vpack.c.bf16 %v5207_v33, %v5206_v61 }
 0x505   : > { %v5208_v35 = vmax.f32 %v4914_v9, %v5080_v13  ;;  %v4570_v29 = vpop.f32.mrf.mxu1 }
 0x506   : > { %v5209_v19 = vmax.f32 %v4916_v57, %v5081_v58  ;;  %v5082_v53 = vmul.f32 0.2, %v4920_v38  ;;  %v4922_v52 = vadd.f32 %v9319_v0, %v4569_v17  ;;  %v4571_v50 = vadd.f32 %v4570_v29, %v8988_v4  ;;  %5668 = vst [vmem:[%s9020_s27 + $0x190] sm:$0xff] %v6133_v30 }
 0x507   : > { %v4572_v1 = vpop.f32.mrf.mxu1 }
 0x508   : > { %v6134_v3 = vpack.c.bf16 %v5209_v19, %v5208_v35  ;;  %v5083_v44 = vmul.f32 0.2, %v4922_v52  ;;  %v4924_v8 = vadd.f32 %v9327_v55, %v4571_v50  ;;  %v4573_v54 = vadd.f32 %v4572_v1, %v8994_v10 }
 0x509   : > { %v4576_v46 = vpop.f32.mrf.mxu1  ;;  %v5210_v60 = vmax.f32 %v4920_v38, %v5082_v53 }
 0x50a   : > { %5669 = vst [vmem:[%s9020_s27 + $0x198] sm:$0xff] %v6134_v3  ;;  %v5211_v39 = vmax.f32 %v4922_v52, %v5083_v44  ;;  %v4577_v31 = vadd.f32 %v4576_v46, %v8988_v4  ;;  %v5084_v0 = vmul.f32 0.2, %v4924_v8  ;;  %v4926_v20 = vadd.f32 %v9334_v36, %v4573_v54 }
 0x50b   : > { %v4578_v28 = vpop.f32.mrf.mxu1 }
 0x50c   : > { %v6135_v40 = vpack.c.bf16 %v5211_v39, %v5210_v60  ;;  %v4930_v22 = vadd.f32 %v9340_v49, %v4577_v31  ;;  %v4579_v55 = vadd.f32 %v4578_v28, %v8994_v10  ;;  %v5085_v43 = vmul.f32 0.2, %v4926_v20 }
 0x50d   : > { %v4580_v37 = vpop.f32.mrf.mxu1  ;;  %v5212_v51 = vmax.f32 %v4924_v8, %v5084_v0 }
 0x50e   : > { %5670 = vst [vmem:[%s9020_s27 + $0x1a0] sm:$0xff] %v6135_v40  ;;  %v5086_v26 = vmul.f32 0.2, %v4930_v22  ;;  %v4932_v45 = vadd.f32 %v9348_v62, %v4579_v55  ;;  %v4581_v11 = vadd.f32 %v4580_v37, %v8988_v4  ;;  %v5213_v16 = vmax.f32 %v4926_v20, %v5085_v43 }
 0x50f   : > { %v4582_v36 = vpop.f32.mrf.mxu1 }
 0x510   : > { %v5087_v6 = vmul.f32 0.2, %v4932_v45  ;;  %v4934_v14 = vadd.f32 %v9355_v25, %v4581_v11  ;;  %v4583_v49 = vadd.f32 %v4582_v36, %v8994_v10  ;;  %v6136_v32 = vpack.c.bf16 %v5213_v16, %v5212_v51  ;;  %v4959_v25 = vpop.f32.mrf.mxu0 }
 0x511   : > { %v5214_v21 = vmax.f32 %v4930_v22, %v5086_v26  ;;  %v4586_v27 = vpop.f32.mrf.mxu1 }
 0x512   : > { %v5215_v2 = vmax.f32 %v4932_v45, %v5087_v6  ;;  %v5088_v59 = vmul.f32 0.2, %v4934_v14  ;;  %v4936_v62 = vadd.f32 %v9361_v18, %v4583_v49  ;;  %v4587_v9 = vadd.f32 %v4586_v27, %v8988_v4  ;;  %5671 = vst [vmem:[%s9020_s27 + $0x1a8] sm:$0xff] %v6136_v32 }
 0x513   : > { %v4588_v24 = vpop.f32.mrf.mxu1 }
 0x514   : > { %v6137_v15 = vpack.c.bf16 %v5215_v2, %v5214_v21  ;;  %v5089_v34 = vmul.f32 0.2, %v4936_v62  ;;  %v4940_v13 = vadd.f32 %v9369_v48, %v4587_v9  ;;  %v4589_v57 = vadd.f32 %v4588_v24, %v8994_v10  ;;  %v4961_v48 = vpop.f32.mrf.mxu0 }
 0x515   : > { %v4590_v12 = vpop.f32.mrf.mxu1  ;;  %v5216_v61 = vmax.f32 %v4934_v14, %v5088_v59 }
 0x516   : > { %5672 = vst [vmem:[%s9020_s27 + $0x1b0] sm:$0xff] %v6137_v15  ;;  %v5217_v33 = vmax.f32 %v4936_v62, %v5089_v34  ;;  %v4591_v41 = vadd.f32 %v4590_v12, %v8988_v4  ;;  %v5090_v58 = vmul.f32 0.2, %v4940_v13  ;;  %v4942_v18 = vadd.f32 %v9376_v56, %v4589_v57  ;;  %v4963_v54 = vpop.f32.mrf.mxu0 }
 0x517   : > { %v4592_v38 = vpop.f32.mrf.mxu1 }
 0x518   : > { %v6138_v17 = vpack.c.bf16 %v5217_v33, %v5216_v61  ;;  %v4944_v30 = vadd.f32 %v9382_v23, %v4591_v41  ;;  %v4593_v35 = vadd.f32 %v4592_v38, %v8994_v10  ;;  %v5091_v29 = vmul.f32 0.2, %v4942_v18 }
 0x519   : > { %v4596_v19 = vpop.f32.mrf.mxu1  ;;  %v5218_v1 = vmax.f32 %v4940_v13, %v5090_v58 }
 0x51a   : > { %5673 = vst [vmem:[%s9020_s27 + $0x1b8] sm:$0xff] %v6138_v17  ;;  %v5092_v53 = vmul.f32 0.2, %v4944_v30  ;;  %v4946_v52 = vadd.f32 %v9390_v5, %v4593_v35  ;;  %v4597_v50 = vadd.f32 %v4596_v19, %v8988_v4  ;;  %v5219_v3 = vmax.f32 %v4942_v18, %v5091_v29 }
 0x51b   : > { %v4598_v44 = vpop.f32.mrf.mxu1 }
 0x51c   : > { %v5093_v56 = vmul.f32 0.2, %v4946_v52  ;;  %v4950_v8 = vadd.f32 %v9397_v42, %v4597_v50  ;;  %v4599_v23 = vadd.f32 %v4598_v44, %v8994_v10  ;;  %v6139_v46 = vpack.c.bf16 %v5219_v3, %v5218_v1  ;;  %v4965_v42 = vpop.f32.mrf.mxu0 }
 0x51d   : > { %v5220_v60 = vmax.f32 %v4944_v30, %v5092_v53  ;;  %v4600_v39 = vpop.f32.mrf.mxu1 }
 0x51e   : > { %v5221_v31 = vmax.f32 %v4946_v52, %v5093_v56  ;;  %v5094_v0 = vmul.f32 0.2, %v4950_v8  ;;  %v4952_v5 = vadd.f32 %v9403_v7, %v4599_v23  ;;  %v4601_v20 = vadd.f32 %v4600_v39, %v8988_v4  ;;  %5674 = vst [vmem:[%s9020_s27 + $0x1c0] sm:$0xff] %v6139_v46  ;;  %v4969_v49 = vpop.f32.mrf.mxu0 }
 0x51f   : > { %v4602_v28 = vpop.f32.mrf.mxu1 }
 0x520   : > { %v6140_v40 = vpack.c.bf16 %v5221_v31, %v5220_v60  ;;  %v5095_v22 = vmul.f32 0.2, %v4952_v5  ;;  %v4954_v55 = vadd.f32 %v9411_v47, %v4601_v20  ;;  %v4603_v43 = vadd.f32 %v4602_v28, %v8994_v10  ;;  %v4971_v34 = vpop.f32.mrf.mxu0 }
 0x521   : > { %v4606_v37 = vpop.f32.mrf.mxu1  ;;  %v5222_v26 = vmax.f32 %v4950_v8, %v5094_v0 }
 0x522   : > { %5675 = vst [vmem:[%s9020_s27 + $0x1c8] sm:$0xff] %v6140_v40  ;;  %v5223_v45 = vmax.f32 %v4952_v5, %v5095_v22  ;;  %v4607_v11 = vadd.f32 %v4606_v37, %v8988_v4  ;;  %v5096_v51 = vmul.f32 0.2, %v4954_v55  ;;  %v4956_v7 = vadd.f32 %v4955_v63, %v4603_v43  ;;  %v4973_v30 = vpop.f32.mrf.mxu0 }
 0x523   : > { %v4608_v16 = vpop.f32.mrf.mxu1 }
 0x524   : > { %v6141_v36 = vpack.c.bf16 %v5223_v45, %v5222_v26  ;;  %v4960_v6 = vadd.f32 %v4959_v25, %v4607_v11  ;;  %v4609_v14 = vadd.f32 %v4608_v16, %v8994_v10  ;;  %v5097_v32 = vmul.f32 0.2, %v4956_v7  ;;  %v4975_v8 = vpop.f32.mrf.mxu0 }
 0x525   : > { %v4610_v47 = vpop.f32.mrf.mxu1  ;;  %v5224_v59 = vmax.f32 %v4954_v55, %v5096_v51 }
 0x526   : > { %5676 = vst [vmem:[%s9020_s27 + $0x1d0] sm:$0xff] %v6141_v36  ;;  %v5098_v21 = vmul.f32 0.2, %v4960_v6  ;;  %v4962_v27 = vadd.f32 %v4961_v48, %v4609_v14  ;;  %v4611_v2 = vadd.f32 %v4610_v47, %v8988_v4  ;;  %v5225_v62 = vmax.f32 %v4956_v7, %v5097_v32 }
 0x527   : > { %v4612_v9 = vpop.f32.mrf.mxu1 }
 0x528   : > { %v5099_v24 = vmul.f32 0.2, %v4962_v27  ;;  %v4964_v15 = vadd.f32 %v4963_v54, %v4611_v2  ;;  %v4613_v63 = vadd.f32 %v4612_v9, %v8994_v10  ;;  %v6142_v13 = vpack.c.bf16 %v5225_v62, %v5224_v59 }
 0x529   : > { %v5226_v25 = vmax.f32 %v4960_v6, %v5098_v21  ;;  %v4616_v57 = vpop.f32.mrf.mxu1 }
 0x52a   : > { %v5227_v12 = vmax.f32 %v4962_v27, %v5099_v24  ;;  %v5100_v61 = vmul.f32 0.2, %v4964_v15  ;;  %v4966_v33 = vadd.f32 %v4965_v42, %v4613_v63  ;;  %v4617_v41 = vadd.f32 %v4616_v57, %v8988_v4  ;;  %5677 = vst [vmem:[%s9020_s27 + $0x1d8] sm:$0xff] %v6142_v13 }
 0x52b   : > { %v4618_v58 = vpop.f32.mrf.mxu1 }
 0x52c   : > { %v6143_v18 = vpack.c.bf16 %v5227_v12, %v5226_v25  ;;  %v5101_v38 = vmul.f32 0.2, %v4966_v33  ;;  %v4970_v17 = vadd.f32 %v4969_v49, %v4617_v41  ;;  %v4619_v35 = vadd.f32 %v4618_v58, %v8994_v10 }
 0x52d   : > { %v4620_v48 = vpop.f32.mrf.mxu1  ;;  %v5228_v29 = vmax.f32 %v4964_v15, %v5100_v61 }
 0x52e   : > { %5678 = vst [vmem:[%s9020_s27 + $0x1e0] sm:$0xff] %v6143_v18  ;;  %v5229_v19 = vmax.f32 %v4966_v33, %v5101_v38  ;;  %v4621_v53 = vadd.f32 %v4620_v48, %v8988_v4  ;;  %v5102_v52 = vmul.f32 0.2, %v4970_v17  ;;  %v4972_v50 = vadd.f32 %v4971_v34, %v4619_v35 }
 0x52f   : > { %v4622_v1 = vpop.f32.mrf.mxu1 }
 0x530   : > { %v6144_v3 = vpack.c.bf16 %v5229_v19, %v5228_v29  ;;  %v4974_v44 = vadd.f32 %v4973_v30, %v4621_v53  ;;  %v4623_v56 = vadd.f32 %v4622_v1, %v8994_v10  ;;  %v5103_v23 = vmul.f32 0.2, %v4972_v50 }
 0x531   : > { %v5230_v60 = vmax.f32 %v4970_v17, %v5102_v52 }
 0x532   : > { %5679 = vst [vmem:[%s9020_s27 + $0x1e8] sm:$0xff] %v6144_v3  ;;  %v5104_v54 = vmul.f32 0.2, %v4974_v44  ;;  %v4976_v46 = vadd.f32 %v4975_v8, %v4623_v56  ;;  %v5231_v39 = vmax.f32 %v4972_v50, %v5103_v23 }
 0x534   : > { %v5105_v31 = vmul.f32 0.2, %v4976_v46  ;;  %v6145_v0 = vpack.c.bf16 %v5231_v39, %v5230_v60  ;;  %v5232_v4 = vmax.f32 %v4974_v44, %v5104_v54 }
 0x536   : > { %v5233_v5 = vmax.f32 %v4976_v46, %v5105_v31  ;;  %5680 = vst [vmem:[%s9020_s27 + $0x1f0] sm:$0xff] %v6145_v0  ;;  %5689 = sbr.rel (!%p6871_p5) target bundleno = 1366 (0x556), region = 60 }
 0x538   : > { %v6146_v20 = vpack.c.bf16 %v5233_v5, %v5232_v4 }
 0x53a   : > { %5681 = vst [vmem:[%s9020_s27 + $0x1f8] sm:$0xff] %v6146_v20 }
 0x53b   : > { %s9674_s14 = smov (!%p5692_p11, %s5691_s14), 64 }
 0x53c   : > { %s9460_s17 = sshll.u32 %s9674_s14, 7 }
 0x53d   : > { %s5697_s28 = ssub.s32 8192, %s9460_s17 }
 0x53e   : > { %5698 = vsyncadd %s9455_s29, %s5697_s28  ;;  %p6075_p12 = scmp.ne.s32.totalorder %s9460_s17, 0  ;;  %s6149_s21 = sshll.u32 %s6854_s13, 13 }
 0x53f   : > { %s9469_s22 = scalar_lea.hbm %s9524_s9, %s6149_s21  ;;  %s5704_s16 = sshll.u32 %s9020_s27, 4  ;;  %s9472_s16 = int_to_ptr.vmem [resolvable:$true] %s5704_s16 }
 0x540   : > { %s6718_s24 = scalar_lea.vmem %s9472_s16, %s9460_s17  ;;  %s6780_s25 = smov [#allocation2]  }
 0x541   : > { %p6719_p13 = scmp.ne.s32.totalorder %s9472_s16, %s6718_s24  ;;  %s6722_s26 = sshll.u32 %s6780_s25, 4  ;;  %s6723_s26 = int_to_ptr.vmem [resolvable:$false] %s6722_s26 }
 0x542   : > { %s6724_s13 = scalar_lea.vmem %s6723_s26, 16384  ;;  %p6725_p2 = scmp.lt.s32.totalorder %s9472_s16, %s6723_s26 }
 0x543   : > { %p6720_p0 = pnand %p6719_p13, %p6075_p12  ;;  %p6726_p3 = scmp.lt.s32.totalorder %s6724_s13, %s6718_s24 }
 0x545   : > { %p6721_p1 = pneg %p6720_p0  ;;  %p6727_p4 = por %p6726_p3, %p6725_p2 }
 0x547   : > { %p6728_p5 = pnand %p6727_p4, %p6721_p1 }
 0x549   : > { %6731 = shalt.err (!%p6728_p5)
}
 0x54a   : > { %s6732_s27 = scalar_lea.hbm %s9469_s22, %s9460_s17  ;;  %s6736_s21 = scalar_lea.hbm %s9524_s9, 32000 }
 0x54b   : > { %p6733_p7 = scmp.ne.s32.totalorder %s9469_s22, %s6732_s27  ;;  %p6737_p10 = scmp.lt.s32.totalorder %s9469_s22, %s9524_s9 }
 0x54c   : > { %p6738_p11 = scmp.lt.s32.totalorder %s6736_s21, %s6732_s27 }
 0x54d   : > { %p6734_p8 = pnand %p6733_p7, %p6075_p12 }
 0x54e   : > { %p6739_p13 = por %p6738_p11, %p6737_p10 }
 0x54f   : > { %p6735_p9 = pneg %p6734_p8 }
 0x551   : > { %p6740_p0 = pnand %p6739_p13, %p6735_p9 }
 0x553   : > { %6743 = shalt.err (!%p6740_p0)
}
 0x554   : > { %s6781_s24 = smov 128   ;;  %s6782_s25 = smov 8  }
 0x555   : > { %5710 = dma.vmem_to_hbm [thread:$0]  (%p6075_p12), %s9472_s16, %s9460_s17, %s9469_s22, %s9455_s29, %s6781_s24, %s6781_s24, %s6782_s25  }
 0x556 PF: > { %p6307_p1 = scmp.ge.s32.totalorder %s6778_s12, 2  ;;  %s5719_s26 = sand.u32 1, %s6766_s30  }
 0x557   : > { %s5720_s13 = scalar_lea.sflag [#allocation3], %s5719_s26 }
 0x558   : > { %p6304_p2 = pnand %p6307_p1, %p6875_p6 }
 0x55a   : > { %p6305_p3 = pneg %p6304_p2 }
 0x55c   : > { %6761 = dma.done.wait (%p6305_p3), %s5720_s13, 8192  }
 0x55d   : > { %6763 = vsyncadd (%p6305_p3), %s5720_s13, 4294959104  ;;  %p19_p4 = scmp.ge.s32.totalorder %s6858_s15, 6   ;;  %s9669_s30 = smov %s6770_s10 }
 0x55e   : > { %s9670_s10 = smov %s6774_s11  ;;  %s9671_s11 = smov %s6869_s18 }
 0x55f   : > { %s9672_s12 = smov %s6858_s15  ;;  %21 = sbr.rel (!%p19_p4) target bundleno = 3 (0x3), region = 91 }
 0x564   :  { %5725 = vsyncpa [#allocation3], 1 }
 0x565   :  { %5727 = vsyncpa [#allocation3 + $0x1], 1 }

</bundles_post_ra>
